<compile_context>
chip_gen: v5e
topology: v5e:2x2
jax: 0.10.0
libtpu: 0.0.40
codegen_flags: <defaults>
</compile_context>

<pallas_src>
import math

import numpy as np

import jax
import jax.numpy as jnp
from jax.experimental import pallas as pl
from jax.experimental.pallas import tpu as pltpu


# ----------------------------------------------------------------------------
# Packed-parameter row offsets (every segment padded to a multiple of 8 rows)
# ----------------------------------------------------------------------------
# packA: every 128-lane parameter
A_C1W, A_C1B = 0, 128           # conv1 weight (75 rows used) / bias
A_C2W, A_C2B = 136, 1288        # conv2 weight (1152 rows)    / bias
A_M1W, A_M1B = 1296, 1496       # mlp Linear(200,100) weight / bias (lanes 0..99)
A_OW,  A_OB  = 1504, 1704       # output LazyLinear(7) weight / bias (lanes 0..6)
A_MSK        = 1712             # 9 taps x 40 rows (36 used) conv2 validity masks
A_ROWS       = A_MSK + 9 * 40   # 2072

# packB: every 200-lane parameter
B_LLW, B_LLB = 0, 640           # ll weight (512 img-permuted + 16 data + pad) / bias
B_M2W, B_M2B = 648, 776         # mlp Linear(100,200) weight (rows 0..99) / bias
B_ROWS       = 784


# ----------------------------------------------------------------------------
# The fused forward kernel
# ----------------------------------------------------------------------------
def _fused_forward_kernel(p1_ref, data_ref, pa_ref, pb_ref, o_ref,
                          y1e_ref, pat2_ref, z2_ref, cat_ref):
    f32 = jnp.float32
    N = data_ref.shape[0]
    G = N * 36                                    # conv spatial positions (6x6 / sample)

    # ---- stage 1: Conv2d(3->25, 5, 'same') + bias + MaxPool(3) + ReLU -------
    # p1 stacks the 9 pool-window-shifted im2col slabs along rows: one tall MXU
    # matmul, then a running max over the slabs (bias/ReLU commute with max).
    z1 = jnp.dot(p1_ref[...], pa_ref[A_C1W:A_C1W + 128, :],
                 preferred_element_type=f32)                        # (9G, 128)
    m = z1[0:G, :]
    for p in range(1, 9):
        m = jnp.maximum(m, z1[p * G:(p + 1) * G, :])
    y1 = jnp.maximum(m + pa_ref[A_C1B:A_C1B + 1, :], 0.0)           # (G, 128) rows=(n,h,w)

    # ---- stage 2: Conv2d(25->50, 3, 'same') + bias + MaxPool(3) + ReLU ------
    # Build conv2's im2col entirely in VMEM: y1 is (n, h, w)-row-major, so each
    # 3x3 tap is a static row shift d of a zero-aproned copy of y1; rows that
    # fall outside the 6x6 image are killed by precomputed 0/1 masks.
    y1e_ref[...] = jnp.zeros(y1e_ref.shape, f32)
    y1e_ref[8:8 + G, :] = y1
    for kh in range(3):
        for kw in range(3):
            t = kh * 3 + kw
            d = (kh - 1) * 6 + (kw - 1)
            mt = pa_ref[A_MSK + 40 * t:A_MSK + 40 * t + 36, :]      # (36, 128)
            for n in range(N):
                src = y1e_ref[8 + n * 36 + d:8 + n * 36 + d + 36, :]
                pat2_ref[n * 36:(n + 1) * 36, t * 128:(t + 1) * 128] = src * mt
    z2_ref[...] = jnp.dot(pat2_ref[...], pa_ref[A_C2W:A_C2W + 1152, :],
                          preferred_element_type=f32)               # (G, 128)

    # MaxPool(3) + bias + ReLU, writing each pooled position straight into the
    # lane offset of the concat buffer that nn.Flatten expects (the ll weight
    # rows were permuted at init to match this (spatial, padded-channel) order).
    b2 = pa_ref[A_C2B:A_C2B + 1, :]
    for n in range(N):
        for hb in range(2):
            for wb in range(2):
                rows = [n * 36 + (3 * hb + dh) * 6 + 3 * wb + dw
                        for dh in range(3) for dw in range(3)]
                g = z2_ref[rows[0]:rows[0] + 1, :]
                for r in rows[1:]:
                    g = jnp.maximum(g, z2_ref[r:r + 1, :])
                s = hb * 2 + wb
                cat_ref[n:n + 1, s * 128:(s + 1) * 128] = jnp.maximum(g + b2, 0.0)
    cat_ref[:, 512:640] = data_ref[...]           # data features (zero-padded to 128)

    # ---- dense head: ll -> (mlp + res) -> (mlp + res) -> output -------------
    x = (jnp.dot(cat_ref[...], pb_ref[B_LLW:B_LLW + 640, :],
                 preferred_element_type=f32) + pb_ref[B_LLB:B_LLB + 1, :])
    res = x                                        # both residual adds reuse ll output
    w1m = pa_ref[A_M1W:A_M1W + 200, :]
    b1m = pa_ref[A_M1B:A_M1B + 1, :]
    w2m = pb_ref[B_M2W:B_M2W + 128, :]
    b2m = pb_ref[B_M2B:B_M2B + 1, :]
    for _ in range(2):
        h = jnp.maximum(jnp.dot(x, w1m, preferred_element_type=f32) + b1m, 0.0)
        x = jnp.dot(h, w2m, preferred_element_type=f32) + b2m + res
    o_ref[...] = (jnp.dot(x, pa_ref[A_OW:A_OW + 200, :],
                          preferred_element_type=f32) + pa_ref[A_OB:A_OB + 1, :])


# ----------------------------------------------------------------------------
# Layout glue (plain JAX, fuses under jit before the single pallas_call)
# ----------------------------------------------------------------------------
def _conv1_patches(img):
    """Im2col for conv1, arranged by pool-window position.

    Returns (9 * N*36, 128): nine row slabs (one per MaxPool(3) window offset);
    each slab's rows are the pooled output positions (n, ho, wo) and its 128
    lanes are the zero-padded (kh, kw, cin) contraction (75 real entries).
    """
    # TODO(synk): this strided window gather stays as plain-JAX glue; it is not
    # cleanly expressible as a BlockSpec index_map at these shapes.
    x = img.transpose(0, 2, 3, 1)                                   # NCHW -> NHWC
    N, H, W, C = x.shape
    k, pool, pad = 5, 3, 2
    Ho, Wo = H // pool, W // pool
    xp = jnp.pad(x, ((0, 0), (pad, pad), (pad, pad), (0, 0)))
    cols = [xp[:, kh:kh + H, kw:kw + W, :] for kh in range(k) for kw in range(k)]
    p = jnp.stack(cols, axis=3)                                     # (N,H,W,25,C)
    p = p.reshape(N, Ho, pool, Wo, pool, k * k * C)
    p = p.transpose(2, 4, 0, 1, 3, 5)                               # (dh,dw,N,Ho,Wo,K)
    p = p.reshape(pool * pool * N * Ho * Wo, k * k * C)
    return jnp.pad(p, ((0, 0), (0, 128 - k * k * C)))               # pad K 75 -> 128


# ----------------------------------------------------------------------------
# Parameters (deterministic PyTorch-style uniform(+-1/sqrt(fan_in)) init),
# packed once into two kernel-layout buffers -> 2 parameter DMAs per forward.
# ----------------------------------------------------------------------------
def _uniform(key, shape, fan_in):
    bound = 1.0 / math.sqrt(fan_in)
    return jax.random.uniform(key, shape, jnp.float32, -bound, bound)


def init_params(key, data_dim=16):
    ks = jax.random.split(key, 12)
    f32 = jnp.float32
    pa = jnp.zeros((A_ROWS, 128), f32)
    pb = jnp.zeros((B_ROWS, 200), f32)

    # conv1: torch (25,3,5,5) -> rows (kh,kw,cin), cols = out channels (padded)
    w = _uniform(ks[0], (25, 3, 5, 5), 3 * 5 * 5)
    w = jnp.transpose(w, (2, 3, 1, 0)).reshape(75, 25)
    pa = pa.at[A_C1W:A_C1W + 75, :25].set(w)
    pa = pa.at[A_C1B, :25].set(_uniform(ks[1], (25,), 3 * 5 * 5))

    # conv2: torch (50,25,3,3) -> rows (kh,kw,cin padded to 128), cols padded
    w = _uniform(ks[2], (50, 25, 3, 3), 25 * 3 * 3)
    w = jnp.transpose(w, (2, 3, 1, 0))                              # (3,3,25,50)
    w = jnp.pad(w, ((0, 0), (0, 0), (0, 103), (0, 78))).reshape(1152, 128)
    pa = pa.at[A_C2W:A_C2W + 1152, :].set(w)
    pa = pa.at[A_C2B, :50].set(_uniform(ks[3], (50,), 25 * 3 * 3))

    # mlp: Linear(200,100) / Linear(100,200)  (hidden padded to 128 lanes)
    pa = pa.at[A_M1W:A_M1W + 200, :100].set(_uniform(ks[6], (200, 100), 200))
    pa = pa.at[A_M1B, :100].set(_uniform(ks[7], (100,), 200))
    pb = pb.at[B_M2W:B_M2W + 100, :].set(_uniform(ks[8], (100, 200), 100))
    pb = pb.at[B_M2B, :].set(_uniform(ks[9], (200,), 100))

    # output: LazyLinear(7), padded to 128 output lanes (wrapper slices [:7])
    pa = pa.at[A_OW:A_OW + 200, :7].set(_uniform(ks[10], (200, 7), 200))
    pa = pa.at[A_OB, :7].set(_uniform(ks[11], (7,), 200))

    # conv2 tap-validity masks (pre-broadcast to 128 lanes): row r of tap
    # (kh,kw) is 1 iff output position (h=r//6, w=r%6) reads inside the image.
    msk = np.zeros((9 * 40, 128), np.float32)
    for kh in range(3):
        for kw in range(3):
            for r in range(36):
                h2, w2 = r // 6, r % 6
                if 0 <= h2 + kh - 1 < 6 and 0 <= w2 + kw - 1 < 6:
                    msk[(kh * 3 + kw) * 40 + r, :] = 1.0
    pa = pa.at[A_MSK:A_MSK + 9 * 40, :].set(jnp.asarray(msk))

    # ll: LazyLinear(200), in = 200 (flattened NCHW conv output) + data_dim.
    # Image rows are permuted so the kernel's native flat layout (lane =
    # spatial*128 + padded channel) matches nn.Flatten's c*4 + spatial order.
    ll_in = 200 + data_dim
    llw = _uniform(ks[4], (ll_in, 200), ll_in)
    w_img = jnp.transpose(llw[:200].reshape(50, 4, 200), (1, 0, 2))  # (s, c, out)
    pb = pb.at[B_LLW:B_LLW + 512, :].set(
        jnp.pad(w_img, ((0, 0), (0, 78), (0, 0))).reshape(512, 200))
    pb = pb.at[B_LLW + 512:B_LLW + 512 + data_dim, :].set(llw[200:])
    pb = pb.at[B_LLB, :].set(_uniform(ks[5], (200,), ll_in))

    return {"packA": pa, "packB": pb}


# ----------------------------------------------------------------------------
# Forward pass (mirrors CustomModel2.forward) -- exactly ONE pallas_call
# ----------------------------------------------------------------------------
def custom_model2_forward(params, img, data):
    N = img.shape[0]
    G = N * 36
    p1 = _conv1_patches(img)                                        # (9*G, 128)
    data_pad = jnp.pad(data, ((0, 0), (0, 128 - data.shape[1])))    # (N, 128)

    out = pl.pallas_call(
        _fused_forward_kernel,
        out_shape=jax.ShapeDtypeStruct((N, 128), jnp.float32),
        grid=(1,),
        in_specs=[
            pl.BlockSpec((9 * G, 128), lambda i: (0, 0)),           # conv1 patches
            pl.BlockSpec((N, 128), lambda i: (0, 0)),               # data (padded)
            pl.BlockSpec((A_ROWS, 128), lambda i: (0, 0)),          # packed params A
            pl.BlockSpec((B_ROWS, 200), lambda i: (0, 0)),          # packed params B
        ],
        out_specs=pl.BlockSpec((N, 128), lambda i: (0, 0)),
        scratch_shapes=[
            pltpu.VMEM((G + 16, 128), jnp.float32),   # conv1 output + zero apron
            pltpu.VMEM((G, 1152), jnp.float32),       # conv2 im2col
            pltpu.VMEM((G, 128), jnp.float32),        # conv2 pre-activations
            pltpu.VMEM((N, 640), jnp.float32),        # concat (ll input) buffer
        ],
        compiler_params=pltpu.CompilerParams(
            dimension_semantics=("arbitrary",)),
    )(p1, data_pad, params["packA"], params["packB"])
    return out[:, :7]


if __name__ == "__main__":
    key = jax.random.PRNGKey(0)
    k_img, k_data, k_params = jax.random.split(key, 3)

    # 18x18 spatial so the conv/pool tower flattens to 50*2*2 = 200 features,
    # matching the Linear(200, ...) inside `mlp`.
    img = jax.random.normal(k_img, (2, 3, 18, 18), jnp.float32)
    data = jax.random.normal(k_data, (2, 16), jnp.float32)
    params = init_params(k_params, data_dim=16)

    fwd = jax.jit(custom_model2_forward)
    out = jax.block_until_ready(fwd(params, img, data))
    assert out.shape == (2, 7) and out.dtype == jnp.float32
    print("KERNEL_OK")
</pallas_src>

<mosaic_0001>
module attributes {stable_mosaic.version = 11 : i64} {
  func.func @_fused_forward_kernel(%arg0: i32, %arg1: memref<648x128xf32, #tpu.memory_space<vmem>>, %arg2: memref<2x128xf32, #tpu.memory_space<vmem>>, %arg3: memref<2072x128xf32, #tpu.memory_space<vmem>>, %arg4: memref<784x200xf32, #tpu.memory_space<vmem>>, %arg5: memref<2x128xf32, #tpu.memory_space<vmem>>, %arg6: memref<88x128xf32, #tpu.memory_space<vmem>>, %arg7: memref<72x1152xf32, #tpu.memory_space<vmem>>, %arg8: memref<72x128xf32, #tpu.memory_space<vmem>>, %arg9: memref<2x640xf32, #tpu.memory_space<vmem>>) attributes {dimension_semantics = [#tpu.dimension_semantics<arbitrary>], iteration_bounds = array<i64: 1>, scalar_prefetch = 0 : i64, scratch_operands = 4 : i64, tpu.core_type = #tpu.core_type<tc>, window_params = [{pipeline_mode = #tpu.pipeline_mode<synchronous>, transform_indices = @transform_0, window_bounds = array<i64: 648, 128>}, {pipeline_mode = #tpu.pipeline_mode<synchronous>, transform_indices = @transform_1, window_bounds = array<i64: 2, 128>}, {pipeline_mode = #tpu.pipeline_mode<synchronous>, transform_indices = @transform_2, window_bounds = array<i64: 2072, 128>}, {pipeline_mode = #tpu.pipeline_mode<synchronous>, transform_indices = @transform_3, window_bounds = array<i64: 784, 200>}, {pipeline_mode = #tpu.pipeline_mode<synchronous>, transform_indices = @transform_4, window_bounds = array<i64: 2, 128>}]} {
    %c0 = arith.constant 0 : index
    %c0_0 = arith.constant 0 : index
    %0 = vector.load %arg1[%c0, %c0_0] : memref<648x128xf32, #tpu.memory_space<vmem>>, vector<648x128xf32>
    %c0_1 = arith.constant 0 : index
    %c0_2 = arith.constant 0 : index
    %1 = vector.load %arg3[%c0_1, %c0_2] : memref<2072x128xf32, #tpu.memory_space<vmem>>, vector<128x128xf32>
    %cst = arith.constant dense<0.000000e+00> : vector<648x128xf32>
    %2 = tpu.matmul %0, %1, %cst {dimension_numbers = #tpu.dot_dimension_numbers<[1], [0], [0], [1], [0, 0, 1, 1], [], []>} : vector<648x128xf32>, vector<128x128xf32>, vector<648x128xf32> -> vector<648x128xf32>
    %3 = vector.extract_strided_slice %2 {offsets = [0, 0], sizes = [72, 128], strides = [1, 1]} : vector<648x128xf32> to vector<72x128xf32>
    %4 = vector.extract_strided_slice %2 {offsets = [72, 0], sizes = [72, 128], strides = [1, 1]} : vector<648x128xf32> to vector<72x128xf32>
    %5 = arith.maximumf %3, %4 : vector<72x128xf32>
    %6 = vector.extract_strided_slice %2 {offsets = [144, 0], sizes = [72, 128], strides = [1, 1]} : vector<648x128xf32> to vector<72x128xf32>
    %7 = arith.maximumf %5, %6 : vector<72x128xf32>
    %8 = vector.extract_strided_slice %2 {offsets = [216, 0], sizes = [72, 128], strides = [1, 1]} : vector<648x128xf32> to vector<72x128xf32>
    %9 = arith.maximumf %7, %8 : vector<72x128xf32>
    %10 = vector.extract_strided_slice %2 {offsets = [288, 0], sizes = [72, 128], strides = [1, 1]} : vector<648x128xf32> to vector<72x128xf32>
    %11 = arith.maximumf %9, %10 : vector<72x128xf32>
    %12 = vector.extract_strided_slice %2 {offsets = [360, 0], sizes = [72, 128], strides = [1, 1]} : vector<648x128xf32> to vector<72x128xf32>
    %13 = arith.maximumf %11, %12 : vector<72x128xf32>
    %14 = vector.extract_strided_slice %2 {offsets = [432, 0], sizes = [72, 128], strides = [1, 1]} : vector<648x128xf32> to vector<72x128xf32>
    %15 = arith.maximumf %13, %14 : vector<72x128xf32>
    %16 = vector.extract_strided_slice %2 {offsets = [504, 0], sizes = [72, 128], strides = [1, 1]} : vector<648x128xf32> to vector<72x128xf32>
    %17 = arith.maximumf %15, %16 : vector<72x128xf32>
    %18 = vector.extract_strided_slice %2 {offsets = [576, 0], sizes = [72, 128], strides = [1, 1]} : vector<648x128xf32> to vector<72x128xf32>
    %19 = arith.maximumf %17, %18 : vector<72x128xf32>
    %c128 = arith.constant 128 : index
    %c0_3 = arith.constant 0 : index
    %20 = vector.load %arg3[%c128, %c0_3] : memref<2072x128xf32, #tpu.memory_space<vmem>>, vector<1x128xf32>
    %21 = vector.broadcast %20 : vector<1x128xf32> to vector<72x128xf32>
    %22 = arith.addf %19, %21 : vector<72x128xf32>
    %cst_4 = arith.constant 0.000000e+00 : f32
    %23 = vector.broadcast %cst_4 : f32 to vector<72x128xf32>
    %24 = arith.maximumf %22, %23 : vector<72x128xf32>
    %cst_5 = arith.constant 0.000000e+00 : f32
    %25 = vector.broadcast %cst_5 : f32 to vector<88x128xf32>
    %c0_6 = arith.constant 0 : index
    %c0_7 = arith.constant 0 : index
    %26 = vector.load %arg6[%c0_6, %c0_7] : memref<88x128xf32, #tpu.memory_space<vmem>>, vector<88x128xf32>
    tpu.vector_store %arg6[%c0_6, %c0_7], %25 {strides = array<i32>} : memref<88x128xf32, #tpu.memory_space<vmem>>, vector<88x128xf32>,
    %c8 = arith.constant 8 : index
    %c0_8 = arith.constant 0 : index
    %27 = vector.load %arg6[%c8, %c0_8] : memref<88x128xf32, #tpu.memory_space<vmem>>, vector<72x128xf32>
    tpu.vector_store %arg6[%c8, %c0_8], %24 {strides = array<i32>} : memref<88x128xf32, #tpu.memory_space<vmem>>, vector<72x128xf32>,
    %c1712 = arith.constant 1712 : index
    %c0_9 = arith.constant 0 : index
    %28 = vector.load %arg3[%c1712, %c0_9] : memref<2072x128xf32, #tpu.memory_space<vmem>>, vector<36x128xf32>
    %c1 = arith.constant 1 : index
    %c0_10 = arith.constant 0 : index
    %29 = vector.load %arg6[%c1, %c0_10] : memref<88x128xf32, #tpu.memory_space<vmem>>, vector<36x128xf32>
    %30 = arith.mulf %29, %28 : vector<36x128xf32>
    %c0_11 = arith.constant 0 : index
    %c0_12 = arith.constant 0 : index
    %31 = vector.load %arg7[%c0_11, %c0_12] : memref<72x1152xf32, #tpu.memory_space<vmem>>, vector<36x128xf32>
    tpu.vector_store %arg7[%c0_11, %c0_12], %30 {strides = array<i32>} : memref<72x1152xf32, #tpu.memory_space<vmem>>, vector<36x128xf32>,
    %c37 = arith.constant 37 : index
    %c0_13 = arith.constant 0 : index
    %32 = vector.load %arg6[%c37, %c0_13] : memref<88x128xf32, #tpu.memory_space<vmem>>, vector<36x128xf32>
    %33 = arith.mulf %32, %28 : vector<36x128xf32>
    %c36 = arith.constant 36 : index
    %c0_14 = arith.constant 0 : index
    %34 = vector.load %arg7[%c36, %c0_14] : memref<72x1152xf32, #tpu.memory_space<vmem>>, vector<36x128xf32>
    tpu.vector_store %arg7[%c36, %c0_14], %33 {strides = array<i32>} : memref<72x1152xf32, #tpu.memory_space<vmem>>, vector<36x128xf32>,
    %c1752 = arith.constant 1752 : index
    %c0_15 = arith.constant 0 : index
    %35 = vector.load %arg3[%c1752, %c0_15] : memref<2072x128xf32, #tpu.memory_space<vmem>>, vector<36x128xf32>
    %c2 = arith.constant 2 : index
    %c0_16 = arith.constant 0 : index
    %36 = vector.load %arg6[%c2, %c0_16] : memref<88x128xf32, #tpu.memory_space<vmem>>, vector<36x128xf32>
    %37 = arith.mulf %36, %35 : vector<36x128xf32>
    %c0_17 = arith.constant 0 : index
    %c128_18 = arith.constant 128 : index
    %38 = vector.load %arg7[%c0_17, %c128_18] : memref<72x1152xf32, #tpu.memory_space<vmem>>, vector<36x128xf32>
    tpu.vector_store %arg7[%c0_17, %c128_18], %37 {strides = array<i32>} : memref<72x1152xf32, #tpu.memory_space<vmem>>, vector<36x128xf32>,
    %c38 = arith.constant 38 : index
    %c0_19 = arith.constant 0 : index
    %39 = vector.load %arg6[%c38, %c0_19] : memref<88x128xf32, #tpu.memory_space<vmem>>, vector<36x128xf32>
    %40 = arith.mulf %39, %35 : vector<36x128xf32>
    %c36_20 = arith.constant 36 : index
    %c128_21 = arith.constant 128 : index
    %41 = vector.load %arg7[%c36_20, %c128_21] : memref<72x1152xf32, #tpu.memory_space<vmem>>, vector<36x128xf32>
    tpu.vector_store %arg7[%c36_20, %c128_21], %40 {strides = array<i32>} : memref<72x1152xf32, #tpu.memory_space<vmem>>, vector<36x128xf32>,
    %c1792 = arith.constant 1792 : index
    %c0_22 = arith.constant 0 : index
    %42 = vector.load %arg3[%c1792, %c0_22] : memref<2072x128xf32, #tpu.memory_space<vmem>>, vector<36x128xf32>
    %c3 = arith.constant 3 : index
    %c0_23 = arith.constant 0 : index
    %43 = vector.load %arg6[%c3, %c0_23] : memref<88x128xf32, #tpu.memory_space<vmem>>, vector<36x128xf32>
    %44 = arith.mulf %43, %42 : vector<36x128xf32>
    %c0_24 = arith.constant 0 : index
    %c256 = arith.constant 256 : index
    %45 = vector.load %arg7[%c0_24, %c256] : memref<72x1152xf32, #tpu.memory_space<vmem>>, vector<36x128xf32>
    tpu.vector_store %arg7[%c0_24, %c256], %44 {strides = array<i32>} : memref<72x1152xf32, #tpu.memory_space<vmem>>, vector<36x128xf32>,
    %c39 = arith.constant 39 : index
    %c0_25 = arith.constant 0 : index
    %46 = vector.load %arg6[%c39, %c0_25] : memref<88x128xf32, #tpu.memory_space<vmem>>, vector<36x128xf32>
    %47 = arith.mulf %46, %42 : vector<36x128xf32>
    %c36_26 = arith.constant 36 : index
    %c256_27 = arith.constant 256 : index
    %48 = vector.load %arg7[%c36_26, %c256_27] : memref<72x1152xf32, #tpu.memory_space<vmem>>, vector<36x128xf32>
    tpu.vector_store %arg7[%c36_26, %c256_27], %47 {strides = array<i32>} : memref<72x1152xf32, #tpu.memory_space<vmem>>, vector<36x128xf32>,
    %c1832 = arith.constant 1832 : index
    %c0_28 = arith.constant 0 : index
    %49 = vector.load %arg3[%c1832, %c0_28] : memref<2072x128xf32, #tpu.memory_space<vmem>>, vector<36x128xf32>
    %c7 = arith.constant 7 : index
    %c0_29 = arith.constant 0 : index
    %50 = vector.load %arg6[%c7, %c0_29] : memref<88x128xf32, #tpu.memory_space<vmem>>, vector<36x128xf32>
    %51 = arith.mulf %50, %49 : vector<36x128xf32>
    %c0_30 = arith.constant 0 : index
    %c384 = arith.constant 384 : index
    %52 = vector.load %arg7[%c0_30, %c384] : memref<72x1152xf32, #tpu.memory_space<vmem>>, vector<36x128xf32>
    tpu.vector_store %arg7[%c0_30, %c384], %51 {strides = array<i32>} : memref<72x1152xf32, #tpu.memory_space<vmem>>, vector<36x128xf32>,
    %c43 = arith.constant 43 : index
    %c0_31 = arith.constant 0 : index
    %53 = vector.load %arg6[%c43, %c0_31] : memref<88x128xf32, #tpu.memory_space<vmem>>, vector<36x128xf32>
    %54 = arith.mulf %53, %49 : vector<36x128xf32>
    %c36_32 = arith.constant 36 : index
    %c384_33 = arith.constant 384 : index
    %55 = vector.load %arg7[%c36_32, %c384_33] : memref<72x1152xf32, #tpu.memory_space<vmem>>, vector<36x128xf32>
    tpu.vector_store %arg7[%c36_32, %c384_33], %54 {strides = array<i32>} : memref<72x1152xf32, #tpu.memory_space<vmem>>, vector<36x128xf32>,
    %c1872 = arith.constant 1872 : index
    %c0_34 = arith.constant 0 : index
    %56 = vector.load %arg3[%c1872, %c0_34] : memref<2072x128xf32, #tpu.memory_space<vmem>>, vector<36x128xf32>
    %c8_35 = arith.constant 8 : index
    %c0_36 = arith.constant 0 : index
    %57 = vector.load %arg6[%c8_35, %c0_36] : memref<88x128xf32, #tpu.memory_space<vmem>>, vector<36x128xf32>
    %58 = arith.mulf %57, %56 : vector<36x128xf32>
    %c0_37 = arith.constant 0 : index
    %c512 = arith.constant 512 : index
    %59 = vector.load %arg7[%c0_37, %c512] : memref<72x1152xf32, #tpu.memory_space<vmem>>, vector<36x128xf32>
    tpu.vector_store %arg7[%c0_37, %c512], %58 {strides = array<i32>} : memref<72x1152xf32, #tpu.memory_space<vmem>>, vector<36x128xf32>,
    %c44 = arith.constant 44 : index
    %c0_38 = arith.constant 0 : index
    %60 = vector.load %arg6[%c44, %c0_38] : memref<88x128xf32, #tpu.memory_space<vmem>>, vector<36x128xf32>
    %61 = arith.mulf %60, %56 : vector<36x128xf32>
    %c36_39 = arith.constant 36 : index
    %c512_40 = arith.constant 512 : index
    %62 = vector.load %arg7[%c36_39, %c512_40] : memref<72x1152xf32, #tpu.memory_space<vmem>>, vector<36x128xf32>
    tpu.vector_store %arg7[%c36_39, %c512_40], %61 {strides = array<i32>} : memref<72x1152xf32, #tpu.memory_space<vmem>>, vector<36x128xf32>,
    %c1912 = arith.constant 1912 : index
    %c0_41 = arith.constant 0 : index
    %63 = vector.load %arg3[%c1912, %c0_41] : memref<2072x128xf32, #tpu.memory_space<vmem>>, vector<36x128xf32>
    %c9 = arith.constant 9 : index
    %c0_42 = arith.constant 0 : index
    %64 = vector.load %arg6[%c9, %c0_42] : memref<88x128xf32, #tpu.memory_space<vmem>>, vector<36x128xf32>
    %65 = arith.mulf %64, %63 : vector<36x128xf32>
    %c0_43 = arith.constant 0 : index
    %c640 = arith.constant 640 : index
    %66 = vector.load %arg7[%c0_43, %c640] : memref<72x1152xf32, #tpu.memory_space<vmem>>, vector<36x128xf32>
    tpu.vector_store %arg7[%c0_43, %c640], %65 {strides = array<i32>} : memref<72x1152xf32, #tpu.memory_space<vmem>>, vector<36x128xf32>,
    %c45 = arith.constant 45 : index
    %c0_44 = arith.constant 0 : index
    %67 = vector.load %arg6[%c45, %c0_44] : memref<88x128xf32, #tpu.memory_space<vmem>>, vector<36x128xf32>
    %68 = arith.mulf %67, %63 : vector<36x128xf32>
    %c36_45 = arith.constant 36 : index
    %c640_46 = arith.constant 640 : index
    %69 = vector.load %arg7[%c36_45, %c640_46] : memref<72x1152xf32, #tpu.memory_space<vmem>>, vector<36x128xf32>
    tpu.vector_store %arg7[%c36_45, %c640_46], %68 {strides = array<i32>} : memref<72x1152xf32, #tpu.memory_space<vmem>>, vector<36x128xf32>,
    %c1952 = arith.constant 1952 : index
    %c0_47 = arith.constant 0 : index
    %70 = vector.load %arg3[%c1952, %c0_47] : memref<2072x128xf32, #tpu.memory_space<vmem>>, vector<36x128xf32>
    %c13 = arith.constant 13 : index
    %c0_48 = arith.constant 0 : index
    %71 = vector.load %arg6[%c13, %c0_48] : memref<88x128xf32, #tpu.memory_space<vmem>>, vector<36x128xf32>
    %72 = arith.mulf %71, %70 : vector<36x128xf32>
    %c0_49 = arith.constant 0 : index
    %c768 = arith.constant 768 : index
    %73 = vector.load %arg7[%c0_49, %c768] : memref<72x1152xf32, #tpu.memory_space<vmem>>, vector<36x128xf32>
    tpu.vector_store %arg7[%c0_49, %c768], %72 {strides = array<i32>} : memref<72x1152xf32, #tpu.memory_space<vmem>>, vector<36x128xf32>,
    %c49 = arith.constant 49 : index
    %c0_50 = arith.constant 0 : index
    %74 = vector.load %arg6[%c49, %c0_50] : memref<88x128xf32, #tpu.memory_space<vmem>>, vector<36x128xf32>
    %75 = arith.mulf %74, %70 : vector<36x128xf32>
    %c36_51 = arith.constant 36 : index
    %c768_52 = arith.constant 768 : index
    %76 = vector.load %arg7[%c36_51, %c768_52] : memref<72x1152xf32, #tpu.memory_space<vmem>>, vector<36x128xf32>
    tpu.vector_store %arg7[%c36_51, %c768_52], %75 {strides = array<i32>} : memref<72x1152xf32, #tpu.memory_space<vmem>>, vector<36x128xf32>,
    %c1992 = arith.constant 1992 : index
    %c0_53 = arith.constant 0 : index
    %77 = vector.load %arg3[%c1992, %c0_53] : memref<2072x128xf32, #tpu.memory_space<vmem>>, vector<36x128xf32>
    %c14 = arith.constant 14 : index
    %c0_54 = arith.constant 0 : index
    %78 = vector.load %arg6[%c14, %c0_54] : memref<88x128xf32, #tpu.memory_space<vmem>>, vector<36x128xf32>
    %79 = arith.mulf %78, %77 : vector<36x128xf32>
    %c0_55 = arith.constant 0 : index
    %c896 = arith.constant 896 : index
    %80 = vector.load %arg7[%c0_55, %c896] : memref<72x1152xf32, #tpu.memory_space<vmem>>, vector<36x128xf32>
    tpu.vector_store %arg7[%c0_55, %c896], %79 {strides = array<i32>} : memref<72x1152xf32, #tpu.memory_space<vmem>>, vector<36x128xf32>,
    %c50 = arith.constant 50 : index
    %c0_56 = arith.constant 0 : index
    %81 = vector.load %arg6[%c50, %c0_56] : memref<88x128xf32, #tpu.memory_space<vmem>>, vector<36x128xf32>
    %82 = arith.mulf %81, %77 : vector<36x128xf32>
    %c36_57 = arith.constant 36 : index
    %c896_58 = arith.constant 896 : index
    %83 = vector.load %arg7[%c36_57, %c896_58] : memref<72x1152xf32, #tpu.memory_space<vmem>>, vector<36x128xf32>
    tpu.vector_store %arg7[%c36_57, %c896_58], %82 {strides = array<i32>} : memref<72x1152xf32, #tpu.memory_space<vmem>>, vector<36x128xf32>,
    %c2032 = arith.constant 2032 : index
    %c0_59 = arith.constant 0 : index
    %84 = vector.load %arg3[%c2032, %c0_59] : memref<2072x128xf32, #tpu.memory_space<vmem>>, vector<36x128xf32>
    %c15 = arith.constant 15 : index
    %c0_60 = arith.constant 0 : index
    %85 = vector.load %arg6[%c15, %c0_60] : memref<88x128xf32, #tpu.memory_space<vmem>>, vector<36x128xf32>
    %86 = arith.mulf %85, %84 : vector<36x128xf32>
    %c0_61 = arith.constant 0 : index
    %c1024 = arith.constant 1024 : index
    %87 = vector.load %arg7[%c0_61, %c1024] : memref<72x1152xf32, #tpu.memory_space<vmem>>, vector<36x128xf32>
    tpu.vector_store %arg7[%c0_61, %c1024], %86 {strides = array<i32>} : memref<72x1152xf32, #tpu.memory_space<vmem>>, vector<36x128xf32>,
    %c51 = arith.constant 51 : index
    %c0_62 = arith.constant 0 : index
    %88 = vector.load %arg6[%c51, %c0_62] : memref<88x128xf32, #tpu.memory_space<vmem>>, vector<36x128xf32>
    %89 = arith.mulf %88, %84 : vector<36x128xf32>
    %c36_63 = arith.constant 36 : index
    %c1024_64 = arith.constant 1024 : index
    %90 = vector.load %arg7[%c36_63, %c1024_64] : memref<72x1152xf32, #tpu.memory_space<vmem>>, vector<36x128xf32>
    tpu.vector_store %arg7[%c36_63, %c1024_64], %89 {strides = array<i32>} : memref<72x1152xf32, #tpu.memory_space<vmem>>, vector<36x128xf32>,
    %c0_65 = arith.constant 0 : index
    %c0_66 = arith.constant 0 : index
    %91 = vector.load %arg7[%c0_65, %c0_66] : memref<72x1152xf32, #tpu.memory_space<vmem>>, vector<72x1152xf32>
    %c136 = arith.constant 136 : index
    %c0_67 = arith.constant 0 : index
    %92 = vector.load %arg3[%c136, %c0_67] : memref<2072x128xf32, #tpu.memory_space<vmem>>, vector<1152x128xf32>
    %cst_68 = arith.constant dense<0.000000e+00> : vector<72x128xf32>
    %93 = tpu.matmul %91, %92, %cst_68 {dimension_numbers = #tpu.dot_dimension_numbers<[1], [0], [0], [1], [0, 0, 1, 1], [], []>} : vector<72x1152xf32>, vector<1152x128xf32>, vector<72x128xf32> -> vector<72x128xf32>
    %c0_69 = arith.constant 0 : index
    %c0_70 = arith.constant 0 : index
    %94 = vector.load %arg8[%c0_69, %c0_70] : memref<72x128xf32, #tpu.memory_space<vmem>>, vector<72x128xf32>
    tpu.vector_store %arg8[%c0_69, %c0_70], %93 {strides = array<i32>} : memref<72x128xf32, #tpu.memory_space<vmem>>, vector<72x128xf32>,
    %c1288 = arith.constant 1288 : index
    %c0_71 = arith.constant 0 : index
    %95 = vector.load %arg3[%c1288, %c0_71] : memref<2072x128xf32, #tpu.memory_space<vmem>>, vector<1x128xf32>
    %c0_72 = arith.constant 0 : index
    %c0_73 = arith.constant 0 : index
    %96 = vector.load %arg8[%c0_72, %c0_73] : memref<72x128xf32, #tpu.memory_space<vmem>>, vector<1x128xf32>
    %c1_74 = arith.constant 1 : index
    %c0_75 = arith.constant 0 : index
    %97 = vector.load %arg8[%c1_74, %c0_75] : memref<72x128xf32, #tpu.memory_space<vmem>>, vector<1x128xf32>
    %98 = arith.maximumf %96, %97 : vector<1x128xf32>
    %c2_76 = arith.constant 2 : index
    %c0_77 = arith.constant 0 : index
    %99 = vector.load %arg8[%c2_76, %c0_77] : memref<72x128xf32, #tpu.memory_space<vmem>>, vector<1x128xf32>
    %100 = arith.maximumf %98, %99 : vector<1x128xf32>
    %c6 = arith.constant 6 : index
    %c0_78 = arith.constant 0 : index
    %101 = vector.load %arg8[%c6, %c0_78] : memref<72x128xf32, #tpu.memory_space<vmem>>, vector<1x128xf32>
    %102 = arith.maximumf %100, %101 : vector<1x128xf32>
    %c7_79 = arith.constant 7 : index
    %c0_80 = arith.constant 0 : index
    %103 = vector.load %arg8[%c7_79, %c0_80] : memref<72x128xf32, #tpu.memory_space<vmem>>, vector<1x128xf32>
    %104 = arith.maximumf %102, %103 : vector<1x128xf32>
    %c8_81 = arith.constant 8 : index
    %c0_82 = arith.constant 0 : index
    %105 = vector.load %arg8[%c8_81, %c0_82] : memref<72x128xf32, #tpu.memory_space<vmem>>, vector<1x128xf32>
    %106 = arith.maximumf %104, %105 : vector<1x128xf32>
    %c12 = arith.constant 12 : index
    %c0_83 = arith.constant 0 : index
    %107 = vector.load %arg8[%c12, %c0_83] : memref<72x128xf32, #tpu.memory_space<vmem>>, vector<1x128xf32>
    %108 = arith.maximumf %106, %107 : vector<1x128xf32>
    %c13_84 = arith.constant 13 : index
    %c0_85 = arith.constant 0 : index
    %109 = vector.load %arg8[%c13_84, %c0_85] : memref<72x128xf32, #tpu.memory_space<vmem>>, vector<1x128xf32>
    %110 = arith.maximumf %108, %109 : vector<1x128xf32>
    %c14_86 = arith.constant 14 : index
    %c0_87 = arith.constant 0 : index
    %111 = vector.load %arg8[%c14_86, %c0_87] : memref<72x128xf32, #tpu.memory_space<vmem>>, vector<1x128xf32>
    %112 = arith.maximumf %110, %111 : vector<1x128xf32>
    %113 = arith.addf %112, %95 : vector<1x128xf32>
    %cst_88 = arith.constant 0.000000e+00 : f32
    %114 = vector.broadcast %cst_88 : f32 to vector<1x128xf32>
    %115 = arith.maximumf %113, %114 : vector<1x128xf32>
    %c0_89 = arith.constant 0 : index
    %c0_90 = arith.constant 0 : index
    %116 = vector.load %arg9[%c0_89, %c0_90] : memref<2x640xf32, #tpu.memory_space<vmem>>, vector<1x128xf32>
    tpu.vector_store %arg9[%c0_89, %c0_90], %115 {strides = array<i32>} : memref<2x640xf32, #tpu.memory_space<vmem>>, vector<1x128xf32>,
    %c3_91 = arith.constant 3 : index
    %c0_92 = arith.constant 0 : index
    %117 = vector.load %arg8[%c3_91, %c0_92] : memref<72x128xf32, #tpu.memory_space<vmem>>, vector<1x128xf32>
    %c4 = arith.constant 4 : index
    %c0_93 = arith.constant 0 : index
    %118 = vector.load %arg8[%c4, %c0_93] : memref<72x128xf32, #tpu.memory_space<vmem>>, vector<1x128xf32>
    %119 = arith.maximumf %117, %118 : vector<1x128xf32>
    %c5 = arith.constant 5 : index
    %c0_94 = arith.constant 0 : index
    %120 = vector.load %arg8[%c5, %c0_94] : memref<72x128xf32, #tpu.memory_space<vmem>>, vector<1x128xf32>
    %121 = arith.maximumf %119, %120 : vector<1x128xf32>
    %c9_95 = arith.constant 9 : index
    %c0_96 = arith.constant 0 : index
    %122 = vector.load %arg8[%c9_95, %c0_96] : memref<72x128xf32, #tpu.memory_space<vmem>>, vector<1x128xf32>
    %123 = arith.maximumf %121, %122 : vector<1x128xf32>
    %c10 = arith.constant 10 : index
    %c0_97 = arith.constant 0 : index
    %124 = vector.load %arg8[%c10, %c0_97] : memref<72x128xf32, #tpu.memory_space<vmem>>, vector<1x128xf32>
    %125 = arith.maximumf %123, %124 : vector<1x128xf32>
    %c11 = arith.constant 11 : index
    %c0_98 = arith.constant 0 : index
    %126 = vector.load %arg8[%c11, %c0_98] : memref<72x128xf32, #tpu.memory_space<vmem>>, vector<1x128xf32>
    %127 = arith.maximumf %125, %126 : vector<1x128xf32>
    %c15_99 = arith.constant 15 : index
    %c0_100 = arith.constant 0 : index
    %128 = vector.load %arg8[%c15_99, %c0_100] : memref<72x128xf32, #tpu.memory_space<vmem>>, vector<1x128xf32>
    %129 = arith.maximumf %127, %128 : vector<1x128xf32>
    %c16 = arith.constant 16 : index
    %c0_101 = arith.constant 0 : index
    %130 = vector.load %arg8[%c16, %c0_101] : memref<72x128xf32, #tpu.memory_space<vmem>>, vector<1x128xf32>
    %131 = arith.maximumf %129, %130 : vector<1x128xf32>
    %c17 = arith.constant 17 : index
    %c0_102 = arith.constant 0 : index
    %132 = vector.load %arg8[%c17, %c0_102] : memref<72x128xf32, #tpu.memory_space<vmem>>, vector<1x128xf32>
    %133 = arith.maximumf %131, %132 : vector<1x128xf32>
    %134 = arith.addf %133, %95 : vector<1x128xf32>
    %cst_103 = arith.constant 0.000000e+00 : f32
    %135 = vector.broadcast %cst_103 : f32 to vector<1x128xf32>
    %136 = arith.maximumf %134, %135 : vector<1x128xf32>
    %c0_104 = arith.constant 0 : index
    %c128_105 = arith.constant 128 : index
    %137 = vector.load %arg9[%c0_104, %c128_105] : memref<2x640xf32, #tpu.memory_space<vmem>>, vector<1x128xf32>
    tpu.vector_store %arg9[%c0_104, %c128_105], %136 {strides = array<i32>} : memref<2x640xf32, #tpu.memory_space<vmem>>, vector<1x128xf32>,
    %c18 = arith.constant 18 : index
    %c0_106 = arith.constant 0 : index
    %138 = vector.load %arg8[%c18, %c0_106] : memref<72x128xf32, #tpu.memory_space<vmem>>, vector<1x128xf32>
    %c19 = arith.constant 19 : index
    %c0_107 = arith.constant 0 : index
    %139 = vector.load %arg8[%c19, %c0_107] : memref<72x128xf32, #tpu.memory_space<vmem>>, vector<1x128xf32>
    %140 = arith.maximumf %138, %139 : vector<1x128xf32>
    %c20 = arith.constant 20 : index
    %c0_108 = arith.constant 0 : index
    %141 = vector.load %arg8[%c20, %c0_108] : memref<72x128xf32, #tpu.memory_space<vmem>>, vector<1x128xf32>
    %142 = arith.maximumf %140, %141 : vector<1x128xf32>
    %c24 = arith.constant 24 : index
    %c0_109 = arith.constant 0 : index
    %143 = vector.load %arg8[%c24, %c0_109] : memref<72x128xf32, #tpu.memory_space<vmem>>, vector<1x128xf32>
    %144 = arith.maximumf %142, %143 : vector<1x128xf32>
    %c25 = arith.constant 25 : index
    %c0_110 = arith.constant 0 : index
    %145 = vector.load %arg8[%c25, %c0_110] : memref<72x128xf32, #tpu.memory_space<vmem>>, vector<1x128xf32>
    %146 = arith.maximumf %144, %145 : vector<1x128xf32>
    %c26 = arith.constant 26 : index
    %c0_111 = arith.constant 0 : index
    %147 = vector.load %arg8[%c26, %c0_111] : memref<72x128xf32, #tpu.memory_space<vmem>>, vector<1x128xf32>
    %148 = arith.maximumf %146, %147 : vector<1x128xf32>
    %c30 = arith.constant 30 : index
    %c0_112 = arith.constant 0 : index
    %149 = vector.load %arg8[%c30, %c0_112] : memref<72x128xf32, #tpu.memory_space<vmem>>, vector<1x128xf32>
    %150 = arith.maximumf %148, %149 : vector<1x128xf32>
    %c31 = arith.constant 31 : index
    %c0_113 = arith.constant 0 : index
    %151 = vector.load %arg8[%c31, %c0_113] : memref<72x128xf32, #tpu.memory_space<vmem>>, vector<1x128xf32>
    %152 = arith.maximumf %150, %151 : vector<1x128xf32>
    %c32 = arith.constant 32 : index
    %c0_114 = arith.constant 0 : index
    %153 = vector.load %arg8[%c32, %c0_114] : memref<72x128xf32, #tpu.memory_space<vmem>>, vector<1x128xf32>
    %154 = arith.maximumf %152, %153 : vector<1x128xf32>
    %155 = arith.addf %154, %95 : vector<1x128xf32>
    %cst_115 = arith.constant 0.000000e+00 : f32
    %156 = vector.broadcast %cst_115 : f32 to vector<1x128xf32>
    %157 = arith.maximumf %155, %156 : vector<1x128xf32>
    %c0_116 = arith.constant 0 : index
    %c256_117 = arith.constant 256 : index
    %158 = vector.load %arg9[%c0_116, %c256_117] : memref<2x640xf32, #tpu.memory_space<vmem>>, vector<1x128xf32>
    tpu.vector_store %arg9[%c0_116, %c256_117], %157 {strides = array<i32>} : memref<2x640xf32, #tpu.memory_space<vmem>>, vector<1x128xf32>,
    %c21 = arith.constant 21 : index
    %c0_118 = arith.constant 0 : index
    %159 = vector.load %arg8[%c21, %c0_118] : memref<72x128xf32, #tpu.memory_space<vmem>>, vector<1x128xf32>
    %c22 = arith.constant 22 : index
    %c0_119 = arith.constant 0 : index
    %160 = vector.load %arg8[%c22, %c0_119] : memref<72x128xf32, #tpu.memory_space<vmem>>, vector<1x128xf32>
    %161 = arith.maximumf %159, %160 : vector<1x128xf32>
    %c23 = arith.constant 23 : index
    %c0_120 = arith.constant 0 : index
    %162 = vector.load %arg8[%c23, %c0_120] : memref<72x128xf32, #tpu.memory_space<vmem>>, vector<1x128xf32>
    %163 = arith.maximumf %161, %162 : vector<1x128xf32>
    %c27 = arith.constant 27 : index
    %c0_121 = arith.constant 0 : index
    %164 = vector.load %arg8[%c27, %c0_121] : memref<72x128xf32, #tpu.memory_space<vmem>>, vector<1x128xf32>
    %165 = arith.maximumf %163, %164 : vector<1x128xf32>
    %c28 = arith.constant 28 : index
    %c0_122 = arith.constant 0 : index
    %166 = vector.load %arg8[%c28, %c0_122] : memref<72x128xf32, #tpu.memory_space<vmem>>, vector<1x128xf32>
    %167 = arith.maximumf %165, %166 : vector<1x128xf32>
    %c29 = arith.constant 29 : index
    %c0_123 = arith.constant 0 : index
    %168 = vector.load %arg8[%c29, %c0_123] : memref<72x128xf32, #tpu.memory_space<vmem>>, vector<1x128xf32>
    %169 = arith.maximumf %167, %168 : vector<1x128xf32>
    %c33 = arith.constant 33 : index
    %c0_124 = arith.constant 0 : index
    %170 = vector.load %arg8[%c33, %c0_124] : memref<72x128xf32, #tpu.memory_space<vmem>>, vector<1x128xf32>
    %171 = arith.maximumf %169, %170 : vector<1x128xf32>
    %c34 = arith.constant 34 : index
    %c0_125 = arith.constant 0 : index
    %172 = vector.load %arg8[%c34, %c0_125] : memref<72x128xf32, #tpu.memory_space<vmem>>, vector<1x128xf32>
    %173 = arith.maximumf %171, %172 : vector<1x128xf32>
    %c35 = arith.constant 35 : index
    %c0_126 = arith.constant 0 : index
    %174 = vector.load %arg8[%c35, %c0_126] : memref<72x128xf32, #tpu.memory_space<vmem>>, vector<1x128xf32>
    %175 = arith.maximumf %173, %174 : vector<1x128xf32>
    %176 = arith.addf %175, %95 : vector<1x128xf32>
    %cst_127 = arith.constant 0.000000e+00 : f32
    %177 = vector.broadcast %cst_127 : f32 to vector<1x128xf32>
    %178 = arith.maximumf %176, %177 : vector<1x128xf32>
    %c0_128 = arith.constant 0 : index
    %c384_129 = arith.constant 384 : index
    %179 = vector.load %arg9[%c0_128, %c384_129] : memref<2x640xf32, #tpu.memory_space<vmem>>, vector<1x128xf32>
    tpu.vector_store %arg9[%c0_128, %c384_129], %178 {strides = array<i32>} : memref<2x640xf32, #tpu.memory_space<vmem>>, vector<1x128xf32>,
    %c36_130 = arith.constant 36 : index
    %c0_131 = arith.constant 0 : index
    %180 = vector.load %arg8[%c36_130, %c0_131] : memref<72x128xf32, #tpu.memory_space<vmem>>, vector<1x128xf32>
    %c37_132 = arith.constant 37 : index
    %c0_133 = arith.constant 0 : index
    %181 = vector.load %arg8[%c37_132, %c0_133] : memref<72x128xf32, #tpu.memory_space<vmem>>, vector<1x128xf32>
    %182 = arith.maximumf %180, %181 : vector<1x128xf32>
    %c38_134 = arith.constant 38 : index
    %c0_135 = arith.constant 0 : index
    %183 = vector.load %arg8[%c38_134, %c0_135] : memref<72x128xf32, #tpu.memory_space<vmem>>, vector<1x128xf32>
    %184 = arith.maximumf %182, %183 : vector<1x128xf32>
    %c42 = arith.constant 42 : index
    %c0_136 = arith.constant 0 : index
    %185 = vector.load %arg8[%c42, %c0_136] : memref<72x128xf32, #tpu.memory_space<vmem>>, vector<1x128xf32>
    %186 = arith.maximumf %184, %185 : vector<1x128xf32>
    %c43_137 = arith.constant 43 : index
    %c0_138 = arith.constant 0 : index
    %187 = vector.load %arg8[%c43_137, %c0_138] : memref<72x128xf32, #tpu.memory_space<vmem>>, vector<1x128xf32>
    %188 = arith.maximumf %186, %187 : vector<1x128xf32>
    %c44_139 = arith.constant 44 : index
    %c0_140 = arith.constant 0 : index
    %189 = vector.load %arg8[%c44_139, %c0_140] : memref<72x128xf32, #tpu.memory_space<vmem>>, vector<1x128xf32>
    %190 = arith.maximumf %188, %189 : vector<1x128xf32>
    %c48 = arith.constant 48 : index
    %c0_141 = arith.constant 0 : index
    %191 = vector.load %arg8[%c48, %c0_141] : memref<72x128xf32, #tpu.memory_space<vmem>>, vector<1x128xf32>
    %192 = arith.maximumf %190, %191 : vector<1x128xf32>
    %c49_142 = arith.constant 49 : index
    %c0_143 = arith.constant 0 : index
    %193 = vector.load %arg8[%c49_142, %c0_143] : memref<72x128xf32, #tpu.memory_space<vmem>>, vector<1x128xf32>
    %194 = arith.maximumf %192, %193 : vector<1x128xf32>
    %c50_144 = arith.constant 50 : index
    %c0_145 = arith.constant 0 : index
    %195 = vector.load %arg8[%c50_144, %c0_145] : memref<72x128xf32, #tpu.memory_space<vmem>>, vector<1x128xf32>
    %196 = arith.maximumf %194, %195 : vector<1x128xf32>
    %197 = arith.addf %196, %95 : vector<1x128xf32>
    %cst_146 = arith.constant 0.000000e+00 : f32
    %198 = vector.broadcast %cst_146 : f32 to vector<1x128xf32>
    %199 = arith.maximumf %197, %198 : vector<1x128xf32>
    %c1_147 = arith.constant 1 : index
    %c0_148 = arith.constant 0 : index
    %200 = vector.load %arg9[%c1_147, %c0_148] : memref<2x640xf32, #tpu.memory_space<vmem>>, vector<1x128xf32>
    tpu.vector_store %arg9[%c1_147, %c0_148], %199 {strides = array<i32>} : memref<2x640xf32, #tpu.memory_space<vmem>>, vector<1x128xf32>,
    %c39_149 = arith.constant 39 : index
    %c0_150 = arith.constant 0 : index
    %201 = vector.load %arg8[%c39_149, %c0_150] : memref<72x128xf32, #tpu.memory_space<vmem>>, vector<1x128xf32>
    %c40 = arith.constant 40 : index
    %c0_151 = arith.constant 0 : index
    %202 = vector.load %arg8[%c40, %c0_151] : memref<72x128xf32, #tpu.memory_space<vmem>>, vector<1x128xf32>
    %203 = arith.maximumf %201, %202 : vector<1x128xf32>
    %c41 = arith.constant 41 : index
    %c0_152 = arith.constant 0 : index
    %204 = vector.load %arg8[%c41, %c0_152] : memref<72x128xf32, #tpu.memory_space<vmem>>, vector<1x128xf32>
    %205 = arith.maximumf %203, %204 : vector<1x128xf32>
    %c45_153 = arith.constant 45 : index
    %c0_154 = arith.constant 0 : index
    %206 = vector.load %arg8[%c45_153, %c0_154] : memref<72x128xf32, #tpu.memory_space<vmem>>, vector<1x128xf32>
    %207 = arith.maximumf %205, %206 : vector<1x128xf32>
    %c46 = arith.constant 46 : index
    %c0_155 = arith.constant 0 : index
    %208 = vector.load %arg8[%c46, %c0_155] : memref<72x128xf32, #tpu.memory_space<vmem>>, vector<1x128xf32>
    %209 = arith.maximumf %207, %208 : vector<1x128xf32>
    %c47 = arith.constant 47 : index
    %c0_156 = arith.constant 0 : index
    %210 = vector.load %arg8[%c47, %c0_156] : memref<72x128xf32, #tpu.memory_space<vmem>>, vector<1x128xf32>
    %211 = arith.maximumf %209, %210 : vector<1x128xf32>
    %c51_157 = arith.constant 51 : index
    %c0_158 = arith.constant 0 : index
    %212 = vector.load %arg8[%c51_157, %c0_158] : memref<72x128xf32, #tpu.memory_space<vmem>>, vector<1x128xf32>
    %213 = arith.maximumf %211, %212 : vector<1x128xf32>
    %c52 = arith.constant 52 : index
    %c0_159 = arith.constant 0 : index
    %214 = vector.load %arg8[%c52, %c0_159] : memref<72x128xf32, #tpu.memory_space<vmem>>, vector<1x128xf32>
    %215 = arith.maximumf %213, %214 : vector<1x128xf32>
    %c53 = arith.constant 53 : index
    %c0_160 = arith.constant 0 : index
    %216 = vector.load %arg8[%c53, %c0_160] : memref<72x128xf32, #tpu.memory_space<vmem>>, vector<1x128xf32>
    %217 = arith.maximumf %215, %216 : vector<1x128xf32>
    %218 = arith.addf %217, %95 : vector<1x128xf32>
    %cst_161 = arith.constant 0.000000e+00 : f32
    %219 = vector.broadcast %cst_161 : f32 to vector<1x128xf32>
    %220 = arith.maximumf %218, %219 : vector<1x128xf32>
    %c1_162 = arith.constant 1 : index
    %c128_163 = arith.constant 128 : index
    %221 = vector.load %arg9[%c1_162, %c128_163] : memref<2x640xf32, #tpu.memory_space<vmem>>, vector<1x128xf32>
    tpu.vector_store %arg9[%c1_162, %c128_163], %220 {strides = array<i32>} : memref<2x640xf32, #tpu.memory_space<vmem>>, vector<1x128xf32>,
    %c54 = arith.constant 54 : index
    %c0_164 = arith.constant 0 : index
    %222 = vector.load %arg8[%c54, %c0_164] : memref<72x128xf32, #tpu.memory_space<vmem>>, vector<1x128xf32>
    %c55 = arith.constant 55 : index
    %c0_165 = arith.constant 0 : index
    %223 = vector.load %arg8[%c55, %c0_165] : memref<72x128xf32, #tpu.memory_space<vmem>>, vector<1x128xf32>
    %224 = arith.maximumf %222, %223 : vector<1x128xf32>
    %c56 = arith.constant 56 : index
    %c0_166 = arith.constant 0 : index
    %225 = vector.load %arg8[%c56, %c0_166] : memref<72x128xf32, #tpu.memory_space<vmem>>, vector<1x128xf32>
    %226 = arith.maximumf %224, %225 : vector<1x128xf32>
    %c60 = arith.constant 60 : index
    %c0_167 = arith.constant 0 : index
    %227 = vector.load %arg8[%c60, %c0_167] : memref<72x128xf32, #tpu.memory_space<vmem>>, vector<1x128xf32>
    %228 = arith.maximumf %226, %227 : vector<1x128xf32>
    %c61 = arith.constant 61 : index
    %c0_168 = arith.constant 0 : index
    %229 = vector.load %arg8[%c61, %c0_168] : memref<72x128xf32, #tpu.memory_space<vmem>>, vector<1x128xf32>
    %230 = arith.maximumf %228, %229 : vector<1x128xf32>
    %c62 = arith.constant 62 : index
    %c0_169 = arith.constant 0 : index
    %231 = vector.load %arg8[%c62, %c0_169] : memref<72x128xf32, #tpu.memory_space<vmem>>, vector<1x128xf32>
    %232 = arith.maximumf %230, %231 : vector<1x128xf32>
    %c66 = arith.constant 66 : index
    %c0_170 = arith.constant 0 : index
    %233 = vector.load %arg8[%c66, %c0_170] : memref<72x128xf32, #tpu.memory_space<vmem>>, vector<1x128xf32>
    %234 = arith.maximumf %232, %233 : vector<1x128xf32>
    %c67 = arith.constant 67 : index
    %c0_171 = arith.constant 0 : index
    %235 = vector.load %arg8[%c67, %c0_171] : memref<72x128xf32, #tpu.memory_space<vmem>>, vector<1x128xf32>
    %236 = arith.maximumf %234, %235 : vector<1x128xf32>
    %c68 = arith.constant 68 : index
    %c0_172 = arith.constant 0 : index
    %237 = vector.load %arg8[%c68, %c0_172] : memref<72x128xf32, #tpu.memory_space<vmem>>, vector<1x128xf32>
    %238 = arith.maximumf %236, %237 : vector<1x128xf32>
    %239 = arith.addf %238, %95 : vector<1x128xf32>
    %cst_173 = arith.constant 0.000000e+00 : f32
    %240 = vector.broadcast %cst_173 : f32 to vector<1x128xf32>
    %241 = arith.maximumf %239, %240 : vector<1x128xf32>
    %c1_174 = arith.constant 1 : index
    %c256_175 = arith.constant 256 : index
    %242 = vector.load %arg9[%c1_174, %c256_175] : memref<2x640xf32, #tpu.memory_space<vmem>>, vector<1x128xf32>
    tpu.vector_store %arg9[%c1_174, %c256_175], %241 {strides = array<i32>} : memref<2x640xf32, #tpu.memory_space<vmem>>, vector<1x128xf32>,
    %c57 = arith.constant 57 : index
    %c0_176 = arith.constant 0 : index
    %243 = vector.load %arg8[%c57, %c0_176] : memref<72x128xf32, #tpu.memory_space<vmem>>, vector<1x128xf32>
    %c58 = arith.constant 58 : index
    %c0_177 = arith.constant 0 : index
    %244 = vector.load %arg8[%c58, %c0_177] : memref<72x128xf32, #tpu.memory_space<vmem>>, vector<1x128xf32>
    %245 = arith.maximumf %243, %244 : vector<1x128xf32>
    %c59 = arith.constant 59 : index
    %c0_178 = arith.constant 0 : index
    %246 = vector.load %arg8[%c59, %c0_178] : memref<72x128xf32, #tpu.memory_space<vmem>>, vector<1x128xf32>
    %247 = arith.maximumf %245, %246 : vector<1x128xf32>
    %c63 = arith.constant 63 : index
    %c0_179 = arith.constant 0 : index
    %248 = vector.load %arg8[%c63, %c0_179] : memref<72x128xf32, #tpu.memory_space<vmem>>, vector<1x128xf32>
    %249 = arith.maximumf %247, %248 : vector<1x128xf32>
    %c64 = arith.constant 64 : index
    %c0_180 = arith.constant 0 : index
    %250 = vector.load %arg8[%c64, %c0_180] : memref<72x128xf32, #tpu.memory_space<vmem>>, vector<1x128xf32>
    %251 = arith.maximumf %249, %250 : vector<1x128xf32>
    %c65 = arith.constant 65 : index
    %c0_181 = arith.constant 0 : index
    %252 = vector.load %arg8[%c65, %c0_181] : memref<72x128xf32, #tpu.memory_space<vmem>>, vector<1x128xf32>
    %253 = arith.maximumf %251, %252 : vector<1x128xf32>
    %c69 = arith.constant 69 : index
    %c0_182 = arith.constant 0 : index
    %254 = vector.load %arg8[%c69, %c0_182] : memref<72x128xf32, #tpu.memory_space<vmem>>, vector<1x128xf32>
    %255 = arith.maximumf %253, %254 : vector<1x128xf32>
    %c70 = arith.constant 70 : index
    %c0_183 = arith.constant 0 : index
    %256 = vector.load %arg8[%c70, %c0_183] : memref<72x128xf32, #tpu.memory_space<vmem>>, vector<1x128xf32>
    %257 = arith.maximumf %255, %256 : vector<1x128xf32>
    %c71 = arith.constant 71 : index
    %c0_184 = arith.constant 0 : index
    %258 = vector.load %arg8[%c71, %c0_184] : memref<72x128xf32, #tpu.memory_space<vmem>>, vector<1x128xf32>
    %259 = arith.maximumf %257, %258 : vector<1x128xf32>
    %260 = arith.addf %259, %95 : vector<1x128xf32>
    %cst_185 = arith.constant 0.000000e+00 : f32
    %261 = vector.broadcast %cst_185 : f32 to vector<1x128xf32>
    %262 = arith.maximumf %260, %261 : vector<1x128xf32>
    %c1_186 = arith.constant 1 : index
    %c384_187 = arith.constant 384 : index
    %263 = vector.load %arg9[%c1_186, %c384_187] : memref<2x640xf32, #tpu.memory_space<vmem>>, vector<1x128xf32>
    tpu.vector_store %arg9[%c1_186, %c384_187], %262 {strides = array<i32>} : memref<2x640xf32, #tpu.memory_space<vmem>>, vector<1x128xf32>,
    %c0_188 = arith.constant 0 : index
    %c0_189 = arith.constant 0 : index
    %264 = vector.load %arg2[%c0_188, %c0_189] : memref<2x128xf32, #tpu.memory_space<vmem>>, vector<2x128xf32>
    %c0_190 = arith.constant 0 : index
    %c512_191 = arith.constant 512 : index
    %265 = vector.load %arg9[%c0_190, %c512_191] : memref<2x640xf32, #tpu.memory_space<vmem>>, vector<2x128xf32>
    tpu.vector_store %arg9[%c0_190, %c512_191], %264 {strides = array<i32>} : memref<2x640xf32, #tpu.memory_space<vmem>>, vector<2x128xf32>,
    %c0_192 = arith.constant 0 : index
    %c0_193 = arith.constant 0 : index
    %266 = vector.load %arg9[%c0_192, %c0_193] : memref<2x640xf32, #tpu.memory_space<vmem>>, vector<2x640xf32>
    %c0_194 = arith.constant 0 : index
    %c0_195 = arith.constant 0 : index
    %267 = vector.load %arg4[%c0_194, %c0_195] : memref<784x200xf32, #tpu.memory_space<vmem>>, vector<640x200xf32>
    %cst_196 = arith.constant dense<0.000000e+00> : vector<2x200xf32>
    %268 = tpu.matmul %266, %267, %cst_196 {dimension_numbers = #tpu.dot_dimension_numbers<[1], [0], [0], [1], [0, 0, 1, 1], [], []>} : vector<2x640xf32>, vector<640x200xf32>, vector<2x200xf32> -> vector<2x200xf32>
    %c640_197 = arith.constant 640 : index
    %c0_198 = arith.constant 0 : index
    %269 = vector.load %arg4[%c640_197, %c0_198] : memref<784x200xf32, #tpu.memory_space<vmem>>, vector<1x200xf32>
    %270 = vector.broadcast %269 : vector<1x200xf32> to vector<2x200xf32>
    %271 = arith.addf %268, %270 : vector<2x200xf32>
    %c1296 = arith.constant 1296 : index
    %c0_199 = arith.constant 0 : index
    %272 = vector.load %arg3[%c1296, %c0_199] : memref<2072x128xf32, #tpu.memory_space<vmem>>, vector<200x128xf32>
    %c1496 = arith.constant 1496 : index
    %c0_200 = arith.constant 0 : index
    %273 = vector.load %arg3[%c1496, %c0_200] : memref<2072x128xf32, #tpu.memory_space<vmem>>, vector<1x128xf32>
    %c648 = arith.constant 648 : index
    %c0_201 = arith.constant 0 : index
    %274 = vector.load %arg4[%c648, %c0_201] : memref<784x200xf32, #tpu.memory_space<vmem>>, vector<128x200xf32>
    %c776 = arith.constant 776 : index
    %c0_202 = arith.constant 0 : index
    %275 = vector.load %arg4[%c776, %c0_202] : memref<784x200xf32, #tpu.memory_space<vmem>>, vector<1x200xf32>
    %cst_203 = arith.constant dense<0.000000e+00> : vector<2x128xf32>
    %276 = tpu.matmul %271, %272, %cst_203 {dimension_numbers = #tpu.dot_dimension_numbers<[1], [0], [0], [1], [0, 0, 1, 1], [], []>} : vector<2x200xf32>, vector<200x128xf32>, vector<2x128xf32> -> vector<2x128xf32>
    %277 = vector.broadcast %273 : vector<1x128xf32> to vector<2x128xf32>
    %278 = arith.addf %276, %277 : vector<2x128xf32>
    %cst_204 = arith.constant 0.000000e+00 : f32
    %279 = vector.broadcast %cst_204 : f32 to vector<2x128xf32>
    %280 = arith.maximumf %278, %279 : vector<2x128xf32>
    %cst_205 = arith.constant dense<0.000000e+00> : vector<2x200xf32>
    %281 = tpu.matmul %280, %274, %cst_205 {dimension_numbers = #tpu.dot_dimension_numbers<[1], [0], [0], [1], [0, 0, 1, 1], [], []>} : vector<2x128xf32>, vector<128x200xf32>, vector<2x200xf32> -> vector<2x200xf32>
    %282 = vector.broadcast %275 : vector<1x200xf32> to vector<2x200xf32>
    %283 = arith.addf %281, %282 : vector<2x200xf32>
    %284 = arith.addf %283, %271 : vector<2x200xf32>
    %cst_206 = arith.constant dense<0.000000e+00> : vector<2x128xf32>
    %285 = tpu.matmul %284, %272, %cst_206 {dimension_numbers = #tpu.dot_dimension_numbers<[1], [0], [0], [1], [0, 0, 1, 1], [], []>} : vector<2x200xf32>, vector<200x128xf32>, vector<2x128xf32> -> vector<2x128xf32>
    %286 = vector.broadcast %273 : vector<1x128xf32> to vector<2x128xf32>
    %287 = arith.addf %285, %286 : vector<2x128xf32>
    %cst_207 = arith.constant 0.000000e+00 : f32
    %288 = vector.broadcast %cst_207 : f32 to vector<2x128xf32>
    %289 = arith.maximumf %287, %288 : vector<2x128xf32>
    %cst_208 = arith.constant dense<0.000000e+00> : vector<2x200xf32>
    %290 = tpu.matmul %289, %274, %cst_208 {dimension_numbers = #tpu.dot_dimension_numbers<[1], [0], [0], [1], [0, 0, 1, 1], [], []>} : vector<2x128xf32>, vector<128x200xf32>, vector<2x200xf32> -> vector<2x200xf32>
    %291 = vector.broadcast %275 : vector<1x200xf32> to vector<2x200xf32>
    %292 = arith.addf %290, %291 : vector<2x200xf32>
    %293 = arith.addf %292, %271 : vector<2x200xf32>
    %c1504 = arith.constant 1504 : index
    %c0_209 = arith.constant 0 : index
    %294 = vector.load %arg3[%c1504, %c0_209] : memref<2072x128xf32, #tpu.memory_space<vmem>>, vector<200x128xf32>
    %cst_210 = arith.constant dense<0.000000e+00> : vector<2x128xf32>
    %295 = tpu.matmul %293, %294, %cst_210 {dimension_numbers = #tpu.dot_dimension_numbers<[1], [0], [0], [1], [0, 0, 1, 1], [], []>} : vector<2x200xf32>, vector<200x128xf32>, vector<2x128xf32> -> vector<2x128xf32>
    %c1704 = arith.constant 1704 : index
    %c0_211 = arith.constant 0 : index
    %296 = vector.load %arg3[%c1704, %c0_211] : memref<2072x128xf32, #tpu.memory_space<vmem>>, vector<1x128xf32>
    %297 = vector.broadcast %296 : vector<1x128xf32> to vector<2x128xf32>
    %298 = arith.addf %295, %297 : vector<2x128xf32>
    %c0_212 = arith.constant 0 : index
    %c0_213 = arith.constant 0 : index
    %299 = vector.load %arg5[%c0_212, %c0_213] : memref<2x128xf32, #tpu.memory_space<vmem>>, vector<2x128xf32>
    tpu.vector_store %arg5[%c0_212, %c0_213], %298 {strides = array<i32>} : memref<2x128xf32, #tpu.memory_space<vmem>>, vector<2x128xf32>,
    return
  }
  func.func @transform_0(%arg0: i32) -> (i32, i32) {
    %c0_i32 = arith.constant 0 : i32
    %c0_i32_0 = arith.constant 0 : i32
    %c0_i32_1 = arith.constant 0 : i32
    return %c0_i32, %c0_i32_0 : i32, i32
  }
  func.func @transform_1(%arg0: i32) -> (i32, i32) {
    %c0_i32 = arith.constant 0 : i32
    %c0_i32_0 = arith.constant 0 : i32
    %c0_i32_1 = arith.constant 0 : i32
    return %c0_i32, %c0_i32_0 : i32, i32
  }
  func.func @transform_2(%arg0: i32) -> (i32, i32) {
    %c0_i32 = arith.constant 0 : i32
    %c0_i32_0 = arith.constant 0 : i32
    %c0_i32_1 = arith.constant 0 : i32
    return %c0_i32, %c0_i32_0 : i32, i32
  }
  func.func @transform_3(%arg0: i32) -> (i32, i32) {
    %c0_i32 = arith.constant 0 : i32
    %c0_i32_0 = arith.constant 0 : i32
    %c0_i32_1 = arith.constant 0 : i32
    return %c0_i32, %c0_i32_0 : i32, i32
  }
  func.func @transform_4(%arg0: i32) -> (i32, i32) {
    %c0_i32 = arith.constant 0 : i32
    %c0_i32_0 = arith.constant 0 : i32
    %c0_i32_1 = arith.constant 0 : i32
    return %c0_i32, %c0_i32_0 : i32, i32
  }
}

</mosaic_0001>

<bundles_post_ra>
// kernel: custom_model2_forward.1
= control target key start
LH: loop header
LB: loop body
LE: loop exit
PB: predicated region body
PF: predicated region fallthrough
CT: control target
= control target key end

     0   :  { %s5036_s0 = inlined_call_operand.vmem [shape: f32[648,128], index: 0, kind: input, shape index: {}]   ;;  %s5037_s1 = inlined_call_operand.vmem [shape: f32[2,128], index: 1, kind: input, shape index: {}]   ;;  %s5038_s2 = inlined_call_operand.vmem [shape: f32[2072,128], index: 2, kind: input, shape index: {}]   ;;  %s5039_s3 = inlined_call_operand.vmem [shape: f32[784,200], index: 3, kind: input, shape index: {}]   ;;  %s5040_s4 = inlined_call_operand.hbm [shape: f32[2,128], index: 4, kind: output, shape index: {}]  }
   0x1   :  { %v114_v0 = vld [vmem:[%s5038_s2 + $0x78] sm:$0xff]  ;;  %v113_v1 = vld [vmem:[%s5038_s2 + $0x70] sm:$0xff]  ;;  %v112_v2 = vld [vmem:[%s5038_s2 + $0x68] sm:$0xff] }
   0x2   :  { %115 = vmatpush.msra.mxu0 %v114_v0  ;;  %2483 = vmatpush.msra.mxu2 %v114_v0  ;;  %v111_v3 = vld [vmem:[%s5038_s2 + $0x60] sm:$0xff]  ;;  %v110_v4 = vld [vmem:[%s5038_s2 + $0x58] sm:$0xff] }
   0x3   :  { %2482 = vmatpush.msra.mxu1 %v114_v0 }
   0x4   :  { %116 = vmatpush.msra.mxu0 %v113_v1  ;;  %2485 = vmatpush.msra.mxu2 %v113_v1 }
   0x5   :  { %2484 = vmatpush.msra.mxu1 %v113_v1 }
   0x6   :  { %117 = vmatpush.msra.mxu0 %v112_v2  ;;  %2487 = vmatpush.msra.mxu2 %v112_v2 }
   0x7   :  { %2486 = vmatpush.msra.mxu1 %v112_v2 }
   0x8   :  { %118 = vmatpush.msra.mxu0 %v111_v3  ;;  %2489 = vmatpush.msra.mxu2 %v111_v3 }
   0x9   :  { %9 = vsyncpa [#allocation7], 0  ;;  %v109_v5 = vld [vmem:[%s5038_s2 + $0x50] sm:$0xff]  ;;  %2488 = vmatpush.msra.mxu1 %v111_v3  ;;  %v108_v6 = vld [vmem:[%s5038_s2 + $0x48] sm:$0xff]  ;;  %vm522_vm0 = vcmask 1043456   ;;  %vm2212_vm1 = vcmask 588800  }
   0xa   :  { %119 = vmatpush.msra.mxu0 %v110_v4  ;;  %2491 = vmatpush.msra.mxu2 %v110_v4  ;;  %v107_v7 = vld [vmem:[%s5038_s2 + $0x40] sm:$0xff]  ;;  %v106_v8 = vld [vmem:[%s5038_s2 + $0x38] sm:$0xff]  ;;  %v105_v9 = vld [vmem:[%s5038_s2 + $0x30] sm:$0xff]  ;;  %s2549_s25 = smov [#allocation6]   ;;  %s2468_s28 = sshll.u32 %s5040_s4, 4  ;;  %s2469_s28 = int_to_ptr.hbm [resolvable:$true] %s2468_s28 }
   0xb   :  { %2490 = vmatpush.msra.mxu1 %v110_v4  ;;  %v104_v10 = vld [vmem:[%s5038_s2 + $0x28] sm:$0xff]  ;;  %v103_v11 = vld [vmem:[%s5038_s2 + $0x20] sm:$0xff]  ;;  %v102_v12 = vld [vmem:[%s5038_s2 + $0x18] sm:$0xff]  ;;  %s2466_s26 = sshll.u32 %s2549_s25, 4  ;;  %s2467_s26 = int_to_ptr.vmem [resolvable:$true] %s2466_s26 }
   0xc   :  { %120 = vmatpush.msra.mxu0 %v109_v5  ;;  %2493 = vmatpush.msra.mxu2 %v109_v5  ;;  %v101_v13 = vld [vmem:[%s5038_s2 + $0x10] sm:$0xff]  ;;  %v100_v14 = vld [vmem:[%s5038_s2 + $0x8] sm:$0xff]  ;;  %v99_v15 = vld [vmem:[%s5038_s2] sm:$0xff] }
   0xd   :  { %2492 = vmatpush.msra.mxu1 %v109_v5  ;;  %v18_v16 = vld [vmem:[%s5036_s0] sm:$0xff]  ;;  %v19_v17 = vld [vmem:[%s5036_s0 + $0x8] sm:$0xff]  ;;  %v20_v18 = vld [vmem:[%s5036_s0 + $0x10] sm:$0xff] }
   0xe   :  { %121 = vmatpush.msra.mxu0 %v108_v6  ;;  %2495 = vmatpush.msra.mxu2 %v108_v6  ;;  %v21_v19 = vld [vmem:[%s5036_s0 + $0x18] sm:$0xff]  ;;  %v22_v20 = vld [vmem:[%s5036_s0 + $0x20] sm:$0xff]  ;;  %v23_v21 = vld [vmem:[%s5036_s0 + $0x28] sm:$0xff] }
   0xf   :  { %2494 = vmatpush.msra.mxu1 %v108_v6  ;;  %v24_v22 = vld [vmem:[%s5036_s0 + $0x30] sm:$0xff]  ;;  %v25_v23 = vld [vmem:[%s5036_s0 + $0x38] sm:$0xff]  ;;  %v26_v24 = vld [vmem:[%s5036_s0 + $0x40] sm:$0xff] }
  0x10   :  { %122 = vmatpush.msra.mxu0 %v107_v7  ;;  %2497 = vmatpush.msra.mxu2 %v107_v7  ;;  %v27_v25 = vld [vmem:[%s5036_s0 + $0x48] sm:$0xff]  ;;  %v28_v26 = vld [vmem:[%s5036_s0 + $0x50] sm:$0xff]  ;;  %v29_v27 = vld [vmem:[%s5036_s0 + $0x58] sm:$0xff] }
  0x11   :  { %2496 = vmatpush.msra.mxu1 %v107_v7  ;;  %v30_v28 = vld [vmem:[%s5036_s0 + $0x60] sm:$0xff]  ;;  %v31_v29 = vld [vmem:[%s5036_s0 + $0x68] sm:$0xff]  ;;  %v32_v30 = vld [vmem:[%s5036_s0 + $0x70] sm:$0xff] }
  0x12   :  { %123 = vmatpush.msra.mxu0 %v106_v8  ;;  %2499 = vmatpush.msra.mxu2 %v106_v8  ;;  %v33_v31 = vld [vmem:[%s5036_s0 + $0x78] sm:$0xff]  ;;  %v34_v33 = vld [vmem:[%s5036_s0 + $0x80] sm:$0xff]  ;;  %v35_v35 = vld [vmem:[%s5036_s0 + $0x88] sm:$0xff] }
  0x13   :  { %2498 = vmatpush.msra.mxu1 %v106_v8  ;;  %v36_v37 = vld [vmem:[%s5036_s0 + $0x90] sm:$0xff]  ;;  %v37_v39 = vld [vmem:[%s5036_s0 + $0x98] sm:$0xff]  ;;  %v38_v41 = vld [vmem:[%s5036_s0 + $0xa0] sm:$0xff] }
  0x14   :  { %124 = vmatpush.msra.mxu0 %v105_v9  ;;  %2501 = vmatpush.msra.mxu2 %v105_v9  ;;  %v39_v43 = vld [vmem:[%s5036_s0 + $0xa8] sm:$0xff]  ;;  %v40_v45 = vld [vmem:[%s5036_s0 + $0xb0] sm:$0xff]  ;;  %v41_v47 = vld [vmem:[%s5036_s0 + $0xb8] sm:$0xff] }
  0x15   :  { %2500 = vmatpush.msra.mxu1 %v105_v9  ;;  %v42_v49 = vld [vmem:[%s5036_s0 + $0xc0] sm:$0xff]  ;;  %v43_v51 = vld [vmem:[%s5036_s0 + $0xc8] sm:$0xff]  ;;  %v44_v53 = vld [vmem:[%s5036_s0 + $0xd0] sm:$0xff] }
  0x16   :  { %125 = vmatpush.msra.mxu0 %v104_v10  ;;  %2503 = vmatpush.msra.mxu2 %v104_v10  ;;  %v45_v55 = vld [vmem:[%s5036_s0 + $0xd8] sm:$0xff]  ;;  %v46_v57 = vld [vmem:[%s5036_s0 + $0xe0] sm:$0xff]  ;;  %v47_v59 = vld [vmem:[%s5036_s0 + $0xe8] sm:$0xff] }
  0x17   :  { %2502 = vmatpush.msra.mxu1 %v104_v10  ;;  %v48_v61 = vld [vmem:[%s5036_s0 + $0xf0] sm:$0xff]  ;;  %v49_v63 = vld [vmem:[%s5036_s0 + $0xf8] sm:$0xff]  ;;  %v50_v1 = vld [vmem:[%s5036_s0 + $0x100] sm:$0xff] }
  0x18   :  { %126 = vmatpush.msra.mxu0 %v103_v11  ;;  %2505 = vmatpush.msra.mxu2 %v103_v11  ;;  %v81_v2 = vld [vmem:[%s5036_s0 + $0x1f8] sm:$0xff]  ;;  %v51_v4 = vld [vmem:[%s5036_s0 + $0x108] sm:$0xff]  ;;  %v82_v5 = vld [vmem:[%s5036_s0 + $0x200] sm:$0xff] }
  0x19   :  { %2504 = vmatpush.msra.mxu1 %v103_v11  ;;  %v52_v7 = vld [vmem:[%s5036_s0 + $0x110] sm:$0xff]  ;;  %v83_v8 = vld [vmem:[%s5036_s0 + $0x208] sm:$0xff]  ;;  %v53_v10 = vld [vmem:[%s5036_s0 + $0x118] sm:$0xff] }
  0x1a   :  { %127 = vmatpush.msra.mxu0 %v102_v12  ;;  %2507 = vmatpush.msra.mxu2 %v102_v12  ;;  %v84_v11 = vld [vmem:[%s5036_s0 + $0x210] sm:$0xff] }
  0x1b   :  { %2506 = vmatpush.msra.mxu1 %v102_v12 }
  0x1c   :  { %128 = vmatpush.msra.mxu0 %v101_v13  ;;  %2509 = vmatpush.msra.mxu2 %v101_v13 }
  0x1d   :  { %2508 = vmatpush.msra.mxu1 %v101_v13  ;;  %v54_v13 = vld [vmem:[%s5036_s0 + $0x120] sm:$0xff] }
  0x1e   :  { %129 = vmatpush.msra.mxu0 %v100_v14  ;;  %2511 = vmatpush.msra.mxu2 %v100_v14 }
  0x1f   :  { %2510 = vmatpush.msra.mxu1 %v100_v14  ;;  %v85_v14 = vld [vmem:[%s5036_s0 + $0x218] sm:$0xff] }
  0x20   :  { %130 = vmatpush.msra.mxu0 %v99_v15  ;;  %2513 = vmatpush.msra.mxu2 %v99_v15 }
  0x21   :  { %131 = vmatmul.f32.vlgmr.msra.gmra.mxu0 %v18_v16  ;;  %2512 = vmatpush.msra.mxu1 %v99_v15  ;;  %v55_v16 = vld [vmem:[%s5036_s0 + $0x128] sm:$0xff] }
  0x22   :  { %320 = vmatmul.f32.vlgmr.msra.gmra.mxu2 %v81_v2  ;;  %v65_v2 = vld [vmem:[%s5036_s0 + $0x178] sm:$0xff] }
  0x29   :  { %134 = vmatmul.f32.gmra.mxu0 %v19_v17  ;;  %v86_v17 = vld [vmem:[%s5036_s0 + $0x220] sm:$0xff] }
  0x2a   :  { %323 = vmatmul.f32.gmra.mxu2 %v82_v5  ;;  %v78_v5 = vld [vmem:[%s5036_s0 + $0x1e0] sm:$0xff] }
  0x31   :  { %137 = vmatmul.f32.gmra.mxu0 %v20_v18 }
  0x32   :  { %326 = vmatmul.f32.gmra.mxu2 %v83_v8  ;;  %v66_v8 = vld [vmem:[%s5036_s0 + $0x180] sm:$0xff] }
  0x39   :  { %140 = vmatmul.f32.gmra.mxu0 %v21_v19  ;;  %v56_v19 = vld [vmem:[%s5036_s0 + $0x130] sm:$0xff] }
  0x3a   :  { %329 = vmatmul.f32.gmra.mxu2 %v84_v11  ;;  %v79_v11 = vld [vmem:[%s5036_s0 + $0x1e8] sm:$0xff] }
  0x41   :  { %143 = vmatmul.f32.gmra.mxu0 %v22_v20  ;;  %v87_v20 = vld [vmem:[%s5036_s0 + $0x228] sm:$0xff] }
  0x42   :  { %332 = vmatmul.f32.gmra.mxu2 %v85_v14 }
  0x49   :  { %146 = vmatmul.f32.gmra.mxu0 %v23_v21 }
  0x4a   :  { %335 = vmatmul.f32.gmra.mxu2 %v86_v17  ;;  %v98_v17 = vld [vmem:[%s5036_s0 + $0x280] sm:$0xff] }
  0x51   :  { %149 = vmatmul.f32.gmra.mxu0 %v24_v22  ;;  %v57_v22 = vld [vmem:[%s5036_s0 + $0x138] sm:$0xff] }
  0x52   :  { %338 = vmatmul.f32.gmra.mxu2 %v87_v20 }
  0x59   :  { %152 = vmatmul.f32.gmra.mxu0 %v25_v23  ;;  %v88_v23 = vld [vmem:[%s5036_s0 + $0x230] sm:$0xff] }
  0x5a   :  { %341 = vmatmul.f32.gmra.mxu2 %v88_v23  ;;  %v68_v23 = vld [vmem:[%s5036_s0 + $0x190] sm:$0xff] }
  0x61   :  { %155 = vmatmul.f32.gmra.mxu0 %v26_v24 }
  0x69   :  { %158 = vmatmul.f32.gmra.mxu0 %v27_v25  ;;  %v58_v25 = vld [vmem:[%s5036_s0 + $0x140] sm:$0xff] }
  0x71   :  { %161 = vmatmul.f32.gmra.mxu0 %v28_v26  ;;  %v89_v26 = vld [vmem:[%s5036_s0 + $0x238] sm:$0xff] }
  0x72   :  { %344 = vmatmul.f32.gmra.mxu2 %v89_v26 }
  0x79   :  { %164 = vmatmul.f32.gmra.mxu0 %v29_v27 }
  0x81   :  { %167 = vmatmul.f32.gmra.mxu0 %v30_v28  ;;  %v59_v28 = vld [vmem:[%s5036_s0 + $0x148] sm:$0xff] }
  0x89   :  { %170 = vmatmul.f32.gmra.mxu0 %v31_v29  ;;  %v90_v29 = vld [vmem:[%s5036_s0 + $0x240] sm:$0xff] }
  0x8a   :  { %347 = vmatmul.f32.gmra.mxu2 %v90_v29 }
  0x91   :  { %173 = vmatmul.f32.gmra.mxu0 %v32_v30 }
  0x99   :  { %176 = vmatmul.f32.gmra.mxu0 %v33_v31  ;;  %v60_v31 = vld [vmem:[%s5036_s0 + $0x150] sm:$0xff] }
  0x9e   :  { %v2671_v32 = vpop.f32.mrf.mxu0 }
  0xa1   :  { %179 = vmatmul.f32.gmra.mxu0 %v34_v33  ;;  %v91_v33 = vld [vmem:[%s5036_s0 + $0x248] sm:$0xff] }
  0xa2   :  { %350 = vmatmul.f32.gmra.mxu2 %v91_v33 }
  0xa6   :  { %v2676_v34 = vpop.f32.mrf.mxu0 }
  0xa9   :  { %182 = vmatmul.f32.gmra.mxu0 %v35_v35 }
  0xae   :  { %v2681_v36 = vpop.f32.mrf.mxu0 }
  0xb1   :  { %185 = vmatmul.f32.gmra.mxu0 %v36_v37  ;;  %v61_v37 = vld [vmem:[%s5036_s0 + $0x158] sm:$0xff] }
  0xb6   :  { %v2686_v38 = vpop.f32.mrf.mxu0 }
  0xb9   :  { %188 = vmatmul.f32.gmra.mxu0 %v37_v39  ;;  %v92_v39 = vld [vmem:[%s5036_s0 + $0x250] sm:$0xff] }
  0xba   :  { %353 = vmatmul.f32.gmra.mxu2 %v92_v39  ;;  %v71_v39 = vld [vmem:[%s5036_s0 + $0x1a8] sm:$0xff] }
  0xbe   :  { %v2691_v40 = vpop.f32.mrf.mxu0 }
  0xc1   :  { %191 = vmatmul.f32.gmra.mxu0 %v38_v41 }
  0xc6   :  { %v2696_v42 = vpop.f32.mrf.mxu0 }
  0xc9   :  { %194 = vmatmul.f32.gmra.mxu0 %v39_v43  ;;  %v62_v43 = vld [vmem:[%s5036_s0 + $0x160] sm:$0xff] }
  0xce   :  { %v2701_v44 = vpop.f32.mrf.mxu0 }
  0xd1   :  { %197 = vmatmul.f32.gmra.mxu0 %v40_v45  ;;  %v93_v45 = vld [vmem:[%s5036_s0 + $0x258] sm:$0xff] }
  0xd2   :  { %356 = vmatmul.f32.gmra.mxu2 %v93_v45 }
  0xd6   :  { %v2706_v46 = vpop.f32.mrf.mxu0 }
  0xd9   :  { %200 = vmatmul.f32.gmra.mxu0 %v41_v47  ;;  %v75_v47 = vld [vmem:[%s5036_s0 + $0x1c8] sm:$0xff] }
  0xda   :  { %302 = vmatmul.f32.vlgmr.msra.gmra.mxu1 %v75_v47  ;;  %v72_v47 = vld [vmem:[%s5036_s0 + $0x1b0] sm:$0xff] }
  0xde   :  { %v2711_v48 = vpop.f32.mrf.mxu0 }
  0xe1   :  { %203 = vmatmul.f32.gmra.mxu0 %v42_v49 }
  0xe6   :  { %v2716_v50 = vpop.f32.mrf.mxu0 }
  0xe9   :  { %206 = vmatmul.f32.gmra.mxu0 %v43_v51  ;;  %v63_v51 = vld [vmem:[%s5036_s0 + $0x168] sm:$0xff] }
  0xee   :  { %v2721_v52 = vpop.f32.mrf.mxu0 }
  0xf1   :  { %209 = vmatmul.f32.gmra.mxu0 %v44_v53  ;;  %v94_v53 = vld [vmem:[%s5036_s0 + $0x260] sm:$0xff] }
  0xf2   :  { %359 = vmatmul.f32.gmra.mxu2 %v94_v53 }
  0xf6   :  { %v2726_v54 = vpop.f32.mrf.mxu0 }
  0xf9   :  { %212 = vmatmul.f32.gmra.mxu0 %v45_v55  ;;  %v76_v55 = vld [vmem:[%s5036_s0 + $0x1d0] sm:$0xff] }
  0xfa   :  { %305 = vmatmul.f32.gmra.mxu1 %v76_v55  ;;  %v73_v55 = vld [vmem:[%s5036_s0 + $0x1b8] sm:$0xff] }
  0xfe   :  { %v2731_v56 = vpop.f32.mrf.mxu0 }
 0x101   :  { %215 = vmatmul.f32.gmra.mxu0 %v46_v57 }
 0x106   :  { %v2736_v58 = vpop.f32.mrf.mxu0 }
 0x109   :  { %218 = vmatmul.f32.gmra.mxu0 %v47_v59  ;;  %v64_v59 = vld [vmem:[%s5036_s0 + $0x170] sm:$0xff] }
 0x10e   :  { %v2741_v60 = vpop.f32.mrf.mxu0 }
 0x111   :  { %221 = vmatmul.f32.gmra.mxu0 %v48_v61  ;;  %v95_v61 = vld [vmem:[%s5036_s0 + $0x268] sm:$0xff] }
 0x112   :  { %362 = vmatmul.f32.gmra.mxu2 %v95_v61 }
 0x116   :  { %v2746_v62 = vpop.f32.mrf.mxu0 }
 0x119   :  { %224 = vmatmul.f32.gmra.mxu0 %v49_v63  ;;  %v77_v63 = vld [vmem:[%s5036_s0 + $0x1d8] sm:$0xff] }
 0x11a   :  { %308 = vmatmul.f32.gmra.mxu1 %v77_v63  ;;  %v74_v63 = vld [vmem:[%s5036_s0 + $0x1c0] sm:$0xff] }
 0x11e   :  { %v2751_v0 = vpop.f32.mrf.mxu0 }
 0x121   :  { %227 = vmatmul.f32.gmra.mxu0 %v50_v1 }
 0x122   :  { %311 = vmatmul.f32.gmra.mxu1 %v78_v5  ;;  %v381_v5 = vmax.f32 %v2701_v44, %v2746_v62 }
 0x126   :  { %v2759_v3 = vpop.f32.mrf.mxu0 }
 0x127   :  { %v383_v44 = vmax.f32 %v2711_v48, %v2759_v3  ;;  %v376_v3 = vmax.f32 %v2676_v34, %v2721_v52  ;;  %v3372_v34 = vld [vmem:[%s5038_s2 + $0x730] sm:$0xff] }
 0x129   :  { %230 = vmatmul.f32.gmra.mxu0 %v51_v4  ;;  %v96_v4 = vld [vmem:[%s5036_s0 + $0x270] sm:$0xff] }
 0x12a   :  { %365 = vmatmul.f32.gmra.mxu2 %v96_v4  ;;  %314 = vmatmul.f32.gmra.mxu1 %v79_v11 }
 0x12e   :  { %v2767_v6 = vpop.f32.mrf.mxu0 }
 0x131   :  { %233 = vmatmul.f32.gmra.mxu0 %v52_v7 }
 0x136   :  { %v2775_v9 = vpop.f32.mrf.mxu0 }
 0x139   :  { %236 = vmatmul.f32.gmra.mxu0 %v53_v10  ;;  %v97_v10 = vld [vmem:[%s5036_s0 + $0x278] sm:$0xff] }
 0x13a   :  { %368 = vmatmul.f32.gmra.mxu2 %v97_v10 }
 0x13e   :  { %v2783_v12 = vpop.f32.mrf.mxu0 }
 0x141   :  { %239 = vmatmul.f32.gmra.mxu0 %v54_v13  ;;  %v2902_v13 = vpop.f32.mrf.mxu2 }
 0x142   :  { %371 = vmatmul.f32.gmra.mxu2 %v98_v17 }
 0x146   :  { %v2791_v15 = vpop.f32.mrf.mxu0 }
 0x149   :  { %242 = vmatmul.f32.gmra.mxu0 %v55_v16  ;;  %v67_v16 = vld [vmem:[%s5036_s0 + $0x188] sm:$0xff]  ;;  %v2913_v20 = vpop.f32.mrf.mxu2 }
 0x14e   :  { %v2799_v18 = vpop.f32.mrf.mxu0 }
 0x151   :  { %245 = vmatmul.f32.gmra.mxu0 %v56_v19  ;;  %v80_v19 = vld [vmem:[%s5036_s0 + $0x1f0] sm:$0xff] }
 0x152   :  { %317 = vmatmul.f32.gmra.mxu1 %v80_v19  ;;  %v382_v19 = vmax.f32 %v2706_v46, %v2751_v0 }
 0x156   :  { %v2807_v21 = vpop.f32.mrf.mxu0 }
 0x159   :  { %248 = vmatmul.f32.gmra.mxu0 %v57_v22 }
 0x15e   :  { %v2815_v24 = vpop.f32.mrf.mxu0 }
 0x161   :  { %251 = vmatmul.f32.gmra.mxu0 %v58_v25  ;;  %v2918_v25 = vpop.f32.mrf.mxu2 }
 0x166   :  { %v2823_v27 = vpop.f32.mrf.mxu0 }
 0x169   :  { %254 = vmatmul.f32.gmra.mxu0 %v59_v28  ;;  %v69_v28 = vld [vmem:[%s5036_s0 + $0x198] sm:$0xff]  ;;  %v2926_v33 = vpop.f32.mrf.mxu2 }
 0x16e   :  { %v2831_v30 = vpop.f32.mrf.mxu0 }
 0x171   :  { %257 = vmatmul.f32.gmra.mxu0 %v60_v31  ;;  %v70_v31 = vld [vmem:[%s5036_s0 + $0x1a0] sm:$0xff] }
 0x176   :  { %v2839_v35 = vpop.f32.mrf.mxu0 }
 0x179   :  { %260 = vmatmul.f32.gmra.mxu0 %v61_v37 }
 0x17e   :  { %v2847_v41 = vpop.f32.mrf.mxu0 }
 0x181   :  { %263 = vmatmul.f32.gmra.mxu0 %v62_v43  ;;  %v2931_v43 = vpop.f32.mrf.mxu2 }
 0x186   :  { %v2858_v49 = vpop.f32.mrf.mxu0 }
 0x189   :  { %266 = vmatmul.f32.gmra.mxu0 %v63_v51  ;;  %v2936_v51 = vpop.f32.mrf.mxu2 }
 0x18e   :  { %v2869_v57 = vpop.f32.mrf.mxu0 }
 0x191   :  { %269 = vmatmul.f32.gmra.mxu0 %v64_v59  ;;  %v2941_v59 = vpop.f32.mrf.mxu2 }
 0x196   :  { %v2880_v1 = vpop.f32.mrf.mxu0 }
 0x199   :  { %272 = vmatmul.f32.gmra.mxu0 %v65_v2  ;;  %v2950_v4 = vpop.f32.mrf.mxu2 }
 0x19e   :  { %v2891_v7 = vpop.f32.mrf.mxu0 }
 0x1a1   :  { %275 = vmatmul.f32.gmra.mxu0 %v66_v8  ;;  %v390_v8 = vmax.f32 %v381_v5, %v2815_v24  ;;  %v2957_v17 = vpop.f32.mrf.mxu2  ;;  %v392_v24 = vmax.f32 %v383_v44, %v2831_v30  ;;  %v377_v5 = vmax.f32 %v2681_v36, %v2726_v54  ;;  %v3027_v44 = vld [vmem:[%s5038_s2 + $0x80] ss:$0 sm:$0xff] }
 0x1a3   :  { %v386_v52 = vmax.f32 %v377_v5, %v2783_v12  ;;  %v1134_v12 = vld [vmem:[%s5038_s2 + $0x300] sm:$0xff]  ;;  %v1084_v5 = vld [vmem:[%s5038_s2 + $0x170] sm:$0xff] }
 0x1a4   :  { %1375 = vmatpush.msrb.mxu2 %v1134_v12 }
 0x1a6   :  { %v231_v14 = vpop.f32.mrf.mxu0 }
 0x1a7   :  { %v399_v10 = vmax.f32 %v390_v8, %v231_v14  ;;  %v303_v8 = vpop.f32.mrf.mxu1 }
 0x1a9   :  { %278 = vmatmul.f32.gmra.mxu0 %v67_v16  ;;  %v2966_v62 = vpop.f32.mrf.mxu2 }
 0x1ae   :  { %v234_v22 = vpop.f32.mrf.mxu0 }
 0x1b1   :  { %281 = vmatmul.f32.gmra.mxu0 %v68_v23  ;;  %v391_v23 = vmax.f32 %v382_v19, %v2823_v27  ;;  %v2975_v27 = vpop.f32.mrf.mxu2 }
 0x1b6   :  { %v237_v26 = vpop.f32.mrf.mxu0 }
 0x1b7   :  { %v401_v14 = vmax.f32 %v392_v24, %v237_v26 }
 0x1b9   :  { %284 = vmatmul.f32.gmra.mxu0 %v69_v28  ;;  %v400_v28 = vmax.f32 %v391_v23, %v234_v22 }
 0x1be   :  { %v240_v29 = vpop.f32.mrf.mxu0 }
 0x1c1   :  { %287 = vmatmul.f32.gmra.mxu0 %v70_v31 }
 0x1c6   :  { %v243_v37 = vpop.f32.mrf.mxu0 }
 0x1c9   :  { %290 = vmatmul.f32.gmra.mxu0 %v71_v39 }
 0x1ce   :  { %v246_v45 = vpop.f32.mrf.mxu0 }
 0x1d1   :  { %293 = vmatmul.f32.gmra.mxu0 %v72_v47 }
 0x1d6   :  { %v249_v53 = vpop.f32.mrf.mxu0 }
 0x1d9   :  { %296 = vmatmul.f32.gmra.mxu0 %v73_v55  ;;  %v375_v55 = vmax.f32 %v2671_v32, %v2716_v50  ;;  %v385_v32 = vmax.f32 %v376_v3, %v2775_v9  ;;  %v2548_v50 = vmov 0.0   ;;  %v395_v9 = vmax.f32 %v386_v52, %v2858_v49  ;;  %v1128_v52 = vld [vmem:[%s5038_s2 + $0x2d0] sm:$0xff] }
 0x1da   :  { %477 = vst [vmem:[#allocation2 + $0x50] sm:$0xff] %v2548_v50 }
 0x1db   :  { %v384_v46 = vmax.f32 %v375_v55, %v2767_v6  ;;  %v394_v6 = vmax.f32 %v385_v32, %v2847_v41  ;;  %467 = vst [vmem:[#allocation2] sm:$0xff] %v2548_v50 }
 0x1dd   :  { %v393_v0 = vmax.f32 %v384_v46, %v2839_v35  ;;  %v2987_v35 = vmax.f32 %v394_v6, %v243_v37  ;;  %v378_v37 = vmax.f32 %v2686_v38, %v2731_v56  ;;  %v306_v38 = vpop.f32.mrf.mxu1  ;;  %v379_v56 = vmax.f32 %v2691_v40, %v2736_v58  ;;  %v1068_v6 = vld [vmem:[%s5038_s2 + $0xf0] sm:$0xff] }
 0x1de   :  { %v2943_v61 = vpop.f32.mrf.mxu0 }
 0x1df   :  { %v2977_v22 = vmax.f32 %v393_v0, %v240_v29  ;;  %v2991_v29 = vpop.f32.mrf.mxu2  ;;  %v387_v36 = vmax.f32 %v378_v37, %v2791_v15  ;;  %v1132_v15 = vld [vmem:[%s5038_s2 + $0x2f0] sm:$0xff]  ;;  %v1129_v0 = vld [vmem:[%s5038_s2 + $0x2d8] sm:$0xff] }
 0x1e1   :  { %299 = vmatmul.f32.gmra.mxu0 %v74_v63  ;;  %v396_v54 = vmax.f32 %v387_v36, %v2869_v57  ;;  %v388_v57 = vmax.f32 %v379_v56, %v2799_v18  ;;  %v1070_v18 = vld [vmem:[%s5038_s2 + $0x100] sm:$0xff]  ;;  %v1083_v36 = vld [vmem:[%s5038_s2 + $0x168] sm:$0xff] }
 0x1e2   :  { %1199 = vmatpush.msrb.mxu1 %v1070_v18  ;;  %v3114_v18 = vld [vmem:[%s5038_s2 + $0x6d0] sm:$0xf] }
 0x1e3   :  { %v405_v49 = vmax.f32 %v396_v54, %v249_v53  ;;  %v1131_v53 = vld [vmem:[%s5038_s2 + $0x2e8] sm:$0xff]  ;;  %v397_v40 = vmax.f32 %v388_v57, %v2880_v1  ;;  %v1069_v1 = vld [vmem:[%s5038_s2 + $0xf8] sm:$0xff] }
 0x1e4   :  { %1200 = vmatpush.msrb.mxu1 %v1069_v1  ;;  %v1127_v54 = vld [vmem:[%s5038_s2 + $0x2c8] sm:$0xff]  ;;  %v1125_v57 = vld [vmem:[%s5038_s2 + $0x2b8] sm:$0xff] }
 0x1e5   :  { %v406_v55 = vmax.f32 %v397_v40, %v2943_v61  ;;  %v380_v61 = vmax.f32 %v2696_v42, %v2741_v60  ;;  %v3065_v42 = vld [vmem:[%s5038_s2 + $0x768] sm:$0xff]  ;;  %v1080_v40 = vld [vmem:[%s5038_s2 + $0x150] sm:$0xff] }
 0x1e6   :  { %v2948_v2 = vpop.f32.mrf.mxu0  ;;  %1201 = vmatpush.msrb.mxu1 %v1068_v6  ;;  %v1079_v1 = vld [vmem:[%s5038_s2 + $0x148] sm:$0xff]  ;;  %v1078_v6 = vld [vmem:[%s5038_s2 + $0x140] sm:$0xff] }
 0x1e7   :  { %v357_v19 = vpop.f32.mrf.mxu2  ;;  %v389_v60 = vmax.f32 %v380_v61, %v2807_v21 }
 0x1e9   :  { %v398_v12 = vmax.f32 %v389_v60, %v2891_v7 }
 0x1ee   :  { %v258_v11 = vpop.f32.mrf.mxu0 }
 0x1ef   :  { %v2955_v16 = vmax.f32 %v399_v10, %v258_v11  ;;  %v2999_v10 = vmax.f32 %v395_v9, %v246_v45  ;;  %v1133_v45 = vld [vmem:[%s5038_s2 + $0x2f8] sm:$0xff]  ;;  %v360_v24 = vpop.f32.mrf.mxu2  ;;  %v309_v9 = vpop.f32.mrf.mxu1  ;;  %v3367_v11 = vld [vmem:[%s5038_s2 + $0x7c8] sm:$0xff] }
 0x1f0   :  { %1376 = vmatpush.msrb.mxu2 %v1133_v45  ;;  %v1082_v45 = vld [vmem:[%s5038_s2 + $0x160] sm:$0xff] }
 0x1f2   :  { %1377 = vmatpush.msrb.mxu2 %v1132_v15  ;;  %v1081_v15 = vld [vmem:[%s5038_s2 + $0x158] sm:$0xff] }
 0x1f4   :  { %1378 = vmatpush.msrb.mxu2 %v1131_v53 }
 0x1f6   :  { %v261_v31 = vpop.f32.mrf.mxu0 }
 0x1f7   :  { %v2962_v39 = vmax.f32 %v400_v28, %v261_v31  ;;  %v363_v7 = vpop.f32.mrf.mxu2 }
 0x1fe   :  { %v264_v47 = vpop.f32.mrf.mxu0 }
 0x1ff   :  { %v2971_v63 = vmax.f32 %v401_v14, %v264_v47  ;;  %v1086_v14 = vld [vmem:[%s5038_s2 + $0x180] sm:$0xff] }
 0x200   :  { %v1130_v47 = vld [vmem:[%s5038_s2 + $0x2e0] sm:$0xff]  ;;  %1243 = vmatpush.msra.mxu3 %v1086_v14  ;;  %v3119_v14 = vld [vmem:[%s5038_s2 + $0x6f8] sm:$0xf] }
 0x201   :  { %1379 = vmatpush.msrb.mxu2 %v1130_v47 }
 0x203   :  { %1380 = vmatpush.msrb.mxu2 %v1129_v0  ;;  %v312_v0 = vpop.f32.mrf.mxu1 }
 0x205   :  { %1381 = vmatpush.msrb.mxu2 %v1128_v52 }
 0x206   :  { %v2979_v48 = vpop.f32.mrf.mxu0 }
 0x207   :  { %1382 = vmatpush.msrb.mxu2 %v1127_v54  ;;  %v366_v54 = vpop.f32.mrf.mxu2 }
 0x20e   :  { %v2989_v26 = vpop.f32.mrf.mxu0 }
 0x216   :  { %v3001_v41 = vpop.f32.mrf.mxu0 }
 0x21e   :  { %v276_v23 = vpop.f32.mrf.mxu0 }
 0x21f   :  { %v414_v28 = vmax.f32 %v405_v49, %v276_v23  ;;  %v1066_v49 = vld [vmem:[%s5038_s2 + $0xe0] sm:$0xff] }
 0x220   :  { %v1126_v23 = vld [vmem:[%s5038_s2 + $0x2c0] sm:$0xff] }
 0x221   :  { %v423_v31 = vmax.f32 %v414_v28, %v303_v8  ;;  %v1065_v28 = vld [vmem:[%s5038_s2 + $0xd8] sm:$0xff]  ;;  %1383 = vmatpush.msrb.mxu2 %v1126_v23 }
 0x223   :  { %v432_v58 = vmax.f32 %v423_v31, %v2926_v33  ;;  %v1085_v33 = vld [vmem:[%s5038_s2 + $0x178] sm:$0xff]  ;;  %1384 = vmatpush.msrb.mxu2 %v1125_v57  ;;  %v3191_v57 = vld [vmem:[%s5038_s2 + $0x7e0] sm:$0xff] }
 0x224   :  { %1244 = vmatpush.msra.mxu3 %v1085_v33  ;;  %v1123_v33 = vld [vmem:[%s5038_s2 + $0x2a8] sm:$0xff] }
 0x225   :  { %v441_v46 = vmax.f32 %v432_v58, %v357_v19  ;;  %v1067_v19 = vld [vmem:[%s5038_s2 + $0xe8] sm:$0xff]  ;;  %v1124_v58 = vld [vmem:[%s5038_s2 + $0x2b0] sm:$0xff] }
 0x226   :  { %v279_v3 = vpop.f32.mrf.mxu0  ;;  %1245 = vmatpush.msra.mxu3 %v1084_v5  ;;  %1202 = vmatpush.msrb.mxu1 %v1067_v19  ;;  %v1122_v5 = vld [vmem:[%s5038_s2 + $0x2a0] sm:$0xff]  ;;  %v1121_v19 = vld [vmem:[%s5038_s2 + $0x298] sm:$0xff] }
 0x227   :  { %v452_v32 = vadd.f32 %v3027_v44, %v441_v46  ;;  %v415_v50 = vmax.f32 %v406_v55, %v279_v3  ;;  %v1063_v46 = vld [vmem:[%s5038_s2 + $0xc8] sm:$0xff]  ;;  %1385 = vmatpush.msrb.mxu2 %v1124_v58 }
 0x228   :  { %1246 = vmatpush.msra.mxu3 %v1083_v36  ;;  %1203 = vmatpush.msrb.mxu1 %v1066_v49 }
 0x229   :  { %v461_v8 = vmax.f32 %v452_v32, 0.0  ;;  %v424_v37 = vmax.f32 %v415_v50, %v306_v38  ;;  %v1062_v50 = vld [vmem:[%s5038_s2 + $0xc0] sm:$0xff]  ;;  %1386 = vmatpush.msrb.mxu2 %v1123_v33 }
 0x22a   :  { %1247 = vmatpush.msra.mxu3 %v1082_v45  ;;  %1204 = vmatpush.msrb.mxu1 %v1065_v28  ;;  %v1074_v33 = vld [vmem:[%s5038_s2 + $0x120] sm:$0xff] }
 0x22b   :  { %481 = vst [vmem:[#allocation2 + $0x20] sm:$0xff] %v461_v8  ;;  %v433_v21 = vmax.f32 %v424_v37, %v2931_v43  ;;  %v3089_v38 = vmul.f32 %v3065_v42, %v461_v8  ;;  %v407_v43 = vmax.f32 %v398_v12, %v2948_v2  ;;  %v1061_v8 = vld [vmem:[%s5038_s2 + $0xb8] sm:$0xff]  ;;  %1387 = vmatpush.msrb.mxu2 %v1122_v5  ;;  %v3159_v12 = vld [vmem:[%s5038_s2 + $0x6b0] sm:$0xff] }
 0x22c   :  { %1248 = vmatpush.msra.mxu3 %v1081_v15  ;;  %v1077_v37 = vld [vmem:[%s5038_s2 + $0x138] sm:$0xff]  ;;  %v3186_v15 = vld [vmem:[%s5038_s2 + $0x700] sm:$0xff] }
 0x22d   :  { %v442_v56 = vmax.f32 %v433_v21, %v360_v24  ;;  %v1064_v24 = vld [vmem:[%s5038_s2 + $0xd0] sm:$0xff]  ;;  %v3164_v21 = vld [vmem:[%s5038_s2 + $0x6d8] sm:$0xff]  ;;  %1388 = vmatpush.msrb.mxu2 %v1121_v19 }
 0x22e   :  { %v282_v31 = vpop.f32.mrf.mxu0  ;;  %1205 = vmatpush.msrb.mxu1 %v1064_v24  ;;  %1249 = vmatpush.msra.mxu3 %v1080_v40  ;;  %v1075_v24 = vld [vmem:[%s5038_s2 + $0x128] sm:$0xff] }
 0x22f   :  { %v453_v53 = vadd.f32 %v3027_v44, %v442_v56  ;;  %v416_v2 = vmax.f32 %v407_v43, %v282_v31  ;;  %v1076_v43 = vld [vmem:[%s5038_s2 + $0x130] sm:$0xff]  ;;  %v1119_v40 = vld [vmem:[%s5038_s2 + $0x288] sm:$0xff] }
 0x230   :  { %1206 = vmatpush.msrb.mxu1 %v1063_v46  ;;  %1250 = vmatpush.msra.mxu3 %v1079_v1  ;;  %v1120_v56 = vld [vmem:[%s5038_s2 + $0x290] sm:$0xff]  ;;  %v1058_v1 = vld [vmem:[%s5038_s2 + $0xa0] sm:$0xff] }
 0x231   :  { %v462_v47 = vmax.f32 %v453_v53, 0.0  ;;  %v425_v55 = vmax.f32 %v416_v2, %v309_v9  ;;  %v1059_v2 = vld [vmem:[%s5038_s2 + $0xa8] sm:$0xff]  ;;  %1389 = vmatpush.msrb.mxu2 %v1120_v56  ;;  %v1072_v56 = vld [vmem:[%s5038_s2 + $0x110] sm:$0xff] }
 0x232   :  { %v496_v3 = vld [vmem:[#allocation2 + $0x21] sm:$0xf]  ;;  %1207 = vmatpush.msrb.mxu1 %v1062_v50  ;;  %1251 = vmatpush.msra.mxu3 %v1078_v6 }
 0x233   :  { %v551_v61 = vld [vmem:[#allocation2 + $0x22] sm:$0xf]  ;;  %482 = vst [vmem:[#allocation2 + $0x28] sm:$0xff] %v462_v47  ;;  %v434_v32 = vmax.f32 %v425_v55, %v2936_v51  ;;  %v501_v52 = vmul.f32 %v496_v3, %v3114_v18  ;;  %v3145_v51 = vld [vmem:[%s5038_s2 + $0x720] sm:$0xf]  ;;  %1390 = vmatpush.msrb.mxu2 %v1119_v40 }
 0x234   :  { %v556_v9 = vmul.f32 %v551_v61, %v3119_v14  ;;  %1208 = vmatpush.msrb.mxu1 %v1061_v8  ;;  %1252 = vmatpush.msra.mxu3 %v1077_v37  ;;  %v605_v49 = vld [vmem:[#allocation2 + $0x23] sm:$0xf]  ;;  %v315_v61 = vpop.f32.mrf.mxu1 }
 0x235   :  { %v443_v60 = vmax.f32 %v434_v32, %v363_v7  ;;  %506 = vst [vmem:[#allocation3 + $0xa8] sm:$0xf] %v501_v52  ;;  %v1060_v7 = vld [vmem:[%s5038_s2 + $0xb0] sm:$0xff]  ;;  %v610_v28 = vmul.f32 %v605_v49, %v3145_v51  ;;  %v3222_v6 = vld [vmem:[%s5038_s2 + $0x748] sm:$0xf]  ;;  %v1057_v52 = vld [vmem:[%s5038_s2 + $0x98] sm:$0xff] }
 0x236   :  { %v285_v36 = vpop.f32.mrf.mxu0  ;;  %561 = vst [vmem:[#allocation3 + $0x1c0] sm:$0xf] %v556_v9  ;;  %1209 = vmatpush.msrb.mxu1 %v1060_v7  ;;  %1253 = vmatpush.msra.mxu3 %v1076_v43  ;;  %v1073_v9 = vld [vmem:[%s5038_s2 + $0x118] sm:$0xff]  ;;  %v3244_v49 = vld [vmem:[%s5038_s2 + $0x790] sm:$0xff] }
 0x237   :  { %v454_v45 = vadd.f32 %v3027_v44, %v443_v60  ;;  %v417_v23 = vmax.f32 %v2955_v16, %v285_v36  ;;  %v3181_v16 = vld [vmem:[%s5038_s2 + $0x770] sm:$0xf]  ;;  %615 = vst [vmem:[#allocation3 + $0x88] sm:$0xf] %v610_v28 }
 0x238   :  { %1210 = vmatpush.msrb.mxu1 %v1059_v2  ;;  %1254 = vmatpush.msra.mxu3 %v1075_v24  ;;  %5055 = vst [vmem:[#allocation10_spill] sm:$0xff] %v3244_v49  ;;  %v1056_v43 = vld [vmem:[%s5038_s2 + $0x90] sm:$0xff]  ;;  %v3270_v2 = vld [vmem:[%s5038_s2 + $0x6e0] sm:$0xff]  ;;  %v3277_v24 = vld [vmem:[%s5038_s2 + $0x728] sm:$0xff] }
 0x239   :  { %v463_v31 = vmax.f32 %v454_v45, 0.0  ;;  %v426_v53 = vmax.f32 %v417_v23, %v312_v0 }
 0x23a   :  { %v507_v58 = vld [vmem:[#allocation2 + $0x25] sm:$0xff]  ;;  %1211 = vmatpush.msrb.mxu1 %v1058_v1  ;;  %1255 = vmatpush.msra.mxu3 %v1074_v33 }
 0x23b   :  { %v562_v47 = vld [vmem:[#allocation2 + $0x26] sm:$0xff]  ;;  %483 = vst [vmem:[#allocation2 + $0x30] sm:$0xff] %v463_v31  ;;  %v435_v46 = vmax.f32 %v426_v53, %v2941_v59  ;;  %v3210_v0 = vmul.f32 %v507_v58, %v3159_v12  ;;  %v3260_v31 = vld [vmem:[%s5038_s2 + $0x7b8] sm:$0xff]  ;;  %v369_v53 = vpop.f32.mrf.mxu2 }
 0x23c   :  { %v713_v55 = vld [vmem:[#allocation2 + $0x28] sm:$0xf]  ;;  %v3213_v3 = vmul.f32 %v562_v47, %v3164_v21  ;;  %v879_v32 = vmul.f32 %v3191_v57, %v562_v47  ;;  %1212 = vmatpush.msrb.mxu1 %v1057_v52  ;;  %1256 = vmatpush.msra.mxu3 %v1073_v9  ;;  %5056 = vst [vmem:[#allocation11_spill] sm:$0xff] %v3260_v31  ;;  %v1071_v1 = vld [vmem:[%s5038_s2 + $0x108] sm:$0xff] }
 0x23d   :  { %v718_v59 = vmul.f32 %v713_v55, %v3181_v16  ;;  %v3217_v50 = vld [vmem:[#allocation2 + $0x27] sm:$0xff]  ;;  %v444_v5 = vmax.f32 %v435_v46, %v366_v54  ;;  %v523_v60 = vrot.slane %v3210_v0, 4  ;;  %v825_v9 = vmul.f32 %v3260_v31, %v507_v58  ;;  %v3353_v0 = vld [vmem:[%s5038_s2 + $0x6c0] sm:$0xff] }
 0x23e   :  { %5054 = vst [vmem:[#allocation9_spill] sm:$0xff] %v3217_v50  ;;  %v577_v8 = vrot.slane %v3213_v3, 4  ;;  %v3234_v37 = vmul.f32 %v3217_v50, %v3186_v15  ;;  %v659_v19 = vld [vmem:[#allocation2 + $0x27] sm:$0xf]  ;;  %v288_v36 = vpop.f32.mrf.mxu0  ;;  %1213 = vmatpush.msrb.mxu1 %v1056_v43  ;;  %1257 = vmatpush.msra.mxu3 %v1072_v56 }
 0x23f   :  { %v3239_v54 = vld [vmem:[%s5038_s2 + $0x750] sm:$0xff]  ;;  %723 = vst [vmem:[#allocation3] sm:$0xf] %v718_v59  ;;  %v455_v23 = vadd.f32 %v3027_v44, %v444_v5  ;;  %v418_v7 = vmax.f32 %v2962_v39, %v288_v36  ;;  %v3265_v39 = vld [vmem:[%s5038_s2 + $0x6b8] sm:$0xff]  ;;  %v664_v40 = vmul.f32 %v659_v19, %v3222_v6  ;;  %v1055_v46 = vld [vmem:[%s5038_s2 + $0x88] sm:$0xff] }
 0x240   :  { %v766_v45 = vld [vmem:[#allocation2 + $0x21] sm:$0xff]  ;;  %537 = vst [vmem:[#allocation3 + $0xa8] sm:$0xf0] %v523_v60  ;;  %v631_v28 = vrot.slane %v3234_v37, 4  ;;  %1214 = vmatpush.msrb.mxu1 %v1055_v46  ;;  %1258 = vmatpush.msra.mxu3 %v1071_v1 }
 0x241   :  { %591 = vst [vmem:[#allocation3 + $0x1c0] sm:$0xf0] %v577_v8  ;;  %v464_v47 = vmax.f32 %v455_v23, 0.0  ;;  %v427_v55 = vmax.f32 %v418_v7, %v315_v61  ;;  %v3289_v33 = vld [vmem:[%s5038_s2 + $0x708] sm:$0xff]  ;;  %v771_v59 = vmul.f32 %v766_v45, %v3244_v49 }
 0x242   :  { %884 = vst [vmem:[#allocation3 + $0xf8] sm:$0xff] %v879_v32  ;;  %v508_v5 = vld [vmem:[#allocation2 + $0x2d] sm:$0xff]  ;;  %v3358_v3 = vld [vmem:[%s5038_s2 + $0x6e8] sm:$0xff] }
 0x243   :  { %v563_v61 = vld [vmem:[#allocation2 + $0x2e] sm:$0xff]  ;;  %645 = vst [vmem:[#allocation3 + $0x88] sm:$0xf0] %v631_v28  ;;  %v436_v19 = vmax.f32 %v427_v55, %v2950_v4  ;;  %v3297_v36 = vmul.f32 %v508_v5, %v3265_v39  ;;  %v3314_v4 = vld [vmem:[%s5038_s2 + $0x7e8] sm:$0xf] }
 0x244   :  { %v724_v52 = vld [vmem:[#allocation2 + $0x2c] sm:$0xff]  ;;  %484 = vst [vmem:[#allocation2 + $0x38] sm:$0xff] %v464_v47  ;;  %v3300_v32 = vmul.f32 %v563_v61, %v3270_v2 }
 0x245   :  { %v3303_v45 = vmul.f32 %v724_v52, %v3239_v54  ;;  %v617_v23 = vld [vmem:[#allocation2 + $0x2f] sm:$0xff]  ;;  %669 = vst [vmem:[#allocation3 + $0x1a8] sm:$0xf] %v664_v40  ;;  %v445_v47 = vmax.f32 %v436_v19, %v369_v53  ;;  %v524_v55 = vrot.slane %v3297_v36, 4  ;;  %v318_v52 = vpop.f32.mrf.mxu1 }
 0x246   :  { %v670_v7 = vld [vmem:[#allocation2 + $0x2b] sm:$0xff]  ;;  %v3306_v43 = vmul.f32 %v617_v23, %v3289_v33  ;;  %v5041_v46 = vrot.slane %v3300_v32, 4  ;;  %776 = vst [vmem:[#allocation3 + $0x98] sm:$0xff] %v771_v59  ;;  %v291_v61 = vpop.f32.mrf.mxu0 }
 0x247   :  { %v3309_v58 = vmul.f32 %v670_v7, %v3277_v24  ;;  %v875_v56 = vld [vmem:[#allocation2 + $0x2e] sm:$0xf]  ;;  %v739_v1 = vrot.slane %v3303_v45, 4  ;;  %830 = vst [vmem:[#allocation3 + $0x210] sm:$0xff] %v825_v9  ;;  %v456_v53 = vadd.f32 %v3027_v44, %v445_v47  ;;  %v419_v19 = vmax.f32 %v2971_v63, %v291_v61  ;;  %v767_v45 = vld [vmem:[#allocation2 + $0x29] sm:$0xf] }
 0x248   :  { %v3322_v40 = vld [vmem:[%s5038_s2 + $0x778] sm:$0xff]  ;;  %v5047_v23 = vrot.slane %v3306_v43, 4  ;;  %v3331_v36 = vsel %vm522_vm0, %v523_v60, %v524_v55  ;;  %v3338_v59 = vsel %vm522_vm0, %v577_v8, %v5041_v46  ;;  %v880_v60 = vmul.f32 %v875_v56, %v3314_v4  ;;  %v3377_v46 = vld [vmem:[%s5038_s2 + $0x710] sm:$0xff]  ;;  %v372_v56 = vpop.f32.mrf.mxu2 }
 0x249   :  { %5057 = vst [vmem:[#allocation12_spill] sm:$0xff] %v3322_v40  ;;  %v778_v5 = vld [vmem:[#allocation2 + $0x2d] sm:$0xff]  ;;  %v5044_v7 = vrot.slane %v3309_v58, 4  ;;  %v465_v47 = vmax.f32 %v456_v53, 0.0  ;;  %v428_v61 = vmax.f32 %v419_v19, %v318_v52 }
 0x24a   :  { %753 = vst [vmem:[#allocation3] sm:$0xf0] %v739_v1  ;;  %v3343_v9 = vld [vmem:[%s5038_s2 + $0x798] sm:$0xf]  ;;  %v3362_v8 = vmul.f32 %v778_v5, %v3322_v40  ;;  %v3386_v52 = vsel %vm522_vm0, %v631_v28, %v5047_v23 }
 0x24b   :  { %5058 = vst [vmem:[#allocation13_spill] sm:$0xff] %v3331_v36  ;;  %v3348_v63 = vld [vmem:[%s5038_s2 + $0x758] sm:$0xff]  ;;  %v772_v19 = vmul.f32 %v767_v45, %v3343_v9 }
 0x24c   :  { %5059 = vst [vmem:[#allocation14_spill] sm:$0xff] %v3338_v59  ;;  %v725_v5 = vld [vmem:[#allocation2 + $0x34] sm:$0xff]  ;;  %v437_v59 = vmax.f32 %v428_v61, %v2957_v17 }
 0x24d   :  { %5060 = vst [vmem:[#allocation15_spill] sm:$0xff] %v3343_v9  ;;  %v509_v30 = vld [vmem:[#allocation2 + $0x35] sm:$0xff]  ;;  %v730_v36 = vmul.f32 %v725_v5, %v3348_v63 }
 0x24e   :  { %5061 = vst [vmem:[#allocation16_spill] sm:$0xff] %v3362_v8  ;;  %v564_v53 = vld [vmem:[#allocation2 + $0x36] sm:$0xff]  ;;  %v514_v31 = vmul.f32 %v509_v30, %v3353_v0 }
 0x24f   :  { %699 = vst [vmem:[#allocation3 + $0x1a8] sm:$0xf0] %v5044_v7  ;;  %v3394_v7 = vmul.f32 %v564_v53, %v3358_v3  ;;  %v3396_v49 = vld [vmem:[#allocation2 + $0x33] sm:$0xff]  ;;  %v740_v30 = vrot.slane %v730_v36, 4  ;;  %v294_v53 = vpop.f32.mrf.mxu0 }
 0x250   :  { %5062 = vst [vmem:[#allocation17_spill] sm:$0xff] %v3386_v52  ;;  %v618_v37 = vld [vmem:[#allocation2 + $0x37] sm:$0xff]  ;;  %v3400_v28 = vmul.f32 %v3396_v49, %v3372_v34  ;;  %v526_v61 = vrot.slane %v514_v31, 4  ;;  %v5066_v31 = vrot.slane %v3362_v8, 4 }
 0x251   :  { %485 = vst [vmem:[#allocation2 + $0x40] sm:$0xff] %v465_v47  ;;  %v886_v40 = vld [vmem:[#allocation2 + $0x32] sm:$0xff]  ;;  %v3403_v45 = vmul.f32 %v618_v37, %v3377_v46  ;;  %v446_v47 = vmax.f32 %v437_v59, %v372_v56  ;;  %v580_v5 = vrot.slane %v3394_v7, 4  ;;  %v5064_v37 = vmax.f32 %v2977_v22, %v2979_v48  ;;  %v821_v59 = vld [vmem:[#allocation2 + $0x2d] sm:$0xf]  ;;  %v3436_v48 = vld [vmem:[%s5038_s2 + $0x6c8] sm:$0xff] }
 0x252   :  { %5063 = vst [vmem:[#allocation18_spill] sm:$0xff] %v3396_v49  ;;  %v3406_v17 = vmul.f32 %v886_v40, %v3367_v11  ;;  %v5050_v23 = vrot.slane %v3400_v28, 4  ;;  %v3416_v40 = vsel %vm522_vm0, %v739_v1, %v740_v30  ;;  %v3419_v36 = vsel %vm522_vm0, %v524_v55, %v526_v61  ;;  %v3426_v7 = vld [vmem:[%s5038_s2 + $0x7c0] sm:$0xf]  ;;  %v3441_v55 = vld [vmem:[%s5038_s2 + $0x6f0] sm:$0xff] }
 0x253   :  { %885 = vst [vmem:[#allocation3 + $0x250] sm:$0xf] %v880_v60  ;;  %v457_v52 = vadd.f32 %v3027_v44, %v446_v47  ;;  %v420_v60 = vmax.f32 %v5064_v37, %v294_v53  ;;  %v3431_v22 = vld [vmem:[%s5038_s2 + $0x760] sm:$0xff]  ;;  %v5068_v1 = vrot.slane %v3300_v32, 4  ;;  %v3453_v37 = vld [vmem:[%s5038_s2 + $0x7d0] sm:$0xff] }
 0x254   :  { %777 = vst [vmem:[#allocation3 + $0x28] sm:$0xf] %v772_v19  ;;  %v901_v19 = vrot.slane %v3406_v17, 4  ;;  %v5072_v17 = vrot.slane %v3403_v45, 4 }
 0x255   :  { %5065 = vst [vmem:[#allocation19_spill] sm:$0xff] %v3419_v36  ;;  %v3446_v56 = vsel %vm522_vm0, %v5068_v1, %v580_v5  ;;  %v466_v47 = vmax.f32 %v457_v52, 0.0  ;;  %v429_v53 = vmax.f32 %v420_v60, %v2902_v13  ;;  %v5070_v52 = vrot.slane %v3309_v58, 4 }
 0x256   :  { %807 = vst [vmem:[#allocation3 + $0x28] sm:$0xf0] %v5066_v31  ;;  %v3458_v31 = vld [vmem:[%s5038_s2 + $0x738] sm:$0xff]  ;;  %v5073_v60 = vrot.slane %v3306_v43, 4  ;;  %v826_v36 = vmul.f32 %v821_v59, %v3426_v7  ;;  %v1102_v43 = vld [vmem:[%s5038_s2 + $0x200] sm:$0xff] }
 0x257   :  { %5067 = vst [vmem:[#allocation20_spill] sm:$0xff] %v3426_v7  ;;  %v3467_v13 = vsel %vm522_vm0, %v5070_v52, %v5050_v23  ;;  %v438_v49 = vmax.f32 %v429_v53, %v2966_v62  ;;  %1287 = vmatpush.msrb.mxu3 %v1102_v43 }
 0x258   :  { %5069 = vst [vmem:[#allocation21_spill] sm:$0xff] %v3446_v56  ;;  %v726_v50 = vld [vmem:[#allocation2 + $0x3c] sm:$0xff]  ;;  %v3474_v56 = vsel %vm522_vm0, %v5073_v60, %v5072_v17  ;;  %v297_v17 = vpop.f32.mrf.mxu0 }
 0x259   :  { %v3460_v32 = vld [vmem:[#allocation2 + $0x3d] sm:$0xff]  ;;  %5071 = vst [vmem:[#allocation22_spill] sm:$0xff] %v3467_v13  ;;  %v731_v8 = vmul.f32 %v726_v50, %v3431_v22  ;;  %v449_v50 = vadd.f32 %v3027_v44, %v438_v49 }
 0x25a   :  { %v565_v1 = vld [vmem:[#allocation2 + $0x3e] sm:$0xff]  ;;  %5074 = vst [vmem:[#allocation23_spill] sm:$0xff] %v3474_v56  ;;  %v515_v58 = vmul.f32 %v3460_v32, %v3436_v48 }
 0x25b   :  { %486 = vst [vmem:[#allocation2 + $0x48] sm:$0xff] %v466_v47  ;;  %v3482_v52 = vmul.f32 %v565_v1, %v3441_v55  ;;  %v887_v23 = vld [vmem:[#allocation2 + $0x3a] sm:$0xff]  ;;  %v742_v47 = vrot.slane %v731_v8, 4  ;;  %v458_v56 = vmax.f32 %v449_v50, 0.0 }
 0x25c   :  { %v3484_v13 = vld [vmem:[#allocation2 + $0x3b] sm:$0xff]  ;;  %v3490_v59 = vmul.f32 %v887_v23, %v3453_v37  ;;  %915 = vst [vmem:[#allocation3 + $0x250] sm:$0xf0] %v901_v19  ;;  %v528_v53 = vrot.slane %v515_v58, 4  ;;  %v5076_v23 = vmax.f32 %v2987_v35, %v2989_v26 }
 0x25d   :  { %5075 = vst [vmem:[#allocation24_spill] sm:$0xff] %v3484_v13  ;;  %v3494_v62 = vmul.f32 %v3484_v13, %v3458_v31  ;;  %v582_v1 = vrot.slane %v3482_v52, 4  ;;  %v3503_v9 = vsel %vm522_vm0, %v740_v30, %v742_v47  ;;  %v714_v58 = vmul.f32 %v3239_v54, %v458_v56  ;;  %v1100_v54 = vld [vmem:[%s5038_s2 + $0x1f0] sm:$0xff] }
 0x25e   :  { %v902_v60 = vrot.slane %v3490_v59, 4  ;;  %v421_v7 = vmax.f32 %v5076_v23, %v297_v17  ;;  %v3506_v13 = vsel %vm522_vm0, %v526_v61, %v528_v53  ;;  %831 = vst [vmem:[#allocation3 + $0xa0] sm:$0xf] %v826_v36 }
 0x25f   :  { %v688_v49 = vrot.slane %v3494_v62, 4  ;;  %478 = vst [vmem:[#allocation2 + $0x8] sm:$0xff] %v458_v56  ;;  %v3512_v52 = vsel %vm522_vm0, %v580_v5, %v582_v1  ;;  %1391 = vmatmul.f32.vlgmr.msrb.gmra.mxu2 %v714_v58 }
 0x260   :  { %v430_v8 = vmax.f32 %v421_v7, %v2913_v20  ;;  %v3517_v30 = vsel %vm522_vm0, %v901_v19, %v902_v60  ;;  %v1101_v20 = vld [vmem:[%s5038_s2 + $0x1f8] sm:$0xff] }
 0x261   :  { %1288 = vmatpush.msrb.mxu3 %v1101_v20 }
 0x262   :  { %v727_v43 = vld [vmem:[#allocation2 + $0x44] sm:$0xff]  ;;  %v439_v61 = vmax.f32 %v430_v8, %v2975_v27  ;;  %v728_v7 = vld [vmem:[#allocation2 + $0x4c] sm:$0xf]  ;;  %v5077_v27 = vrot.slane %v3400_v28, 4  ;;  %v300_v8 = vpop.f32.mrf.mxu0 }
 0x263   :  { %v511_v35 = vld [vmem:[#allocation2 + $0x45] sm:$0xf]  ;;  %v732_v36 = vmul.f32 %v727_v43, %v3065_v42  ;;  %v733_v19 = vmul.f32 %v728_v7, %v3181_v16  ;;  %1289 = vmatpush.msrb.mxu3 %v1100_v54 }
 0x264   :  { %v566_v26 = vld [vmem:[#allocation2 + $0x46] sm:$0xf]  ;;  %v516_v5 = vmul.f32 %v511_v35, %v3114_v18  ;;  %v3535_v42 = vsel %vm522_vm0, %v5077_v27, %v688_v49  ;;  %v450_v50 = vadd.f32 %v3027_v44, %v439_v61 }
 0x265   :  { %v571_v56 = vmul.f32 %v566_v26, %v3119_v14  ;;  %v744_v17 = vrot.slane %v732_v36, 4  ;;  %v5078_v14 = vmax.f32 %v2999_v10, %v3001_v41  ;;  %v746_v20 = vrot.slane %v733_v19, 4  ;;  %v3554_v41 = vld [vmem:[%s5038_s2 + $0x7d8] sm:$0xff]  ;;  %v619_v19 = vld [vmem:[#allocation2 + $0x3f] sm:$0xff] }
 0x266   :  { %v530_v23 = vrot.slane %v516_v5, 4  ;;  %v459_v58 = vmax.f32 %v450_v50, 0.0  ;;  %v492_v35 = vld [vmem:[#allocation2 + $0x1] sm:$0xff] }
 0x267   :  { %v584_v18 = vrot.slane %v571_v56, 4  ;;  %v422_v43 = vmax.f32 %v5078_v14, %v300_v8  ;;  %v3542_v16 = vsel %vm522_vm0, %v742_v47, %v744_v17  ;;  %v547_v26 = vld [vmem:[#allocation2 + $0x2] sm:$0xff]  ;;  %v497_v36 = vmul.f32 %v492_v35, %v3159_v12  ;;  %v1098_v12 = vld [vmem:[%s5038_s2 + $0x1e0] sm:$0xff]  ;;  %v3575_v56 = vld [vmem:[%s5038_s2 + $0x718] sm:$0xff] }
 0x268   :  { %v3545_v28 = vsel %vm522_vm0, %v528_v53, %v530_v23  ;;  %479 = vst [vmem:[#allocation2 + $0x10] sm:$0xff] %v459_v58  ;;  %v552_v54 = vmul.f32 %v547_v26, %v3164_v21  ;;  %v715_v5 = vmul.f32 %v3348_v63, %v459_v58  ;;  %v601_v10 = vld [vmem:[#allocation2 + $0x3] sm:$0xff]  ;;  %v3567_v7 = vsel %vm522_vm0, %v744_v17, %v746_v20 }
 0x269   :  { %v431_v61 = vmax.f32 %v422_v43, %v2918_v25  ;;  %v888_v47 = vld [vmem:[#allocation2 + $0x42] sm:$0xff]  ;;  %1215 = vmatmul.f32.vlgmr.msrb.gmra.mxu1 %v497_v36  ;;  %v3564_v21 = vsel %vm522_vm0, %v582_v1, %v584_v18  ;;  %v1182_v1 = vld [vmem:[%s5038_s2 + $0x480] sm:$0xff]  ;;  %v3588_v23 = vmul.f32 %v619_v19, %v3575_v56 }
 0x26a   :  { %1259 = vmatmul.f32.vlgmr.msra.gmra.mxu3 %v552_v54  ;;  %v1099_v25 = vld [vmem:[%s5038_s2 + $0x1e8] sm:$0xff]  ;;  %1394 = vmatmul.f32.gmra.mxu2 %v715_v5  ;;  %v3585_v17 = vmul.f32 %v888_v47, %v3554_v41  ;;  %v1180_v20 = vld [vmem:[%s5038_s2 + $0x470] sm:$0xff] }
 0x26b   :  { %v440_v53 = vmax.f32 %v431_v61, %v2991_v29  ;;  %v655_v63 = vld [vmem:[#allocation2 + $0x7] sm:$0xff]  ;;  %1290 = vmatpush.msrb.mxu3 %v1099_v25  ;;  %v3570_v29 = vmul.f32 %v601_v10, %v3186_v15  ;;  %1507 = vmatpush.msra.mxu2 %v1182_v1 }
 0x26c   :  { %v3582_v50 = vmul.f32 %v655_v63, %v3277_v24  ;;  %v904_v36 = vrot.slane %v3585_v17, 4  ;;  %v1179_v5 = vld [vmem:[%s5038_s2 + $0x468] sm:$0xff]  ;;  %v1116_v47 = vld [vmem:[%s5038_s2 + $0x270] sm:$0xff]  ;;  %v1173_v17 = vld [vmem:[%s5038_s2 + $0x438] sm:$0xff] }
 0x26d   :  { %v451_v27 = vadd.f32 %v3027_v44, %v440_v53  ;;  %1291 = vmatpush.msrb.mxu3 %v1098_v12  ;;  %v1181_v44 = vld [vmem:[%s5038_s2 + $0x478] sm:$0xff]  ;;  %v653_v53 = vld [vmem:[%s5038_s2 + $0x740] sm:$0xff]  ;;  %v3634_v25 = vld [vmem:[#allocation2 + $0x43] sm:$0xff] }
 0x26e   :  { %1508 = vmatpush.msra.mxu2 %v1181_v44  ;;  %v1115_v12 = vld [vmem:[%s5038_s2 + $0x268] sm:$0xff]  ;;  %v889_v63 = vld [vmem:[#allocation2 + $0x4a] sm:$0xff] }
 0x26f   :  { %v460_v15 = vmax.f32 %v451_v27, 0.0  ;;  %v493_v8 = vld [vmem:[#allocation2 + $0x9] sm:$0xff]  ;;  %v5079_v27 = vrot.slane %v3403_v45, 4 }
 0x270   :  { %v548_v18 = vld [vmem:[#allocation2 + $0xa] sm:$0xff]  ;;  %v498_v58 = vmul.f32 %v493_v8, %v3265_v39  ;;  %v1118_v39 = vld [vmem:[%s5038_s2 + $0x280] sm:$0xff]  ;;  %1509 = vmatpush.msra.mxu2 %v1180_v20 }
 0x271   :  { %480 = vst [vmem:[#allocation2 + $0x18] sm:$0xff] %v460_v15  ;;  %v553_v24 = vmul.f32 %v548_v18, %v3270_v2  ;;  %v716_v14 = vmul.f32 %v3431_v22, %v460_v15  ;;  %v871_v43 = vld [vmem:[#allocation2 + $0xe] sm:$0xff]  ;;  %1331 = vmatpush.msra.mxu1 %v1118_v39  ;;  %v620_v19 = vld [vmem:[#allocation2 + $0x47] sm:$0xf]  ;;  %v3678_v39 = vmul.f32 %v889_v63, %v3191_v57 }
 0x272   :  { %v602_v35 = vld [vmem:[#allocation2 + $0xb] sm:$0xff]  ;;  %v3602_v61 = vmul.f32 %v871_v43, %v3367_v11  ;;  %1218 = vmatmul.f32.gmra.mxu1 %v498_v58  ;;  %v636_v11 = vrot.slane %v3588_v23, 4  ;;  %1510 = vmatpush.msra.mxu2 %v1179_v5  ;;  %v1095_v5 = vld [vmem:[%s5038_s2 + $0x1c8] sm:$0xff]  ;;  %v625_v57 = vmul.f32 %v620_v19, %v3145_v51 }
 0x273   :  { %v3596_v26 = vld [vmem:[#allocation2 + $0xf] sm:$0xff]  ;;  %1262 = vmatmul.f32.gmra.mxu3 %v553_v24  ;;  %v3615_v54 = vmul.f32 %v602_v35, %v3289_v33  ;;  %1397 = vmatmul.f32.gmra.mxu2 %v716_v14  ;;  %v1178_v33 = vld [vmem:[%s5038_s2 + $0x460] sm:$0xff]  ;;  %v674_v14 = vld [vmem:[#allocation2 + $0x4b] sm:$0xf] }
 0x274   :  { %v1117_v2 = vld [vmem:[%s5038_s2 + $0x278] sm:$0xff]  ;;  %v3623_v10 = vmul.f32 %v3596_v26, %v3372_v34  ;;  %v3641_v34 = vsel %vm522_vm0, %v902_v60, %v904_v36  ;;  %v3651_v1 = vsel %vm522_vm0, %v5079_v27, %v636_v11  ;;  %1511 = vmatpush.msra.mxu2 %v1178_v33  ;;  %v679_v63 = vmul.f32 %v674_v14, %v3222_v6  ;;  %v1112_v27 = vld [vmem:[%s5038_s2 + $0x250] sm:$0xff]  ;;  %v1174_v14 = vld [vmem:[%s5038_s2 + $0x440] sm:$0xff] }
 0x275   :  { %v1097_v22 = vld [vmem:[%s5038_s2 + $0x1d8] sm:$0xff]  ;;  %1332 = vmatpush.msra.mxu1 %v1117_v2  ;;  %v1092_v23 = vld [vmem:[%s5038_s2 + $0x1b0] sm:$0xff] }
 0x276   :  { %1292 = vmatpush.msrb.mxu3 %v1097_v22  ;;  %v1177_v43 = vld [vmem:[%s5038_s2 + $0x458] sm:$0xff] }
 0x277   :  { %1333 = vmatpush.msra.mxu1 %v1116_v47  ;;  %v890_v2 = vld [vmem:[#allocation2 + $0x52] sm:$0xf]  ;;  %1512 = vmatpush.msra.mxu2 %v1177_v43 }
 0x278   :  { %v494_v15 = vld [vmem:[#allocation2 + $0x11] sm:$0xff]  ;;  %v3653_v59 = vld [vmem:[#allocation2 + $0x19] sm:$0xff] }
 0x279   :  { %v549_v8 = vld [vmem:[#allocation2 + $0x12] sm:$0xff]  ;;  %v499_v60 = vmul.f32 %v494_v15, %v3353_v0  ;;  %v500_v44 = vmul.f32 %v3653_v59, %v3436_v48  ;;  %v550_v58 = vld [vmem:[#allocation2 + $0x1a] sm:$0xff]  ;;  %1334 = vmatpush.msra.mxu1 %v1115_v12  ;;  %v3666_v0 = vmul.f32 %v3634_v25, %v653_v53  ;;  %v895_v15 = vmul.f32 %v890_v2, %v3314_v4 }
 0x27a   :  { %v554_v18 = vmul.f32 %v549_v8, %v3358_v3  ;;  %v872_v24 = vld [vmem:[#allocation2 + $0x16] sm:$0xff]  ;;  %v555_v45 = vmul.f32 %v550_v58, %v3441_v55  ;;  %v1096_v3 = vld [vmem:[%s5038_s2 + $0x1d0] sm:$0xff]  ;;  %v873_v33 = vld [vmem:[#allocation2 + $0x1e] sm:$0xff]  ;;  %v906_v8 = vrot.slane %v3678_v39, 4 }
 0x27b   :  { %v603_v35 = vld [vmem:[#allocation2 + $0x13] sm:$0xff]  ;;  %1221 = vmatmul.f32.gmra.mxu1 %v499_v60  ;;  %v3675_v55 = vmul.f32 %v872_v24, %v3453_v37  ;;  %1400 = vmatmul.f32.gmra.mxu2 %v3089_v38  ;;  %v1176_v37 = vld [vmem:[%s5038_s2 + $0x450] sm:$0xff]  ;;  %v604_v12 = vld [vmem:[#allocation2 + $0x1b] sm:$0xff]  ;;  %v3706_v51 = vmul.f32 %v873_v33, %v3554_v41  ;;  %v692_v24 = vrot.slane %v679_v63, 4 }
 0x27c   :  { %v3663_v20 = vld [vmem:[#allocation2 + $0x17] sm:$0xff]  ;;  %1265 = vmatmul.f32.gmra.mxu3 %v554_v18  ;;  %v3691_v47 = vmul.f32 %v603_v35, %v3377_v46  ;;  %v1175_v46 = vld [vmem:[%s5038_s2 + $0x448] sm:$0xff]  ;;  %1513 = vmatpush.msra.mxu2 %v1176_v37  ;;  %v3713_v6 = vmul.f32 %v604_v12, %v3575_v56  ;;  %v638_v18 = vrot.slane %v625_v57, 4  ;;  %v3745_v62 = vsel %vm522_vm0, %v904_v36, %v906_v8 }
 0x27d   :  { %v1114_v48 = vld [vmem:[%s5038_s2 + $0x260] sm:$0xff]  ;;  %1293 = vmatpush.msrb.mxu3 %v1096_v3  ;;  %v1113_v22 = vld [vmem:[%s5038_s2 + $0x258] sm:$0xff]  ;;  %v3696_v38 = vmul.f32 %v3663_v20, %v3458_v31  ;;  %v690_v31 = vrot.slane %v3666_v0, 4  ;;  %v1111_v41 = vld [vmem:[%s5038_s2 + $0x248] sm:$0xff] }
 0x27e   :  { %1335 = vmatpush.msra.mxu1 %v1114_v48  ;;  %v3708_v19 = vld [vmem:[#allocation2 + $0x1f] sm:$0xff]  ;;  %1514 = vmatpush.msra.mxu2 %v1175_v46  ;;  %v779_v56 = vld [vmem:[#allocation2 + $0x35] sm:$0xff]  ;;  %v3762_v36 = vsel %vm522_vm0, %v636_v11, %v638_v18  ;;  %v1172_v11 = vld [vmem:[%s5038_s2 + $0x430] sm:$0xff] }
 0x27f   :  { %1294 = vmatpush.msrb.mxu3 %v1095_v5  ;;  %v3717_v60 = vmul.f32 %v3708_v19, %v653_v53  ;;  %v1014_v58 = vld [vmem:[#allocation3] sm:$0xff]  ;;  %v908_v53 = vrot.slane %v895_v15, 4  ;;  %v3731_v43 = vsel %vm522_vm0, %v688_v49, %v690_v31  ;;  %v813_v35 = vld [vmem:[%s5038_s2 + $0x7a8] sm:$0xff]  ;;  %v763_v49 = vld [vmem:[#allocation2 + $0x9] sm:$0xff]  ;;  %v3771_v57 = vsel %vm522_vm0, %v690_v31, %v692_v24 }
 0x280   :  { %1336 = vmatpush.msra.mxu1 %v1113_v22  ;;  %v759_v4 = vld [vmem:[%s5038_s2 + $0x780] sm:$0xff]  ;;  %v1093_v2 = vld [vmem:[%s5038_s2 + $0x1b8] sm:$0xff]  ;;  %v814_v5 = vld [vmem:[%s5038_s2 + $0x7b0] sm:$0xff]  ;;  %1515 = vmatpush.msra.mxu2 %v1174_v14 }
 0x281   :  { %v833_v0 = vld [vmem:[#allocation2 + $0x39] sm:$0xff]  ;;  %v817_v22 = vld [vmem:[#allocation2 + $0xd] sm:$0xff]  ;;  %v834_v12 = vld [vmem:[#allocation2 + $0x41] sm:$0xff]  ;;  %v3780_v63 = vsel %vm522_vm0, %v906_v8, %v908_v53  ;;  %v784_v15 = vmul.f32 %v779_v56, %v759_v4 }
 0x282   :  { %1337 = vmatpush.msra.mxu1 %v1112_v27  ;;  %v1094_v3 = vld [vmem:[%s5038_s2 + $0x1c0] sm:$0xff]  ;;  %v1109_v37 = vld [vmem:[%s5038_s2 + $0x238] sm:$0xff]  ;;  %1516 = vmatpush.msra.mxu2 %v1173_v17  ;;  %v1108_v18 = vld [vmem:[%s5038_s2 + $0x230] sm:$0xff] }
 0x283   :  { %1224 = vmatmul.f32.gmra.mxu1 %v500_v44  ;;  %v1110_v48 = vld [vmem:[%s5038_s2 + $0x240] sm:$0xff]  ;;  %v760_v44 = vld [vmem:[%s5038_s2 + $0x788] sm:$0xff]  ;;  %1403 = vmatmul.f32.gmra.mxu2 %v1014_v58  ;;  %v5080_v27 = vld [vmem:[#allocation12_spill] sm:$0xff] }
 0x284   :  { %1268 = vmatmul.f32.gmra.mxu3 %v555_v45  ;;  %v812_v39 = vld [vmem:[%s5038_s2 + $0x7a0] sm:$0xff]  ;;  %1338 = vmatpush.msra.mxu1 %v1111_v41  ;;  %v3783_v46 = vmul.f32 %v763_v49, %v5080_v27  ;;  %v838_v41 = vmul.f32 %v833_v0, %v813_v35  ;;  %v781_v24 = vld [vmem:[#allocation2 + $0x45] sm:$0xff]  ;;  %v785_v8 = vmul.f32 %v760_v44, %v3460_v32 }
 0x285   :  { %v832_v45 = vld [vmem:[#allocation2 + $0x31] sm:$0xff]  ;;  %1295 = vmatpush.msrb.mxu3 %v1094_v3  ;;  %v3788_v58 = vmul.f32 %v817_v22, %v812_v39  ;;  %v1010_v14 = vld [vmem:[#allocation3 + $0xa8] sm:$0xff]  ;;  %1517 = vmatpush.msra.mxu2 %v1172_v11  ;;  %v839_v0 = vmul.f32 %v834_v12, %v814_v5  ;;  %v782_v22 = vld [vmem:[#allocation2 + $0x4d] sm:$0xf] }
 0x286   :  { %v764_v33 = vld [vmem:[#allocation2 + $0x11] sm:$0xff]  ;;  %1339 = vmatpush.msra.mxu1 %v1110_v48  ;;  %v819_v53 = vld [vmem:[#allocation2 + $0x1d] sm:$0xff]  ;;  %v835_v48 = vld [vmem:[#allocation2 + $0x49] sm:$0xff]  ;;  %v837_v56 = vmul.f32 %v832_v45, %v812_v39  ;;  %v794_v39 = vrot.slane %v784_v15, 4  ;;  %v3805_v45 = vmul.f32 %v760_v44, %v3653_v59  ;;  %v848_v12 = vrot.slane %v838_v41, 4 }
 0x287   :  { %v818_v31 = vld [vmem:[#allocation2 + $0x15] sm:$0xff]  ;;  %1296 = vmatpush.msrb.mxu3 %v1093_v2  ;;  %v3790_v3 = vmul.f32 %v764_v33, %v759_v4  ;;  %v1091_v2 = vld [vmem:[%s5038_s2 + $0x1a8] sm:$0xff]  ;;  %v3811_v11 = vmul.f32 %v819_v53, %v814_v5  ;;  %v796_v15 = vrot.slane %v785_v8, 4  ;;  %v5084_v41 = vld [vmem:[#allocation20_spill] sm:$0xff] }
 0x288   :  { %1340 = vmatpush.msra.mxu1 %v1109_v37  ;;  %v1011_v49 = vld [vmem:[#allocation3 + $0x1c0] sm:$0xff]  ;;  %v3796_v17 = vmul.f32 %v818_v31, %v813_v35  ;;  %v1107_v4 = vld [vmem:[%s5038_s2 + $0x228] sm:$0xff]  ;;  %v1089_v5 = vld [vmem:[%s5038_s2 + $0x198] sm:$0xff] }
 0x289   :  { %1297 = vmatpush.msrb.mxu3 %v1092_v23  ;;  %v1171_v32 = vld [vmem:[%s5038_s2 + $0x428] sm:$0xff]  ;;  %v836_v23 = vld [vmem:[#allocation2 + $0x51] sm:$0xf]  ;;  %v1090_v35 = vld [vmem:[%s5038_s2 + $0x1a0] sm:$0xff] }
 0x28a   :  { %1341 = vmatpush.msra.mxu1 %v1108_v18  ;;  %v5081_v37 = vld [vmem:[#allocation10_spill] sm:$0xff]  ;;  %v5082_v27 = vld [vmem:[#allocation11_spill] sm:$0xff]  ;;  %1518 = vmatpush.msra.mxu2 %v1171_v32  ;;  %v841_v53 = vmul.f32 %v836_v23, %v5084_v41  ;;  %v1169_v8 = vld [vmem:[%s5038_s2 + $0x418] sm:$0xff] }
 0x28b   :  { %v786_v33 = vmul.f32 %v781_v24, %v5081_v37  ;;  %1227 = vmatmul.f32.gmra.mxu1 %v1010_v14  ;;  %v840_v31 = vmul.f32 %v835_v48, %v5082_v27  ;;  %1406 = vmatmul.f32.gmra.mxu2 %v3416_v40  ;;  %v1106_v59 = vld [vmem:[%s5038_s2 + $0x220] sm:$0xff]  ;;  %v5083_v18 = vld [vmem:[#allocation15_spill] sm:$0xff]  ;;  %v847_v14 = vrot.slane %v837_v56, 4  ;;  %v850_v40 = vrot.slane %v839_v0, 4  ;;  %v1105_v48 = vld [vmem:[%s5038_s2 + $0x218] sm:$0xff] }
 0x28c   :  { %1271 = vmatmul.f32.gmra.mxu3 %v1011_v49  ;;  %v1170_v44 = vld [vmem:[%s5038_s2 + $0x420] sm:$0xff]  ;;  %v787_v24 = vmul.f32 %v782_v22, %v5083_v18  ;;  %1342 = vmatpush.msra.mxu1 %v1107_v4  ;;  %v5085_v56 = vld [vmem:[#allocation16_spill] sm:$0xff]  ;;  %v1167_v41 = vld [vmem:[%s5038_s2 + $0x408] sm:$0xff] }
 0x28d   :  { %1298 = vmatpush.msrb.mxu3 %v1091_v2  ;;  %v798_v49 = vrot.slane %v786_v33, 4  ;;  %v5086_v2 = vrot.slane %v5085_v56, 4  ;;  %1519 = vmatpush.msra.mxu2 %v1170_v44  ;;  %v1088_v0 = vld [vmem:[%s5038_s2 + $0x190] sm:$0xff]  ;;  %v852_v4 = vrot.slane %v840_v31, 4  ;;  %v3841_v32 = vsel %vm522_vm0, %v847_v14, %v848_v12  ;;  %861 = vst [vmem:[#allocation3 + $0xa0] sm:$0xf0] %v847_v14 }
 0x28e   :  { %1343 = vmatpush.msra.mxu1 %v1106_v59  ;;  %v800_v37 = vrot.slane %v787_v24, 4  ;;  %v3844_v33 = vsel %vm522_vm0, %v794_v39, %v796_v15  ;;  %v1104_v23 = vld [vmem:[%s5038_s2 + $0x210] sm:$0xff]  ;;  %v3850_v27 = vsel %vm522_vm0, %v848_v12, %v850_v40  ;;  %v921_v31 = vld [vmem:[%s5038_s2 + $0x7f8] sm:$0xff]  ;;  %v1087_v59 = vld [vmem:[%s5038_s2 + $0x188] sm:$0xff] }
 0x28f   :  { %1299 = vmatpush.msrb.mxu3 %v1090_v35  ;;  %v3835_v22 = vsel %vm522_vm0, %v5086_v2, %v794_v39  ;;  %1520 = vmatpush.msra.mxu2 %v1169_v8  ;;  %v854_v35 = vrot.slane %v841_v53, 4  ;;  %v1168_v39 = vld [vmem:[%s5038_s2 + $0x410] sm:$0xff]  ;;  %v3862_v44 = vsel %vm522_vm0, %v796_v15, %v798_v49  ;;  %v5087_v18 = vld [vmem:[#allocation13_spill] sm:$0xff]  ;;  %v5088_v12 = vld [vmem:[#allocation14_spill] sm:$0xff]  ;;  %v3870_v14 = vsel %vm522_vm0, %v850_v40, %v852_v4 }
 0x290   :  { %1344 = vmatpush.msra.mxu1 %v1105_v48  ;;  %v1103_v24 = vld [vmem:[%s5038_s2 + $0x208] sm:$0xff]  ;;  %v922_v15 = vld [vmem:[%s5038_s2 + $0x800] sm:$0xff]  ;;  %v3883_v53 = vsel %vm522_vm0, %v798_v49, %v800_v37  ;;  %v5089_v40 = vld [vmem:[#allocation24_spill] sm:$0xff]  ;;  %v3896_v2 = vmul.f32 %v921_v31, %v3663_v20 }
 0x291   :  { %1300 = vmatpush.msrb.mxu3 %v1089_v5  ;;  %v920_v5 = vld [vmem:[%s5038_s2 + $0x7f0] sm:$0xff]  ;;  %v946_v48 = vmul.f32 %v921_v31, %v5089_v40  ;;  %1521 = vmatpush.msra.mxu2 %v1168_v39  ;;  %v3887_v8 = vsel %vm522_vm0, %v852_v4, %v854_v35  ;;  %v947_v49 = vmul.f32 %v922_v15, %v3634_v25  ;;  %v5092_v4 = vld [vmem:[#allocation18_spill] sm:$0xff]  ;;  %v5093_v39 = vld [vmem:[#allocation9_spill] sm:$0xff] }
 0x292   :  { %1345 = vmatpush.msra.mxu1 %v1104_v23  ;;  %v3890_v56 = vmul.f32 %v920_v5, %v3596_v26  ;;  %5091 = vst [vmem:[#allocation10_spill] sm:$0xff] %v3896_v2  ;;  %v929_v37 = vld [vmem:[#allocation2 + $0x2f] sm:$0xf]  ;;  %v945_v23 = vmul.f32 %v920_v5, %v5092_v4  ;;  %v3904_v26 = vmul.f32 %v922_v15, %v3708_v19  ;;  %v944_v31 = vld [vmem:[#allocation2 + $0x53] sm:$0xf]  ;;  %v5094_v2 = vld [vmem:[#allocation19_spill] sm:$0xff] }
 0x293   :  { %1301 = vmatpush.msrb.mxu3 %v1088_v0  ;;  %1230 = vmatmul.f32.gmra.mxu1 %v5087_v18  ;;  %v924_v0 = vld [vmem:[%s5038_s2 + $0x810] sm:$0xf]  ;;  %v956_v35 = vrot.slane %v946_v48, 4  ;;  %v1141_v4 = vld [vmem:[%s5038_s2 + $0x338] sm:$0xff] }
 0x294   :  { %1274 = vmatmul.f32.gmra.mxu3 %v5088_v12  ;;  %1409 = vmatmul.f32.gmra.mxu2 %v3503_v9  ;;  %5090 = vst [vmem:[#allocation12_spill] sm:$0xff] %v3890_v56  ;;  %v923_v9 = vld [vmem:[%s5038_s2 + $0x808] sm:$0xff]  ;;  %v943_v18 = vld [vmem:[#allocation2 + $0x4b] sm:$0xff]  ;;  %v934_v20 = vmul.f32 %v929_v37, %v924_v0  ;;  %v958_v12 = vrot.slane %v947_v49, 4  ;;  %v955_v40 = vrot.slane %v945_v23, 4  ;;  %v5095_v56 = vld [vmem:[#allocation21_spill] sm:$0xff] }
 0x295   :  { %1302 = vmatpush.msrb.mxu3 %v1087_v59  ;;  %1346 = vmatpush.msra.mxu1 %v1103_v24  ;;  %v3907_v59 = vmul.f32 %v923_v9, %v5093_v39  ;;  %v948_v25 = vmul.f32 %v943_v18, %v923_v9  ;;  %v949_v24 = vmul.f32 %v944_v31, %v924_v0  ;;  %v1017_v49 = vld [vmem:[#allocation3 + $0x250] sm:$0xff]  ;;  %v1142_v0 = vld [vmem:[%s5038_s2 + $0x340] sm:$0xff]  ;;  %v1012_v39 = vld [vmem:[#allocation3 + $0x88] sm:$0xff] }
 0x296   :  { %1522 = vmatpush.msra.mxu2 %v1167_v41  ;;  %v3913_v15 = vsel %vm522_vm0, %v955_v40, %v956_v35  ;;  %939 = vst [vmem:[#allocation3 + $0x40] sm:$0xf] %v934_v20  ;;  %v3916_v41 = vsel %vm522_vm0, %v956_v35, %v958_v12  ;;  %v1158_v37 = vld [vmem:[%s5038_s2 + $0x3c0] sm:$0xff]  ;;  %v1156_v23 = vld [vmem:[%s5038_s2 + $0x3b0] sm:$0xff]  ;;  %v1139_v35 = vld [vmem:[%s5038_s2 + $0x328] sm:$0xff] }
 0x297   :  { %v960_v5 = vrot.slane %v948_v25, 4  ;;  %v962_v19 = vrot.slane %v949_v24, 4  ;;  %969 = vst [vmem:[#allocation3 + $0x40] sm:$0xf0] %v955_v40  ;;  %v1013_v18 = vld [vmem:[#allocation3 + $0x1a8] sm:$0xff]  ;;  %v1138_v31 = vld [vmem:[%s5038_s2 + $0x320] sm:$0xff] }
 0x298   :  { %v1155_v20 = vld [vmem:[%s5038_s2 + $0x3a8] sm:$0xff]  ;;  %v1137_v25 = vld [vmem:[%s5038_s2 + $0x318] sm:$0xff]  ;;  %v1152_v40 = vld [vmem:[%s5038_s2 + $0x390] sm:$0xff] }
 0x299   :  { %v3919_v48 = vsel %vm522_vm0, %v958_v12, %v960_v5  ;;  %v3922_v9 = vsel %vm522_vm0, %v960_v5, %v962_v19  ;;  %v1154_v12 = vld [vmem:[%s5038_s2 + $0x3a0] sm:$0xff]  ;;  %v1153_v24 = vld [vmem:[%s5038_s2 + $0x398] sm:$0xff]  ;;  %v1135_v5 = vld [vmem:[%s5038_s2 + $0x308] sm:$0xff] }
 0x29a   :  { %v5096_v19 = vld [vmem:[#allocation17_spill] sm:$0xff] }
 0x29b   :  { %1233 = vmatmul.f32.gmra.mxu1 %v5094_v2  ;;  %v1159_v2 = vld [vmem:[%s5038_s2 + $0x3c8] sm:$0xff] }
 0x29c   :  { %1277 = vmatmul.f32.gmra.mxu3 %v5095_v56  ;;  %1412 = vmatmul.f32.gmra.mxu2 %v3542_v16  ;;  %v1150_v16 = vld [vmem:[%s5038_s2 + $0x380] sm:$0xff]  ;;  %v1149_v56 = vld [vmem:[%s5038_s2 + $0x378] sm:$0xff] }
 0x29d   :  { %1419 = vmatpush.msra.mxu3 %v1150_v16  ;;  %v5097_v16 = vld [vmem:[#allocation22_spill] sm:$0xff] }
 0x29f   :  { %1420 = vmatpush.msra.mxu3 %v1149_v56  ;;  %v1151_v56 = vld [vmem:[%s5038_s2 + $0x388] sm:$0xff] }
 0x2a3   :  { %1236 = vmatmul.f32.gmra.mxu1 %v3506_v13  ;;  %v1148_v13 = vld [vmem:[%s5038_s2 + $0x370] sm:$0xff] }
 0x2a4   :  { %1280 = vmatmul.f32.gmra.mxu3 %v3512_v52  ;;  %1415 = vmatmul.f32.gmra.mxu2 %v3567_v7  ;;  %v1147_v52 = vld [vmem:[%s5038_s2 + $0x368] sm:$0xff]  ;;  %v1165_v7 = vld [vmem:[%s5038_s2 + $0x3f8] sm:$0xff] }
 0x2a5   :  { %1421 = vmatpush.msra.mxu3 %v1148_v13  ;;  %v5098_v13 = vld [vmem:[#allocation23_spill] sm:$0xff] }
 0x2a7   :  { %1422 = vmatpush.msra.mxu3 %v1147_v52 }
 0x2ab   :  { %1239 = vmatmul.f32.gmra.mxu1 %v3545_v28  ;;  %v1146_v28 = vld [vmem:[%s5038_s2 + $0x360] sm:$0xff] }
 0x2ac   :  { %1283 = vmatmul.f32.gmra.mxu3 %v3564_v21  ;;  %1523 = vmatmul.f32.vlgmr.msra.gmra.mxu2 %v3602_v61  ;;  %v1166_v21 = vld [vmem:[%s5038_s2 + $0x400] sm:$0xff]  ;;  %v1163_v61 = vld [vmem:[%s5038_s2 + $0x3e8] sm:$0xff] }
 0x2ad   :  { %1423 = vmatpush.msra.mxu3 %v1146_v28  ;;  %1463 = vmatpush.msrb.mxu1 %v1166_v21 }
 0x2af   :  { %1464 = vmatpush.msrb.mxu1 %v1165_v7  ;;  %v1198_v7 = vld [vmem:[%s5038_s2 + $0x500] sm:$0xff] }
 0x2b3   :  { %1347 = vmatmul.f32.vlgmr.msra.gmra.mxu1 %v3582_v50  ;;  %v1164_v50 = vld [vmem:[%s5038_s2 + $0x3f0] sm:$0xff] }
 0x2b4   :  { %1303 = vmatmul.f32.vlgmr.msrb.gmra.mxu3 %v3570_v29  ;;  %1526 = vmatmul.f32.gmra.mxu2 %v3675_v55  ;;  %v1145_v29 = vld [vmem:[%s5038_s2 + $0x358] sm:$0xff] }
 0x2b5   :  { %1424 = vmatpush.msra.mxu3 %v1145_v29  ;;  %1465 = vmatpush.msrb.mxu1 %v1164_v50  ;;  %v2519_v55 = vld [vmem:[#allocation3 + $0xf8] sm:$0xff]  ;;  %v1195_v29 = vld [vmem:[%s5038_s2 + $0x4e8] sm:$0xff] }
 0x2b7   :  { %1466 = vmatpush.msrb.mxu1 %v1163_v61  ;;  %v1194_v61 = vld [vmem:[%s5038_s2 + $0x4e0] sm:$0xff] }
 0x2bb   :  { %1350 = vmatmul.f32.gmra.mxu1 %v3623_v10  ;;  %v1162_v10 = vld [vmem:[%s5038_s2 + $0x3e0] sm:$0xff] }
 0x2bc   :  { %1306 = vmatmul.f32.gmra.mxu3 %v3615_v54  ;;  %1529 = vmatmul.f32.gmra.mxu2 %v3706_v51  ;;  %v1144_v54 = vld [vmem:[%s5038_s2 + $0x350] sm:$0xff]  ;;  %v1161_v51 = vld [vmem:[%s5038_s2 + $0x3d8] sm:$0xff] }
 0x2bd   :  { %1425 = vmatpush.msra.mxu3 %v1144_v54  ;;  %1467 = vmatpush.msrb.mxu1 %v1162_v10  ;;  %v1192_v10 = vld [vmem:[%s5038_s2 + $0x4d0] sm:$0xff] }
 0x2bf   :  { %1468 = vmatpush.msrb.mxu1 %v1161_v51  ;;  %v2520_v51 = vld [vmem:[#allocation3 + $0x98] sm:$0xff] }
 0x2c3   :  { %1353 = vmatmul.f32.gmra.mxu1 %v3696_v38  ;;  %v1160_v38 = vld [vmem:[%s5038_s2 + $0x3d0] sm:$0xff] }
 0x2c4   :  { %1309 = vmatmul.f32.gmra.mxu3 %v3691_v47  ;;  %1532 = vmatmul.f32.gmra.mxu2 %v2519_v55  ;;  %v1143_v47 = vld [vmem:[%s5038_s2 + $0x348] sm:$0xff] }
 0x2c5   :  { %1426 = vmatpush.msra.mxu3 %v1143_v47  ;;  %1469 = vmatpush.msrb.mxu1 %v1160_v38  ;;  %v1191_v55 = vld [vmem:[%s5038_s2 + $0x4c8] sm:$0xff]  ;;  %v2521_v47 = vld [vmem:[#allocation3 + $0x210] sm:$0xff] }
 0x2c7   :  { %1470 = vmatpush.msrb.mxu1 %v1159_v2  ;;  %1427 = vmatpush.msra.mxu3 %v1142_v0  ;;  %v1189_v2 = vld [vmem:[%s5038_s2 + $0x4b8] sm:$0xff]  ;;  %v1015_v0 = vld [vmem:[#allocation3 + $0x28] sm:$0xff] }
 0x2c9   :  { %1471 = vmatpush.msrb.mxu1 %v1158_v37  ;;  %1428 = vmatpush.msra.mxu3 %v1141_v4  ;;  %v1016_v37 = vld [vmem:[#allocation3 + $0xa0] sm:$0xff]  ;;  %v1187_v4 = vld [vmem:[%s5038_s2 + $0x4a8] sm:$0xff] }
 0x2cb   :  { %1356 = vmatmul.f32.gmra.mxu1 %v3717_v60  ;;  %v1140_v60 = vld [vmem:[%s5038_s2 + $0x330] sm:$0xff] }
 0x2cc   :  { %1312 = vmatmul.f32.gmra.mxu3 %v3713_v6  ;;  %1535 = vmatmul.f32.gmra.mxu2 %v1017_v49  ;;  %v1157_v6 = vld [vmem:[%s5038_s2 + $0x3b8] sm:$0xff]  ;;  %v1188_v49 = vld [vmem:[%s5038_s2 + $0x4b0] sm:$0xff] }
 0x2cd   :  { %1472 = vmatpush.msrb.mxu1 %v1157_v6  ;;  %1429 = vmatpush.msra.mxu3 %v1140_v60  ;;  %v1186_v6 = vld [vmem:[%s5038_s2 + $0x4a0] sm:$0xff] }
 0x2cf   :  { %1473 = vmatpush.msrb.mxu1 %v1156_v23  ;;  %1430 = vmatpush.msra.mxu3 %v1139_v35  ;;  %v1185_v35 = vld [vmem:[%s5038_s2 + $0x498] sm:$0xff] }
 0x2d1   :  { %1474 = vmatpush.msrb.mxu1 %v1155_v20  ;;  %1431 = vmatpush.msra.mxu3 %v1138_v31 }
 0x2d3   :  { %1359 = vmatmul.f32.gmra.mxu1 %v1013_v18  ;;  %1432 = vmatpush.msra.mxu3 %v1137_v25  ;;  %v1183_v18 = vld [vmem:[%s5038_s2 + $0x488] sm:$0xff] }
 0x2d4   :  { %1315 = vmatmul.f32.gmra.mxu3 %v1012_v39  ;;  %1538 = vmatmul.f32.gmra.mxu2 %v3517_v30  ;;  %v1136_v30 = vld [vmem:[%s5038_s2 + $0x310] sm:$0xff] }
 0x2d5   :  { %1475 = vmatpush.msrb.mxu1 %v1154_v12  ;;  %1433 = vmatpush.msra.mxu3 %v1136_v30  ;;  %v1184_v39 = vld [vmem:[%s5038_s2 + $0x490] sm:$0xff] }
 0x2d7   :  { %1476 = vmatpush.msrb.mxu1 %v1153_v24  ;;  %1434 = vmatpush.msra.mxu3 %v1135_v5 }
 0x2d9   :  { %1477 = vmatpush.msrb.mxu1 %v1152_v40  ;;  %1551 = vmatpush.msrb.mxu3 %v1198_v7 }
 0x2db   :  { %1362 = vmatmul.f32.gmra.mxu1 %v5097_v16 }
 0x2dc   :  { %1318 = vmatmul.f32.gmra.mxu3 %v5096_v19  ;;  %1541 = vmatmul.f32.gmra.mxu2 %v3641_v34 }
 0x2dd   :  { %1478 = vmatpush.msrb.mxu1 %v1151_v56 }
 0x2e2   :  { %v1392_v16 = vpop.f32.mrf.mxu2 }
 0x2e3   :  { %1365 = vmatmul.f32.gmra.mxu1 %v3535_v42  ;;  %v1197_v42 = vld [vmem:[%s5038_s2 + $0x4f8] sm:$0xff] }
 0x2e4   :  { %1321 = vmatmul.f32.gmra.mxu3 %v5098_v13  ;;  %1544 = vmatmul.f32.gmra.mxu2 %v3745_v62  ;;  %v5100_v13 = vld [vmem:[#allocation10_spill] sm:$0xff] }
 0x2e5   :  { %1552 = vmatpush.msrb.mxu3 %v1197_v42 }
 0x2e6   :  { %v1216_v52 = vpop.f32.mrf.mxu1 }
 0x2eb   :  { %1368 = vmatmul.f32.gmra.mxu1 %v3731_v43 }
 0x2ec   :  { %1324 = vmatmul.f32.gmra.mxu3 %v3651_v1  ;;  %1547 = vmatmul.f32.gmra.mxu2 %v3780_v63  ;;  %v1196_v63 = vld [vmem:[%s5038_s2 + $0x4f0] sm:$0xff] }
 0x2ed   :  { %v1260_v28 = vpop.f32.mrf.mxu3  ;;  %1553 = vmatpush.msrb.mxu3 %v1196_v63 }
 0x2ee   :  { %v4046_v21 = vadd.f32 %v1260_v28, %v1216_v52 }
 0x2ef   :  { %v1219_v34 = vpop.f32.mrf.mxu1  ;;  %1554 = vmatpush.msrb.mxu3 %v1195_v29 }
 0x2f1   :  { %1555 = vmatpush.msrb.mxu3 %v1194_v61 }
 0x2f3   :  { %1371 = vmatmul.f32.gmra.mxu1 %v3771_v57 }
 0x2f4   :  { %1327 = vmatmul.f32.gmra.mxu3 %v3762_v36 }
 0x2f6   :  { %v1263_v1 = vpop.f32.mrf.mxu3 }
 0x2f7   :  { %v4056_v43 = vadd.f32 %v1263_v1, %v1219_v34  ;;  %v1395_v34 = vpop.f32.mrf.mxu2 }
 0x2f8   :  { %v1222_v62 = vpop.f32.mrf.mxu1 }
 0x2fb   :  { %1479 = vmatmul.f32.vlgmr.msrb.gmra.mxu1 %v3788_v58  ;;  %v1193_v58 = vld [vmem:[%s5038_s2 + $0x4d8] sm:$0xff] }
 0x2fc   :  { %1435 = vmatmul.f32.vlgmr.msra.gmra.mxu3 %v3783_v46 }
 0x2fd   :  { %1556 = vmatpush.msrb.mxu3 %v1193_v58  ;;  %v1018_v58 = vld [vmem:[#allocation3 + $0x40] sm:$0xff] }
 0x2ff   :  { %v1266_v36 = vpop.f32.mrf.mxu3  ;;  %1557 = vmatpush.msrb.mxu3 %v1192_v10 }
 0x300   :  { %v4063_v57 = vadd.f32 %v1266_v36, %v1222_v62  ;;  %v4068_v50 = vpop.f32.mrf.mxu1 }
 0x301   :  { %1558 = vmatpush.msrb.mxu3 %v1191_v55 }
 0x303   :  { %1482 = vmatmul.f32.gmra.mxu1 %v3796_v17 }
 0x304   :  { %1438 = vmatmul.f32.gmra.mxu3 %v3790_v3 }
 0x307   :  { %v4075_v46 = vpop.f32.mrf.mxu3 }
 0x308   :  { %v4080_v54 = vpop.f32.mrf.mxu1 }
 0x30b   :  { %1485 = vmatmul.f32.gmra.mxu1 %v3811_v11 }
 0x30c   :  { %1441 = vmatmul.f32.gmra.mxu3 %v3805_v45  ;;  %v1190_v45 = vld [vmem:[%s5038_s2 + $0x4c0] sm:$0xff] }
 0x30d   :  { %1559 = vmatpush.msrb.mxu3 %v1190_v45 }
 0x30f   :  { %v4087_v3 = vpop.f32.mrf.mxu3  ;;  %1560 = vmatpush.msrb.mxu3 %v1189_v2 }
 0x310   :  { %v4089_v17 = vpop.f32.mrf.mxu1  ;;  %v1273_v7 = vadd.f32 %v4087_v3, %v4080_v54 }
 0x311   :  { %1561 = vmatpush.msrb.mxu3 %v1188_v49 }
 0x313   :  { %1488 = vmatmul.f32.gmra.mxu1 %v2521_v47  ;;  %1562 = vmatpush.msrb.mxu3 %v1187_v4 }
 0x314   :  { %1444 = vmatmul.f32.gmra.mxu3 %v2520_v51 }
 0x315   :  { %1563 = vmatpush.msrb.mxu3 %v1186_v6 }
 0x317   :  { %v4097_v11 = vpop.f32.mrf.mxu3  ;;  %1564 = vmatpush.msrb.mxu3 %v1185_v35 }
 0x318   :  { %v4099_v38 = vpop.f32.mrf.mxu1  ;;  %v1276_v29 = vadd.f32 %v4097_v11, %v4089_v17 }
 0x319   :  { %1565 = vmatpush.msrb.mxu3 %v1184_v39 }
 0x31b   :  { %1491 = vmatmul.f32.gmra.mxu1 %v1016_v37  ;;  %1566 = vmatpush.msrb.mxu3 %v1183_v18 }
 0x31c   :  { %1447 = vmatmul.f32.gmra.mxu3 %v1015_v0 }
 0x31f   :  { %v1278_v60 = vpop.f32.mrf.mxu3 }
 0x320   :  { %v4113_v23 = vpop.f32.mrf.mxu1  ;;  %v1279_v54 = vadd.f32 %v1278_v60, %v4099_v38 }
 0x323   :  { %1494 = vmatmul.f32.gmra.mxu1 %v3841_v32 }
 0x324   :  { %1450 = vmatmul.f32.gmra.mxu3 %v3835_v22 }
 0x327   :  { %v1281_v20 = vpop.f32.mrf.mxu3 }
 0x328   :  { %v1240_v31 = vpop.f32.mrf.mxu1 }
 0x32b   :  { %1497 = vmatmul.f32.gmra.mxu1 %v3850_v27  ;;  %v5099_v27 = vld [vmem:[#allocation12_spill] sm:$0xff] }
 0x32c   :  { %1453 = vmatmul.f32.gmra.mxu3 %v3844_v33 }
 0x32f   :  { %v1284_v12 = vpop.f32.mrf.mxu3 }
 0x330   :  { %v1348_v25 = vpop.f32.mrf.mxu1  ;;  %v1285_v4 = vadd.f32 %v1284_v12, %v1240_v31 }
 0x333   :  { %1500 = vmatmul.f32.gmra.mxu1 %v3870_v14 }
 0x334   :  { %1456 = vmatmul.f32.gmra.mxu3 %v3862_v44 }
 0x337   :  { %v1304_v22 = vpop.f32.mrf.mxu3 }
 0x338   :  { %v1305_v32 = vadd.f32 %v1304_v22, %v4046_v21  ;;  %v1351_v24 = vpop.f32.mrf.mxu1 }
 0x33a   :  { %v1349_v1 = vadd.f32 %v1348_v25, %v1305_v32 }
 0x33b   :  { %1503 = vmatmul.f32.gmra.mxu1 %v3887_v8 }
 0x33c   :  { %1459 = vmatmul.f32.gmra.mxu3 %v3883_v53  ;;  %v1270_v53 = vadd.f32 %v4075_v46, %v4068_v50  ;;  %v1393_v36 = vadd.f32 %v1392_v16, %v1349_v1 }
 0x33f   :  { %v1307_v30 = vpop.f32.mrf.mxu3 }
 0x340   :  { %v1308_v40 = vadd.f32 %v1307_v30, %v4056_v43  ;;  %v1354_v33 = vpop.f32.mrf.mxu1 }
 0x342   :  { %v1352_v5 = vadd.f32 %v1351_v24, %v1308_v40 }
 0x344   :  { %1567 = vmatmul.f32.vlgmr.msrb.gmra.mxu3 %v5099_v27 }
 0x347   :  { %v1310_v19 = vpop.f32.mrf.mxu3 }
 0x348   :  { %v1311_v44 = vadd.f32 %v1310_v19, %v4063_v57  ;;  %v1357_v14 = vpop.f32.mrf.mxu1  ;;  %v1398_v57 = vpop.f32.mrf.mxu2 }
 0x34a   :  { %v1355_v56 = vadd.f32 %v1354_v33, %v1311_v44 }
 0x34c   :  { %1570 = vmatmul.f32.gmra.mxu3 %v5100_v13  ;;  %v1399_v45 = vadd.f32 %v1398_v57, %v1355_v56 }
 0x34f   :  { %v1313_v52 = vpop.f32.mrf.mxu3 }
 0x350   :  { %v1314_v8 = vadd.f32 %v1313_v52, %v1270_v53  ;;  %v1360_v28 = vpop.f32.mrf.mxu1  ;;  %v1401_v3 = vpop.f32.mrf.mxu2 }
 0x352   :  { %v1358_v21 = vadd.f32 %v1357_v14, %v1314_v8 }
 0x354   :  { %1573 = vmatmul.f32.gmra.mxu3 %v3904_v26  ;;  %v1396_v26 = vadd.f32 %v1395_v34, %v1352_v5  ;;  %v1402_v37 = vadd.f32 %v1401_v3, %v1358_v21 }
 0x357   :  { %v1316_v42 = vpop.f32.mrf.mxu3 }
 0x358   :  { %v1317_v43 = vadd.f32 %v1316_v42, %v1273_v7  ;;  %v1363_v63 = vpop.f32.mrf.mxu1  ;;  %v1404_v49 = vpop.f32.mrf.mxu2 }
 0x35a   :  { %v1361_v62 = vadd.f32 %v1360_v28, %v1317_v43 }
 0x35c   :  { %1576 = vmatmul.f32.gmra.mxu3 %v3907_v59  ;;  %v1282_v59 = vadd.f32 %v1281_v20, %v4113_v23  ;;  %v1405_v39 = vadd.f32 %v1404_v49, %v1361_v62 }
 0x35f   :  { %v1319_v50 = vpop.f32.mrf.mxu3 }
 0x360   :  { %v1320_v61 = vadd.f32 %v1319_v50, %v1276_v29  ;;  %v1366_v10 = vpop.f32.mrf.mxu1  ;;  %v1407_v18 = vpop.f32.mrf.mxu2 }
 0x362   :  { %v1364_v46 = vadd.f32 %v1363_v63, %v1320_v61 }
 0x364   :  { %1579 = vmatmul.f32.gmra.mxu3 %v1018_v58  ;;  %v1408_v25 = vadd.f32 %v1407_v18, %v1364_v46 }
 0x367   :  { %v1322_v55 = vpop.f32.mrf.mxu3 }
 0x368   :  { %v1323_v51 = vadd.f32 %v1322_v55, %v1279_v54  ;;  %v1369_v2 = vpop.f32.mrf.mxu1  ;;  %v1410_v23 = vpop.f32.mrf.mxu2 }
 0x36a   :  { %v1367_v47 = vadd.f32 %v1366_v10, %v1323_v51 }
 0x36c   :  { %1582 = vmatmul.f32.gmra.mxu3 %v3913_v15  ;;  %v1411_v32 = vadd.f32 %v1410_v23, %v1367_v47 }
 0x36f   :  { %v1325_v17 = vpop.f32.mrf.mxu3 }
 0x370   :  { %v1326_v11 = vadd.f32 %v1325_v17, %v1282_v59  ;;  %v1372_v60 = vpop.f32.mrf.mxu1  ;;  %v1413_v24 = vpop.f32.mrf.mxu2 }
 0x372   :  { %v1370_v0 = vadd.f32 %v1369_v2, %v1326_v11 }
 0x374   :  { %1585 = vmatmul.f32.gmra.mxu3 %v3916_v41  ;;  %v1414_v31 = vadd.f32 %v1413_v24, %v1370_v0 }
 0x377   :  { %v1328_v6 = vpop.f32.mrf.mxu3 }
 0x378   :  { %v1329_v38 = vadd.f32 %v1328_v6, %v1285_v4  ;;  %v1416_v33 = vpop.f32.mrf.mxu2  ;;  %v1480_v14 = vpop.f32.mrf.mxu1 }
 0x37a   :  { %v1373_v35 = vadd.f32 %v1372_v60, %v1329_v38 }
 0x37c   :  { %1588 = vmatmul.f32.gmra.mxu3 %v3919_v48  ;;  %v1417_v5 = vadd.f32 %v1416_v33, %v1373_v35 }
 0x37f   :  { %v1436_v15 = vpop.f32.mrf.mxu3 }
 0x380   :  { %v1524_v56 = vpop.f32.mrf.mxu2  ;;  %v1483_v52 = vpop.f32.mrf.mxu1  ;;  %v1437_v8 = vadd.f32 %v1436_v15, %v1393_v36 }
 0x382   :  { %v1481_v7 = vadd.f32 %v1480_v14, %v1437_v8 }
 0x384   :  { %1591 = vmatmul.f32.gmra.mxu3 %v3922_v9  ;;  %v1525_v1 = vadd.f32 %v1524_v56, %v1481_v7 }
 0x387   :  { %v1439_v20 = vpop.f32.mrf.mxu3 }
 0x388   :  { %v1440_v22 = vadd.f32 %v1439_v20, %v1396_v26  ;;  %v1527_v28 = vpop.f32.mrf.mxu2  ;;  %v1486_v42 = vpop.f32.mrf.mxu1 }
 0x38a   :  { %v1484_v57 = vadd.f32 %v1483_v52, %v1440_v22 }
 0x38c   :  { %v1528_v29 = vadd.f32 %v1527_v28, %v1484_v57 }
 0x38f   :  { %v1442_v30 = vpop.f32.mrf.mxu3 }
 0x390   :  { %v1443_v41 = vadd.f32 %v1442_v30, %v1399_v45  ;;  %v1530_v63 = vpop.f32.mrf.mxu2  ;;  %v1489_v50 = vpop.f32.mrf.mxu1 }
 0x392   :  { %v1487_v10 = vadd.f32 %v1486_v42, %v1443_v41 }
 0x394   :  { %v1531_v17 = vadd.f32 %v1530_v63, %v1487_v10 }
 0x397   :  { %v1445_v12 = vpop.f32.mrf.mxu3 }
 0x398   :  { %v1446_v40 = vadd.f32 %v1445_v12, %v1402_v37  ;;  %v1533_v3 = vpop.f32.mrf.mxu2  ;;  %v1492_v4 = vpop.f32.mrf.mxu1 }
 0x39a   :  { %v1490_v38 = vadd.f32 %v1489_v50, %v1446_v40  ;;  %v4164_v40 = vld [vmem:[%s5038_s2 + $0x508] sm:$0x1] }
 0x39c   :  { %v1534_v30 = vadd.f32 %v1533_v3, %v1490_v38  ;;  %v1861_v3 = vld [vmem:[%s5039_s3 + $0x2e0] sm:$0xff] }
 0x39f   :  { %v1448_v27 = vpop.f32.mrf.mxu3 }
 0x3a0   :  { %v4151_v19 = vadd.f32 %v1448_v27, %v1405_v39  ;;  %v1536_v23 = vpop.f32.mrf.mxu2 }
 0x3a2   :  { %v1493_v14 = vadd.f32 %v1492_v4, %v4151_v19 }
 0x3a7   :  { %v1451_v48 = vpop.f32.mrf.mxu3 }
 0x3a8   :  { %v4153_v44 = vadd.f32 %v1451_v48, %v1408_v25  ;;  %v1539_v10 = vpop.f32.mrf.mxu2 }
 0x3af   :  { %v1454_v16 = vpop.f32.mrf.mxu3 }
 0x3b0   :  { %v4155_v9 = vadd.f32 %v1454_v16, %v1411_v32 }
 0x3b7   :  { %v1457_v13 = vpop.f32.mrf.mxu3 }
 0x3b8   :  { %v4157_v53 = vadd.f32 %v1457_v13, %v1414_v31  ;;  %v1495_v13 = vpop.f32.mrf.mxu1 }
 0x3bf   :  { %v1460_v21 = vpop.f32.mrf.mxu3 }
 0x3c0   :  { %v4159_v34 = vadd.f32 %v1460_v21, %v1417_v5 }
 0x3c7   :  { %v1568_v43 = vpop.f32.mrf.mxu3 }
 0x3c8   :  { %v1569_v62 = vadd.f32 %v1568_v43, %v1525_v1 }
 0x3ca   :  { %1595 = vst [vmem:[#allocation4] sm:$0xff] %v1569_v62 }
 0x3cf   :  { %v1571_v61 = vpop.f32.mrf.mxu3 }
 0x3d0   :  { %v1572_v46 = vadd.f32 %v1571_v61, %v1528_v29  ;;  %v1799_v29 = vld [vmem:[%s5039_s3 + $0xf0] sm:$0xff]  ;;  %v1537_v61 = vadd.f32 %v1536_v23, %v1493_v14 }
 0x3d1   :  { %v1605_v58 = vld [vmem:[#allocation4] sm:$0x1]  ;;  %v1606_v26 = vld [vmem:[#allocation4 + $0x1] sm:$0x1]  ;;  %v1608_v54 = vld [vmem:[#allocation4 + $0x2] sm:$0x1]  ;;  %1951 = vmatpush.msra.mxu1 %v1799_v29 }
 0x3d2   :  { %v1607_v36 = vmax.f32 %v1605_v58, %v1606_v26  ;;  %v1625_v55 = vld [vmem:[#allocation4 + $0x3] sm:$0x1]  ;;  %v1626_v51 = vld [vmem:[#allocation4 + $0x4] sm:$0x1]  ;;  %1596 = vst [vmem:[#allocation4 + $0x8] sm:$0xff] %v1572_v46  ;;  %v1831_v46 = vld [vmem:[%s5039_s3 + $0x1f0] sm:$0xff] }
 0x3d3   :  { %v1610_v45 = vld [vmem:[#allocation4 + $0x6] sm:$0x1]  ;;  %v1627_v2 = vmax.f32 %v1625_v55, %v1626_v51  ;;  %v1612_v11 = vld [vmem:[#allocation4 + $0x7] sm:$0x1]  ;;  %v1628_v6 = vld [vmem:[#allocation4 + $0x5] sm:$0x1]  ;;  %1971 = vmatpush.msrb.mxu2 %v1831_v46 }
 0x3d4   :  { %v1609_v47 = vmax.f32 %v1607_v36, %v1608_v54  ;;  %v1863_v58 = vld [vmem:[%s5039_s3 + $0x2f0] sm:$0xff]  ;;  %v1797_v26 = vld [vmem:[%s5039_s3 + $0xe0] sm:$0xff] }
 0x3d5   :  { %v1629_v60 = vmax.f32 %v1627_v2, %v1628_v6  ;;  %1991 = vmatpush.msra.mxu3 %v1863_v58  ;;  %v1829_v54 = vld [vmem:[%s5039_s3 + $0x1e0] sm:$0xff]  ;;  %v1795_v55 = vld [vmem:[%s5039_s3 + $0xd0] sm:$0xff]  ;;  %1952 = vmatpush.msra.mxu1 %v1797_v26 }
 0x3d6   :  { %v1611_v59 = vmax.f32 %v1609_v47, %v1610_v45  ;;  %v1859_v2 = vld [vmem:[%s5039_s3 + $0x2d0] sm:$0xff]  ;;  %1972 = vmatpush.msrb.mxu2 %v1829_v54  ;;  %v1853_v29 = vld [vmem:[%s5039_s3 + $0x2a0] sm:$0xff] }
 0x3d7   :  { %v1574_v49 = vpop.f32.mrf.mxu3  ;;  %1992 = vmatpush.msra.mxu3 %v1861_v3  ;;  %1953 = vmatpush.msra.mxu1 %v1795_v55  ;;  %v1819_v46 = vld [vmem:[%s5039_s3 + $0x190] sm:$0xff]  ;;  %v1785_v54 = vld [vmem:[%s5039_s3 + $0x80] sm:$0xff] }
 0x3d8   :  { %v1613_v0 = vmax.f32 %v1611_v59, %v1612_v11  ;;  %v1575_v37 = vadd.f32 %v1574_v49, %v1531_v17  ;;  %v1827_v59 = vld [vmem:[%s5039_s3 + $0x1d0] sm:$0xff]  ;;  %v1496_v49 = vadd.f32 %v1495_v13, %v4153_v44 }
 0x3d9   :  { %v1614_v35 = vld [vmem:[#allocation4 + $0x8] sm:$0x1]  ;;  %v1630_v18 = vld [vmem:[#allocation4 + $0x9] sm:$0x1]  ;;  %v1616_v15 = vld [vmem:[#allocation4 + $0xc] sm:$0x1]  ;;  %1973 = vmatpush.msrb.mxu2 %v1827_v59  ;;  %1993 = vmatpush.msra.mxu3 %v1859_v2 }
 0x3da   :  { %v1615_v39 = vmax.f32 %v1613_v0, %v1614_v35  ;;  %v1631_v25 = vmax.f32 %v1629_v60, %v1630_v18  ;;  %1597 = vst [vmem:[#allocation4 + $0x10] sm:$0xff] %v1575_v37  ;;  %v1632_v22 = vld [vmem:[#allocation4 + $0xa] sm:$0x1]  ;;  %v1618_v32 = vld [vmem:[#allocation4 + $0xd] sm:$0x1] }
 0x3db   :  { %v1634_v31 = vld [vmem:[#allocation4 + $0xb] sm:$0x1]  ;;  %v1620_v33 = vld [vmem:[#allocation4 + $0xe] sm:$0x1]  ;;  %v1636_v16 = vld [vmem:[#allocation4 + $0xf] sm:$0x1] }
 0x3dc   :  { %v1617_v20 = vmax.f32 %v1615_v39, %v1616_v15  ;;  %v1633_v24 = vmax.f32 %v1631_v25, %v1632_v22  ;;  %v1498_v39 = vpop.f32.mrf.mxu1  ;;  %v1851_v58 = vld [vmem:[%s5039_s3 + $0x290] sm:$0xff] }
 0x3de   :  { %v1619_v41 = vmax.f32 %v1617_v20, %v1618_v32  ;;  %v1635_v5 = vmax.f32 %v1633_v24, %v1634_v31  ;;  %v1540_v20 = vadd.f32 %v1539_v10, %v1496_v49  ;;  %v1793_v31 = vld [vmem:[%s5039_s3 + $0xc0] sm:$0xff] }
 0x3df   :  { %v1577_v12 = vpop.f32.mrf.mxu3  ;;  %1954 = vmatpush.msra.mxu1 %v1793_v31 }
 0x3e0   :  { %v1578_v27 = vadd.f32 %v1577_v12, %v1534_v30  ;;  %v1621_v48 = vmax.f32 %v1619_v41, %v1620_v33  ;;  %v1637_v56 = vmax.f32 %v1635_v5, %v1636_v16  ;;  %v1825_v12 = vld [vmem:[%s5039_s3 + $0x1c0] sm:$0xff]  ;;  %v1542_v5 = vpop.f32.mrf.mxu2 }
 0x3e1   :  { %v1638_v8 = vld [vmem:[#allocation4 + $0x10] sm:$0x1]  ;;  %v1645_v28 = vld [vmem:[#allocation4 + $0x12] sm:$0x1]  ;;  %v1640_v7 = vld [vmem:[#allocation4 + $0x11] sm:$0x1]  ;;  %1974 = vmatpush.msrb.mxu2 %v1825_v12 }
 0x3e2   :  { %1598 = vst [vmem:[#allocation4 + $0x18] sm:$0xff] %v1578_v27  ;;  %v1622_v52 = vadd.f32 %v1621_v48, %v4164_v40  ;;  %v1639_v21 = vmax.f32 %v1637_v56, %v1638_v8  ;;  %v1646_v42 = vld [vmem:[#allocation4 + $0x13] sm:$0x1]  ;;  %v1665_v1 = vld [vmem:[#allocation4 + $0x15] sm:$0x1]  ;;  %v1857_v33 = vld [vmem:[%s5039_s3 + $0x2c0] sm:$0xff]  ;;  %v1499_v8 = vadd.f32 %v1498_v39, %v4155_v9 }
 0x3e3   :  { %v1647_v62 = vmax.f32 %v1645_v28, %v1646_v42  ;;  %v1648_v63 = vld [vmem:[#allocation4 + $0x14] sm:$0x1]  ;;  %v1666_v57 = vld [vmem:[#allocation4 + $0x16] sm:$0x1]  ;;  %v1668_v17 = vld [vmem:[#allocation4 + $0x17] sm:$0x1]  ;;  %1994 = vmatpush.msra.mxu3 %v1857_v33 }
 0x3e4   :  { %v1623_v43 = vmax.f32 %v1622_v52, 0.0  ;;  %v1641_v19 = vmax.f32 %v1639_v21, %v1640_v7  ;;  %v1667_v50 = vmax.f32 %v1665_v1, %v1666_v57  ;;  %v1791_v7 = vld [vmem:[%s5039_s3 + $0xb0] sm:$0xff]  ;;  %v1789_v9 = vld [vmem:[%s5039_s3 + $0xa0] sm:$0xff]  ;;  %v1501_v26 = vpop.f32.mrf.mxu1  ;;  %v1543_v10 = vadd.f32 %v1542_v5, %v1499_v8 }
 0x3e5   :  { %v1649_v47 = vmax.f32 %v1647_v62, %v1648_v63  ;;  %1955 = vmatpush.msra.mxu1 %v1791_v7  ;;  %v1855_v62 = vld [vmem:[%s5039_s3 + $0x2b0] sm:$0xff]  ;;  %v1821_v57 = vld [vmem:[%s5039_s3 + $0x1a0] sm:$0xff]  ;;  %v1502_v49 = vadd.f32 %v1501_v26, %v4157_v53 }
 0x3e6   :  { %1624 = vst [vmem:[#allocation5] sm:$0x1] %v1623_v43  ;;  %v1642_v51 = vadd.f32 %v1641_v19, %v4164_v40  ;;  %v1669_v37 = vmax.f32 %v1667_v50, %v1668_v17  ;;  %v1823_v43 = vld [vmem:[%s5039_s3 + $0x1b0] sm:$0xff]  ;;  %1995 = vmatpush.msra.mxu3 %v1855_v62  ;;  %v1781_v39 = vld [vmem:[%s5039_s3 + $0x60] sm:$0xff] }
 0x3e7   :  { %v1580_v36 = vpop.f32.mrf.mxu3  ;;  %1975 = vmatpush.msrb.mxu2 %v1823_v43  ;;  %v1787_v19 = vld [vmem:[%s5039_s3 + $0x90] sm:$0xff]  ;;  %1956 = vmatpush.msra.mxu1 %v1789_v9  ;;  %v1841_v8 = vld [vmem:[%s5039_s3 + $0x240] sm:$0xff] }
 0x3e8   :  { %v1581_v45 = vadd.f32 %v1580_v36, %v1537_v61  ;;  %v1643_v0 = vmax.f32 %v1642_v51, 0.0  ;;  %1996 = vmatpush.msra.mxu3 %v1853_v29  ;;  %v1783_v17 = vld [vmem:[%s5039_s3 + $0x70] sm:$0xff] }
 0x3e9   :  { %v1650_v11 = vld [vmem:[#allocation4 + $0x18] sm:$0x1]  ;;  %v1652_v6 = vld [vmem:[#allocation4 + $0x19] sm:$0x1]  ;;  %v1670_v38 = vld [vmem:[#allocation4 + $0x1b] sm:$0x1]  ;;  %1976 = vmatpush.msrb.mxu2 %v1821_v57  ;;  %1957 = vmatpush.msra.mxu1 %v1787_v19 }
 0x3ea   :  { %v1651_v4 = vmax.f32 %v1649_v47, %v1650_v11  ;;  %1599 = vst [vmem:[#allocation4 + $0x20] sm:$0xff] %v1581_v45  ;;  %v1671_v35 = vmax.f32 %v1669_v37, %v1670_v38  ;;  %v1654_v18 = vld [vmem:[#allocation4 + $0x1a] sm:$0x1]  ;;  %v1672_v15 = vld [vmem:[#allocation4 + $0x1c] sm:$0x1]  ;;  %1997 = vmatpush.msra.mxu3 %v1851_v58  ;;  %v1815_v11 = vld [vmem:[%s5039_s3 + $0x170] sm:$0xff] }
 0x3eb   :  { %1644 = vst [vmem:[#allocation5 + $0x2] sm:$0x1] %v1643_v0  ;;  %v1656_v22 = vld [vmem:[#allocation4 + $0x1e] sm:$0x1]  ;;  %v1674_v44 = vld [vmem:[#allocation4 + $0x1d] sm:$0x1]  ;;  %1977 = vmatpush.msrb.mxu2 %v1819_v46  ;;  %1958 = vmatpush.msra.mxu1 %v1785_v54 }
 0x3ec   :  { %v1653_v60 = vmax.f32 %v1651_v4, %v1652_v6  ;;  %v1673_v23 = vmax.f32 %v1671_v35, %v1672_v15  ;;  %v1658_v27 = vld [vmem:[#allocation4 + $0x1f] sm:$0x1]  ;;  %v1847_v4 = vld [vmem:[%s5039_s3 + $0x270] sm:$0xff]  ;;  %v1545_v6 = vpop.f32.mrf.mxu2  ;;  %v1504_v5 = vpop.f32.mrf.mxu1 }
 0x3ed   :  { %v1817_v47 = vld [vmem:[%s5039_s3 + $0x180] sm:$0xff]  ;;  %1959 = vmatpush.msra.mxu1 %v1783_v17  ;;  %v1839_v7 = vld [vmem:[%s5039_s3 + $0x230] sm:$0xff] }
 0x3ee   :  { %v1655_v25 = vmax.f32 %v1653_v60, %v1654_v18  ;;  %v1675_v30 = vmax.f32 %v1673_v23, %v1674_v44  ;;  %v1849_v45 = vld [vmem:[%s5039_s3 + $0x280] sm:$0xff]  ;;  %1978 = vmatpush.msrb.mxu2 %v1817_v47  ;;  %v1779_v23 = vld [vmem:[%s5039_s3 + $0x50] sm:$0xff]  ;;  %v1546_v44 = vadd.f32 %v1545_v6, %v1502_v49 }
 0x3ef   :  { %v1583_v32 = vpop.f32.mrf.mxu3  ;;  %1998 = vmatpush.msra.mxu3 %v1849_v45  ;;  %v1813_v18 = vld [vmem:[%s5039_s3 + $0x160] sm:$0xff]  ;;  %1960 = vmatpush.msra.mxu1 %v1781_v39  ;;  %v1803_v45 = vld [vmem:[%s5039_s3 + $0x110] sm:$0xff] }
 0x3f0   :  { %v1657_v24 = vmax.f32 %v1655_v25, %v1656_v22  ;;  %v1584_v41 = vadd.f32 %v1583_v32, %v1540_v20  ;;  %v1845_v15 = vld [vmem:[%s5039_s3 + $0x260] sm:$0xff]  ;;  %1979 = vmatpush.msrb.mxu2 %v1815_v11  ;;  %v1811_v32 = vld [vmem:[%s5039_s3 + $0x150] sm:$0xff] }
 0x3f1   :  { %v1676_v48 = vld [vmem:[#allocation4 + $0x21] sm:$0x1]  ;;  %v1660_v14 = vld [vmem:[#allocation4 + $0x20] sm:$0x1]  ;;  %v1685_v13 = vld [vmem:[#allocation4 + $0x24] sm:$0x1]  ;;  %1999 = vmatpush.msra.mxu3 %v1847_v4  ;;  %1961 = vmatpush.msra.mxu1 %v1779_v23 }
 0x3f2   :  { %v1659_v16 = vmax.f32 %v1657_v24, %v1658_v27  ;;  %v1677_v56 = vmax.f32 %v1675_v30, %v1676_v48  ;;  %v1686_v52 = vld [vmem:[#allocation4 + $0x25] sm:$0x1]  ;;  %v1678_v28 = vld [vmem:[#allocation4 + $0x22] sm:$0x1]  ;;  %v1680_v21 = vld [vmem:[#allocation4 + $0x23] sm:$0x1]  ;;  %1980 = vmatpush.msrb.mxu2 %v1813_v18 }
 0x3f3   :  { %1600 = vst [vmem:[#allocation4 + $0x28] sm:$0xff] %v1584_v41  ;;  %v1687_v63 = vmax.f32 %v1685_v13, %v1686_v52  ;;  %v1688_v51 = vld [vmem:[#allocation4 + $0x26] sm:$0x1]  ;;  %v1705_v38 = vld [vmem:[#allocation4 + $0x27] sm:$0x1]  ;;  %v1843_v24 = vld [vmem:[%s5039_s3 + $0x250] sm:$0xff]  ;;  %2000 = vmatpush.msra.mxu3 %v1845_v15 }
 0x3f4   :  { %v1661_v42 = vmax.f32 %v1659_v16, %v1660_v14  ;;  %v1679_v1 = vmax.f32 %v1677_v56, %v1678_v28  ;;  %1981 = vmatpush.msrb.mxu2 %v1811_v32  ;;  %v1505_v14 = vadd.f32 %v1504_v5, %v4159_v34  ;;  %v1777_v13 = vld [vmem:[%s5039_s3 + $0x40] sm:$0xff]  ;;  %v1775_v34 = vld [vmem:[%s5039_s3 + $0x30] sm:$0xff]  ;;  %v1548_v43 = vpop.f32.mrf.mxu2  ;;  %v1800_v32 = vld [vmem:[%s5039_s3 + $0xf8] sm:$0xff] }
 0x3f5   :  { %v1689_v59 = vmax.f32 %v1687_v63, %v1688_v51  ;;  %2001 = vmatpush.msra.mxu3 %v1843_v24  ;;  %v1809_v52 = vld [vmem:[%s5039_s3 + $0x140] sm:$0xff]  ;;  %1962 = vmatpush.msra.mxu1 %v1777_v13  ;;  %v1891_v5 = vld [vmem:[%s5039_s3 + $0x3d0] sm:$0xff] }
 0x3f6   :  { %v1662_v50 = vadd.f32 %v1661_v42, %v4164_v40  ;;  %v1681_v61 = vmax.f32 %v1679_v1, %v1680_v21  ;;  %1982 = vmatpush.msrb.mxu2 %v1809_v52  ;;  %v1807_v21 = vld [vmem:[%s5039_s3 + $0x130] sm:$0xff]  ;;  %v1549_v46 = vadd.f32 %v1548_v43, %v1505_v14  ;;  %v1773_v58 = vld [vmem:[%s5039_s3 + $0x20] sm:$0xff]  ;;  %v1792_v43 = vld [vmem:[%s5039_s3 + $0xb8] sm:$0xff] }
 0x3f7   :  { %v1586_v36 = vpop.f32.mrf.mxu3  ;;  %2002 = vmatpush.msra.mxu3 %v1841_v8  ;;  %1963 = vmatpush.msra.mxu1 %v1775_v34  ;;  %v1837_v54 = vld [vmem:[%s5039_s3 + $0x220] sm:$0xff]  ;;  %v1794_v8 = vld [vmem:[%s5039_s3 + $0xc8] sm:$0xff] }
 0x3f8   :  { %v1663_v3 = vmax.f32 %v1662_v50, 0.0  ;;  %v1682_v55 = vadd.f32 %v1681_v61, %v4164_v40  ;;  %v1587_v2 = vadd.f32 %v1586_v36, %v1543_v10  ;;  %1983 = vmatpush.msrb.mxu2 %v1807_v21  ;;  %v1805_v36 = vld [vmem:[%s5039_s3 + $0x120] sm:$0xff]  ;;  %v1887_v21 = vld [vmem:[%s5039_s3 + $0x3b0] sm:$0xff] }
 0x3f9   :  { %2003 = vmatpush.msra.mxu3 %v1839_v7  ;;  %1964 = vmatpush.msra.mxu1 %v1773_v58  ;;  %v1801_v18 = vld [vmem:[%s5039_s3 + $0x100] sm:$0xff]  ;;  %v1883_v58 = vld [vmem:[%s5039_s3 + $0x390] sm:$0xff] }
 0x3fa   :  { %1664 = vst [vmem:[#allocation5 + $0x4] sm:$0x1] %v1663_v3  ;;  %v1683_v0 = vmax.f32 %v1682_v55, 0.0  ;;  %v1690_v37 = vld [vmem:[#allocation4 + $0x2a] sm:$0x1]  ;;  %1984 = vmatpush.msrb.mxu2 %v1805_v36  ;;  %v1833_v23 = vld [vmem:[%s5039_s3 + $0x200] sm:$0xff] }
 0x3fb   :  { %v1691_v60 = vmax.f32 %v1689_v59, %v1690_v37  ;;  %v1706_v35 = vld [vmem:[#allocation4 + $0x28] sm:$0x1]  ;;  %v1708_v25 = vld [vmem:[#allocation4 + $0x29] sm:$0x1]  ;;  %1601 = vst [vmem:[#allocation4 + $0x30] sm:$0xff] %v1587_v2  ;;  %2004 = vmatpush.msra.mxu3 %v1837_v54  ;;  %v1769_v2 = vld [vmem:[%s5039_s3] sm:$0xff] }
 0x3fc   :  { %1684 = vst [vmem:[#allocation5 + $0x6] sm:$0x1] %v1683_v0  ;;  %v1707_v53 = vmax.f32 %v1705_v38, %v1706_v35  ;;  %v1692_v20 = vld [vmem:[#allocation4 + $0x2b] sm:$0x1]  ;;  %v1710_v41 = vld [vmem:[#allocation4 + $0x2d] sm:$0x1]  ;;  %1985 = vmatpush.msrb.mxu2 %v1803_v45 }
 0x3fd   :  { %v1693_v30 = vmax.f32 %v1691_v60, %v1692_v20  ;;  %v1694_v27 = vld [vmem:[#allocation4 + $0x2c] sm:$0x1]  ;;  %v1712_v48 = vld [vmem:[#allocation4 + $0x2e] sm:$0x1]  ;;  %v1714_v16 = vld [vmem:[#allocation4 + $0x2f] sm:$0x1] }
 0x3fe   :  { %v1709_v22 = vmax.f32 %v1707_v53, %v1708_v25  ;;  %v1771_v3 = vld [vmem:[%s5039_s3 + $0x10] sm:$0xff]  ;;  %1986 = vmatpush.msrb.mxu2 %v1801_v18  ;;  %v1893_v24 = vld [vmem:[%s5039_s3 + $0x3e0] sm:$0xff]  ;;  %v1788_v54 = vld [vmem:[%s5039_s3 + $0x98] sm:$0xff] }
 0x3ff   :  { %v1589_v31 = vpop.f32.mrf.mxu3  ;;  %v1695_v28 = vmax.f32 %v1693_v30, %v1694_v27  ;;  %v1835_v59 = vld [vmem:[%s5039_s3 + $0x210] sm:$0xff]  ;;  %1965 = vmatpush.msra.mxu1 %v1771_v3  ;;  %v1925_v30 = vld [vmem:[%s5039_s3 + $0x4e0] sm:$0xff]  ;;  %v1780_v18 = vld [vmem:[%s5039_s3 + $0x58] sm:$0xff] }
 0x400   :  { %v1711_v12 = vmax.f32 %v1709_v22, %v1710_v41  ;;  %v1590_v33 = vadd.f32 %v1589_v31, %v1546_v44  ;;  %2005 = vmatpush.msra.mxu3 %v1835_v59  ;;  %v1895_v20 = vld [vmem:[%s5039_s3 + $0x3f0] sm:$0xff]  ;;  %v1921_v52 = vld [vmem:[%s5039_s3 + $0x4c0] sm:$0xff]  ;;  %v1786_v59 = vld [vmem:[%s5039_s3 + $0x88] sm:$0xff] }
 0x401   :  { %1966 = vmatpush.msra.mxu1 %v1769_v2  ;;  %v1927_v22 = vld [vmem:[%s5039_s3 + $0x4f0] sm:$0xff]  ;;  %v1913_v45 = vld [vmem:[%s5039_s3 + $0x480] sm:$0xff] }
 0x402   :  { %v1713_v56 = vmax.f32 %v1711_v12, %v1712_v48  ;;  %1602 = vst [vmem:[#allocation4 + $0x38] sm:$0xff] %v1590_v33  ;;  %v1696_v1 = vld [vmem:[#allocation4 + $0x30] sm:$0x1]  ;;  %v1698_v9 = vld [vmem:[#allocation4 + $0x31] sm:$0x1]  ;;  %2006 = vmatpush.msra.mxu3 %v1833_v23  ;;  %2031 = vmatpush.msra.mxu2 %v1927_v22  ;;  %v1798_v33 = vld [vmem:[%s5039_s3 + $0xe8] sm:$0xff] }
 0x403   :  { %v1697_v62 = vmax.f32 %v1695_v28, %v1696_v1  ;;  %v1716_v63 = vld [vmem:[#allocation4 + $0x33] sm:$0x1]  ;;  %v1718_v57 = vld [vmem:[#allocation4 + $0x34] sm:$0x1]  ;;  %v1700_v29 = vld [vmem:[#allocation4 + $0x32] sm:$0x1]  ;;  %2011 = vmatpush.msrb.mxu1 %v1895_v20 }
 0x404   :  { %v1715_v42 = vmax.f32 %v1713_v56, %v1714_v16  ;;  %v1725_v50 = vld [vmem:[#allocation4 + $0x36] sm:$0x1]  ;;  %v1726_v61 = vld [vmem:[#allocation4 + $0x37] sm:$0x1]  ;;  %v1720_v11 = vld [vmem:[#allocation4 + $0x35] sm:$0x1]  ;;  %2051 = vmatpush.msrb.mxu3 %v1800_v32  ;;  %2032 = vmatpush.msra.mxu2 %v1925_v30 }
 0x405   :  { %v1699_v26 = vmax.f32 %v1697_v62, %v1698_v9  ;;  %v1727_v51 = vmax.f32 %v1725_v50, %v1726_v61  ;;  %2012 = vmatpush.msrb.mxu1 %v1893_v24  ;;  %v1923_v48 = vld [vmem:[%s5039_s3 + $0x4d0] sm:$0xff]  ;;  %v1796_v16 = vld [vmem:[%s5039_s3 + $0xd8] sm:$0xff]  ;;  %v1889_v56 = vld [vmem:[%s5039_s3 + $0x3c0] sm:$0xff] }
 0x406   :  { %v1717_v19 = vmax.f32 %v1715_v42, %v1716_v63  ;;  %2052 = vmatpush.msrb.mxu3 %v1798_v33  ;;  %2033 = vmatpush.msra.mxu2 %v1923_v48  ;;  %v1919_v1 = vld [vmem:[%s5039_s3 + $0x4b0] sm:$0xff]  ;;  %v1885_v63 = vld [vmem:[%s5039_s3 + $0x3a0] sm:$0xff]  ;;  %v1790_v50 = vld [vmem:[%s5039_s3 + $0xa8] sm:$0xff] }
 0x407   :  { %v1592_v10 = vpop.f32.mrf.mxu3  ;;  %v1701_v17 = vmax.f32 %v1699_v26, %v1700_v29  ;;  %2013 = vmatpush.msrb.mxu1 %v1891_v5  ;;  %v1915_v36 = vld [vmem:[%s5039_s3 + $0x490] sm:$0xff]  ;;  %v1778_v23 = vld [vmem:[%s5039_s3 + $0x48] sm:$0xff]  ;;  %v1765_v32 = vld [vmem:[%s5037_s1] sm:$0x3] }
 0x408   :  { %v1719_v55 = vmax.f32 %v1717_v19, %v1718_v57  ;;  %v1593_v47 = vadd.f32 %v1592_v10, %v1549_v46  ;;  %2053 = vmatpush.msrb.mxu3 %v1796_v16  ;;  %2034 = vmatpush.msra.mxu2 %v1921_v52  ;;  %v1917_v19 = vld [vmem:[%s5039_s3 + $0x4a0] sm:$0xff]  ;;  %v1871_v20 = vld [vmem:[%s5039_s3 + $0x330] sm:$0xff]  ;;  %1766 = vst [vmem:[#allocation5 + $0x8] sm:$0x3] %v1765_v32  ;;  %v1772_v33 = vld [vmem:[%s5039_s3 + $0x18] sm:$0xff] }
 0x409   :  { %v1728_v49 = vld [vmem:[#allocation4 + $0x38] sm:$0x1]  ;;  %v1730_v4 = vld [vmem:[#allocation4 + $0x3c] sm:$0x1]  ;;  %v1745_v6 = vld [vmem:[#allocation4 + $0x39] sm:$0x1]  ;;  %v1702_v60 = vadd.f32 %v1701_v17, %v4164_v40  ;;  %2014 = vmatpush.msrb.mxu1 %v1889_v56 }
 0x40a   :  { %v1721_v0 = vmax.f32 %v1719_v55, %v1720_v11  ;;  %v1729_v37 = vmax.f32 %v1727_v51, %v1728_v49  ;;  %v1746_v38 = vld [vmem:[#allocation4 + $0x3a] sm:$0x1]  ;;  %v1732_v35 = vld [vmem:[#allocation4 + $0x3d] sm:$0x1]  ;;  %v1748_v53 = vld [vmem:[#allocation4 + $0x3b] sm:$0x1]  ;;  %2054 = vmatpush.msrb.mxu3 %v1794_v8  ;;  %2035 = vmatpush.msra.mxu2 %v1919_v1 }
 0x40b   :  { %v1747_v39 = vmax.f32 %v1745_v6, %v1746_v38  ;;  %1603 = vst [vmem:[#allocation4 + $0x40] sm:$0xff] %v1593_v47  ;;  %v1703_v44 = vmax.f32 %v1702_v60, 0.0  ;;  %v1734_v27 = vld [vmem:[#allocation4 + $0x3e] sm:$0x1]  ;;  %v1750_v13 = vld [vmem:[#allocation4 + $0x3f] sm:$0x1]  ;;  %2015 = vmatpush.msrb.mxu1 %v1887_v21 }
 0x40c   :  { %v1722_v15 = vadd.f32 %v1721_v0, %v4164_v40  ;;  %v1731_v25 = vmax.f32 %v1729_v37, %v1730_v4  ;;  %2055 = vmatpush.msrb.mxu3 %v1792_v43  ;;  %2036 = vmatpush.msra.mxu2 %v1917_v19  ;;  %v1881_v55 = vld [vmem:[%s5039_s3 + $0x380] sm:$0xff]  ;;  %v1879_v17 = vld [vmem:[%s5039_s3 + $0x370] sm:$0xff]  ;;  %v1784_v37 = vld [vmem:[%s5039_s3 + $0x78] sm:$0xff] }
 0x40d   :  { %v1749_v12 = vmax.f32 %v1747_v39, %v1748_v53  ;;  %1704 = vst [vmem:[#allocation5 + $0x1] sm:$0x1] %v1703_v44  ;;  %2016 = vmatpush.msrb.mxu1 %v1885_v63  ;;  %v1911_v0 = vld [vmem:[%s5039_s3 + $0x470] sm:$0xff]  ;;  %v1877_v6 = vld [vmem:[%s5039_s3 + $0x360] sm:$0xff]  ;;  %v1782_v60 = vld [vmem:[%s5039_s3 + $0x68] sm:$0xff] }
 0x40e   :  { %v1723_v41 = vmax.f32 %v1722_v15, 0.0  ;;  %v1733_v31 = vmax.f32 %v1731_v25, %v1732_v35  ;;  %2056 = vmatpush.msrb.mxu3 %v1790_v50  ;;  %2037 = vmatpush.msra.mxu2 %v1915_v36  ;;  %v1909_v38 = vld [vmem:[%s5039_s3 + $0x460] sm:$0xff]  ;;  %v1875_v39 = vld [vmem:[%s5039_s3 + $0x350] sm:$0xff]  ;;  %v1776_v44 = vld [vmem:[%s5039_s3 + $0x38] sm:$0xff] }
 0x40f   :  { %v1751_v28 = vmax.f32 %v1749_v12, %v1750_v13  ;;  %2017 = vmatpush.msrb.mxu1 %v1883_v58  ;;  %v1907_v53 = vld [vmem:[%s5039_s3 + $0x450] sm:$0xff]  ;;  %v1905_v25 = vld [vmem:[%s5039_s3 + $0x440] sm:$0xff]  ;;  %v1770_v48 = vld [vmem:[%s5039_s3 + $0x8] sm:$0xff] }
 0x410   :  { %1724 = vst [vmem:[#allocation5 + $0x3] sm:$0x1] %v1723_v41  ;;  %v1735_v14 = vmax.f32 %v1733_v31, %v1734_v27  ;;  %2057 = vmatpush.msrb.mxu3 %v1788_v54  ;;  %2038 = vmatpush.msra.mxu2 %v1913_v45  ;;  %v1903_v22 = vld [vmem:[%s5039_s3 + $0x430] sm:$0xff]  ;;  %v1869_v24 = vld [vmem:[%s5039_s3 + $0x320] sm:$0xff]  ;;  %v1774_v41 = vld [vmem:[%s5039_s3 + $0x28] sm:$0xff] }
 0x411   :  { %2018 = vmatpush.msrb.mxu1 %v1881_v55  ;;  %v1901_v30 = vld [vmem:[%s5039_s3 + $0x420] sm:$0xff]  ;;  %v1867_v31 = vld [vmem:[%s5039_s3 + $0x310] sm:$0xff]  ;;  %v1832_v56 = vld [vmem:[%s5039_s3 + $0x1f8] sm:$0xff] }
 0x412   :  { %v1736_v34 = vld [vmem:[#allocation4 + $0x42] sm:$0x1]  ;;  %v1752_v42 = vld [vmem:[#allocation4 + $0x40] sm:$0x1]  ;;  %v1738_v62 = vld [vmem:[#allocation4 + $0x43] sm:$0x1]  ;;  %2058 = vmatpush.msrb.mxu3 %v1786_v59  ;;  %2039 = vmatpush.msra.mxu2 %v1911_v0 }
 0x413   :  { %v1737_v7 = vmax.f32 %v1735_v14, %v1736_v34  ;;  %v1753_v9 = vmax.f32 %v1751_v28, %v1752_v42  ;;  %v1754_v29 = vld [vmem:[#allocation4 + $0x41] sm:$0x1]  ;;  %v1740_v61 = vld [vmem:[#allocation4 + $0x44] sm:$0x1]  ;;  %v1756_v10 = vld [vmem:[#allocation4 + $0x45] sm:$0x1]  ;;  %2019 = vmatpush.msrb.mxu1 %v1879_v17 }
 0x414   :  { %v1758_v47 = vld [vmem:[#allocation4 + $0x46] sm:$0x1]  ;;  %v1760_v49 = vld [vmem:[#allocation4 + $0x47] sm:$0x1]  ;;  %2059 = vmatpush.msrb.mxu3 %v1784_v37  ;;  %2040 = vmatpush.msra.mxu2 %v1909_v38  ;;  %v1899_v12 = vld [vmem:[%s5039_s3 + $0x410] sm:$0xff] }
 0x415   :  { %v1739_v57 = vmax.f32 %v1737_v7, %v1738_v62  ;;  %v1755_v46 = vmax.f32 %v1753_v9, %v1754_v29  ;;  %2020 = vmatpush.msrb.mxu1 %v1877_v6  ;;  %v1865_v5 = vld [vmem:[%s5039_s3 + $0x300] sm:$0xff]  ;;  %v1768_v14 = vld [vmem:[#allocation5 + $0x8] sm:$0x3]  ;;  %v1830_v21 = vld [vmem:[%s5039_s3 + $0x1e8] sm:$0xff] }
 0x416   :  { %2060 = vmatpush.msrb.mxu3 %v1782_v60  ;;  %2041 = vmatpush.msra.mxu2 %v1907_v53  ;;  %v1897_v27 = vld [vmem:[%s5039_s3 + $0x400] sm:$0xff]  ;;  %1940 = vst [vmem:[#allocation1 + $0x20] ss:$4 sm:$0xff] %v1768_v14  ;;  %v1864_v13 = vld [vmem:[%s5039_s3 + $0x2f8] sm:$0xff]  ;;  %v1862_v7 = vld [vmem:[%s5039_s3 + $0x2e8] sm:$0xff] }
 0x417   :  { %v1741_v26 = vmax.f32 %v1739_v57, %v1740_v61  ;;  %v1757_v3 = vmax.f32 %v1755_v46, %v1756_v10  ;;  %2021 = vmatpush.msrb.mxu1 %v1875_v39  ;;  %v1896_v52 = vld [vmem:[%s5039_s3 + $0x3f8] sm:$0xff]  ;;  %v1894_v42 = vld [vmem:[%s5039_s3 + $0x3e8] sm:$0xff] }
 0x418   :  { %2061 = vmatpush.msrb.mxu3 %v1780_v18  ;;  %2042 = vmatpush.msra.mxu2 %v1905_v25  ;;  %v1828_v1 = vld [vmem:[%s5039_s3 + $0x1d8] sm:$0xff]  ;;  %v1826_v9 = vld [vmem:[%s5039_s3 + $0x1c8] sm:$0xff] }
 0x419   :  { %v1742_v51 = vadd.f32 %v1741_v26, %v4164_v40  ;;  %v1759_v2 = vmax.f32 %v1757_v3, %v1758_v47  ;;  %v1860_v43 = vld [vmem:[%s5039_s3 + $0x2d8] sm:$0xff]  ;;  %v1858_v63 = vld [vmem:[%s5039_s3 + $0x2c8] sm:$0xff] }
 0x41a   :  { %2062 = vmatpush.msrb.mxu3 %v1778_v23  ;;  %2043 = vmatpush.msra.mxu2 %v1903_v22  ;;  %v1892_v62 = vld [vmem:[%s5039_s3 + $0x3d8] sm:$0xff]  ;;  %v1890_v57 = vld [vmem:[%s5039_s3 + $0x3c8] sm:$0xff] }
 0x41b   :  { %v1743_v11 = vmax.f32 %v1742_v51, 0.0  ;;  %v1761_v4 = vmax.f32 %v1759_v2, %v1760_v49  ;;  %v1824_v19 = vld [vmem:[%s5039_s3 + $0x1b8] sm:$0xff]  ;;  %v1822_v58 = vld [vmem:[%s5039_s3 + $0x1a8] sm:$0xff] }
 0x41c   :  { %2063 = vmatpush.msrb.mxu3 %v1776_v44  ;;  %2044 = vmatpush.msra.mxu2 %v1901_v30  ;;  %v1856_v61 = vld [vmem:[%s5039_s3 + $0x2b8] sm:$0xff]  ;;  %v1854_v26 = vld [vmem:[%s5039_s3 + $0x2a8] sm:$0xff] }
 0x41d   :  { %1744 = vst [vmem:[#allocation5 + $0x5] sm:$0x1] %v1743_v11  ;;  %v1762_v35 = vadd.f32 %v1761_v4, %v4164_v40  ;;  %v1873_v40 = vld [vmem:[%s5039_s3 + $0x340] sm:$0xff]  ;;  %v1888_v46 = vld [vmem:[%s5039_s3 + $0x3b8] sm:$0xff]  ;;  %v1886_v10 = vld [vmem:[%s5039_s3 + $0x3a8] sm:$0xff] }
 0x41e   :  { %2022 = vmatpush.msrb.mxu1 %v1873_v40  ;;  %2064 = vmatpush.msrb.mxu3 %v1774_v41  ;;  %v4512_v29 = vld.sshfl [vmem:[#allocation1 + $0x20] sm:$0xff pattern:$0x73625140]  ;;  %v1820_v36 = vld [vmem:[%s5039_s3 + $0x198] sm:$0xff]  ;;  %v1818_v55 = vld [vmem:[%s5039_s3 + $0x188] sm:$0xff] }
 0x41f   :  { %v1763_v15 = vmax.f32 %v1762_v35, 0.0  ;;  %2045 = vmatpush.msra.mxu2 %v1899_v12  ;;  %v1852_v54 = vld [vmem:[%s5039_s3 + $0x298] sm:$0xff]  ;;  %v1850_v51 = vld [vmem:[%s5039_s3 + $0x288] sm:$0xff] }
 0x420   :  { %2023 = vmatpush.msrb.mxu1 %v1871_v20  ;;  %2065 = vmatpush.msrb.mxu3 %v1772_v33  ;;  %v1884_v3 = vld [vmem:[%s5039_s3 + $0x398] sm:$0xff]  ;;  %v1882_v47 = vld [vmem:[%s5039_s3 + $0x388] sm:$0xff] }
 0x421   :  { %1764 = vst [vmem:[#allocation5 + $0x7] sm:$0x1] %v1763_v15  ;;  %2046 = vmatpush.msra.mxu2 %v1897_v27  ;;  %v1816_v45 = vld [vmem:[%s5039_s3 + $0x178] sm:$0xff]  ;;  %v1814_v17 = vld [vmem:[%s5039_s3 + $0x168] sm:$0xff]  ;;  %v2163_v27 = vld [vmem:[%s5038_s2 + $0x570] sm:$0xff] }
 0x422   :  { %2024 = vmatpush.msrb.mxu1 %v1869_v24  ;;  %2066 = vmatpush.msrb.mxu3 %v1770_v48  ;;  %v1848_v59 = vld [vmem:[%s5039_s3 + $0x278] sm:$0xff]  ;;  %v1846_v11 = vld [vmem:[%s5039_s3 + $0x268] sm:$0xff] }
 0x423   :  { %v1880_v2 = vld [vmem:[%s5039_s3 + $0x378] sm:$0xff]  ;;  %v1878_v49 = vld [vmem:[%s5039_s3 + $0x368] sm:$0xff] }
 0x424   :  { %2025 = vmatpush.msrb.mxu1 %v1867_v31  ;;  %v1812_v0 = vld [vmem:[%s5039_s3 + $0x158] sm:$0xff]  ;;  %v1810_v6 = vld [vmem:[%s5039_s3 + $0x148] sm:$0xff]  ;;  %v2165_v31 = vld [vmem:[%s5038_s2 + $0x580] sm:$0xff] }
 0x425   :  { %v1844_v37 = vld [vmem:[%s5039_s3 + $0x258] sm:$0xff]  ;;  %v1842_v38 = vld [vmem:[%s5039_s3 + $0x248] sm:$0xff] }
 0x426   :  { %2026 = vmatpush.msrb.mxu1 %v1865_v5  ;;  %v1876_v4 = vld [vmem:[%s5039_s3 + $0x358] sm:$0xff]  ;;  %v1874_v60 = vld [vmem:[%s5039_s3 + $0x348] sm:$0xff] }
 0x427   :  { %v1808_v35 = vld [vmem:[%s5039_s3 + $0x138] sm:$0xff]  ;;  %v1806_v18 = vld [vmem:[%s5039_s3 + $0x128] sm:$0xff] }
 0x428   :  { %v1767_v16 = vld [vmem:[#allocation5] sm:$0xff]  ;;  %v1840_v39 = vld [vmem:[%s5039_s3 + $0x238] sm:$0xff]  ;;  %v1838_v15 = vld [vmem:[%s5039_s3 + $0x228] sm:$0xff] }
 0x429   :  { %1938 = vst [vmem:[#allocation1] ss:$4 sm:$0xff] %v1767_v16  ;;  %v1872_v53 = vld [vmem:[%s5039_s3 + $0x338] sm:$0xff]  ;;  %v1870_v40 = vld [vmem:[%s5039_s3 + $0x328] sm:$0xff] }
 0x42a   :  { %v1804_v25 = vld [vmem:[%s5039_s3 + $0x118] sm:$0xff]  ;;  %v1802_v22 = vld [vmem:[%s5039_s3 + $0x108] sm:$0xff] }
 0x42b   :  { %v1836_v23 = vld [vmem:[%s5039_s3 + $0x218] sm:$0xff]  ;;  %v1834_v44 = vld [vmem:[%s5039_s3 + $0x208] sm:$0xff] }
 0x42c   :  { %v1868_v20 = vld [vmem:[%s5039_s3 + $0x318] sm:$0xff]  ;;  %v1866_v32 = vld [vmem:[%s5039_s3 + $0x308] sm:$0xff] }
 0x42d   :  { %v1928_v24 = vld [vmem:[%s5039_s3 + $0x4f8] sm:$0xff]  ;;  %v1926_v30 = vld [vmem:[%s5039_s3 + $0x4e8] sm:$0xff] }
 0x42e   :  { %v4637_v41 = vld [vmem:[%s5038_s2 + $0x588] sm:$0xff]  ;;  %v1924_v12 = vld [vmem:[%s5039_s3 + $0x4d8] sm:$0xff] }
 0x42f   :  { %v2164_v33 = vld [vmem:[%s5038_s2 + $0x578] sm:$0xff]  ;;  %v1922_v5 = vld [vmem:[%s5039_s3 + $0x4c8] sm:$0xff] }
 0x430   :  { %v1941_v8 = vld.sshfl [vmem:[#allocation1] sm:$0xff pattern:$0x73625140]  ;;  %v4479_v28 = vld.sshfl [vmem:[#allocation1 + $0x8] sm:$0xff pattern:$0x73625140] }
 0x431   :  { %1967 = vmatmul.f32.vlgmr.msra.gmra.mxu1 %v1941_v8  ;;  %1987 = vmatmul.f32.vlgmr.msrb.gmra.mxu2 %v4479_v28  ;;  %v4482_v34 = vld.sshfl [vmem:[#allocation1 + $0x10] sm:$0xff pattern:$0x73625140]  ;;  %v4517_v50 = vld.sshfl [vmem:[#allocation1 + $0x18] sm:$0xff pattern:$0x73625140] }
 0x432   :  { %2007 = vmatmul.f32.vlgmr.msra.gmra.mxu3 %v4482_v34  ;;  %2071 = vmatpush.msra.mxu1 %v1832_v56  ;;  %v1920_v48 = vld [vmem:[%s5039_s3 + $0x4b8] sm:$0xff]  ;;  %v2162_v16 = vld [vmem:[%s5038_s2 + $0x568] sm:$0xff]  ;;  %v2161_v56 = vld [vmem:[%s5038_s2 + $0x560] sm:$0xff] }
 0x433   :  { %2091 = vmatpush.msrb.mxu2 %v1864_v13  ;;  %2111 = vmatpush.msra.mxu3 %v1896_v52  ;;  %v1918_v14 = vld [vmem:[%s5039_s3 + $0x4a8] sm:$0xff]  ;;  %v1916_v13 = vld [vmem:[%s5039_s3 + $0x498] sm:$0xff] }
 0x434   :  { %2072 = vmatpush.msra.mxu1 %v1830_v21  ;;  %v2160_v52 = vld [vmem:[%s5038_s2 + $0x558] sm:$0xff] }
 0x435   :  { %2092 = vmatpush.msrb.mxu2 %v1862_v7  ;;  %2112 = vmatpush.msra.mxu3 %v1894_v42  ;;  %v1908_v21 = vld [vmem:[%s5039_s3 + $0x458] sm:$0xff]  ;;  %v1906_v7 = vld [vmem:[%s5039_s3 + $0x448] sm:$0xff] }
 0x436   :  { %2073 = vmatpush.msra.mxu1 %v1828_v1  ;;  %v1904_v42 = vld [vmem:[%s5039_s3 + $0x438] sm:$0xff]  ;;  %v1902_v1 = vld [vmem:[%s5039_s3 + $0x428] sm:$0xff] }
 0x437   :  { %2093 = vmatpush.msrb.mxu2 %v1860_v43  ;;  %2113 = vmatpush.msra.mxu3 %v1892_v62  ;;  %v1900_v43 = vld [vmem:[%s5039_s3 + $0x418] sm:$0xff]  ;;  %v1898_v62 = vld [vmem:[%s5039_s3 + $0x408] sm:$0xff] }
 0x438   :  { %2074 = vmatpush.msra.mxu1 %v1826_v9  ;;  %v2159_v9 = vld [vmem:[%s5038_s2 + $0x550] sm:$0xff] }
 0x439   :  { %2094 = vmatpush.msrb.mxu2 %v1858_v63  ;;  %2114 = vmatpush.msra.mxu3 %v1890_v57  ;;  %v2158_v63 = vld [vmem:[%s5038_s2 + $0x548] sm:$0xff]  ;;  %v2157_v57 = vld [vmem:[%s5038_s2 + $0x540] sm:$0xff] }
 0x43a   :  { %2027 = vmatmul.f32.vlgmr.msrb.gmra.mxu1 %v4517_v50  ;;  %2047 = vmatmul.f32.vlgmr.msra.gmra.mxu2 %v4512_v29 }
 0x43b   :  { %2067 = vmatmul.f32.vlgmr.msrb.gmra.mxu3 %v1941_v8  ;;  %2075 = vmatpush.msra.mxu1 %v1824_v19  ;;  %v1914_v8 = vld [vmem:[%s5039_s3 + $0x488] sm:$0xff]  ;;  %v2156_v19 = vld [vmem:[%s5038_s2 + $0x538] sm:$0xff] }
 0x43c   :  { %2095 = vmatpush.msrb.mxu2 %v1856_v61  ;;  %2115 = vmatpush.msra.mxu3 %v1888_v46  ;;  %v2153_v61 = vld [vmem:[%s5038_s2 + $0x520] sm:$0xff]  ;;  %v2152_v46 = vld [vmem:[%s5038_s2 + $0x518] sm:$0xff] }
 0x43d   :  { %2076 = vmatpush.msra.mxu1 %v1822_v58  ;;  %v2151_v58 = vld [vmem:[%s5038_s2 + $0x510] sm:$0xff] }
 0x43e   :  { %2096 = vmatpush.msrb.mxu2 %v1854_v26  ;;  %2116 = vmatpush.msra.mxu3 %v1886_v10  ;;  %v2477_v26 = vld [vmem:[%s5039_s3 + $0x500] ss:$8 sm:$0x3] }
 0x43f   :  { %2077 = vmatpush.msra.mxu1 %v1820_v36  ;;  %v1932_v10 = vperm.slane %v2477_v26, 0 }
 0x440   :  { %2097 = vmatpush.msrb.mxu2 %v1852_v54  ;;  %2117 = vmatpush.msra.mxu3 %v1884_v3 }
 0x441   :  { %2078 = vmatpush.msra.mxu1 %v1818_v55 }
 0x442   :  { %2098 = vmatpush.msrb.mxu2 %v1850_v51  ;;  %2118 = vmatpush.msra.mxu3 %v1882_v47 }
 0x443   :  { %2079 = vmatpush.msra.mxu1 %v1816_v45  ;;  %v4736_v45 = vld [vmem:[%s5038_s2 + $0x5d0] sm:$0xff] }
 0x444   :  { %2099 = vmatpush.msrb.mxu2 %v1848_v59  ;;  %2119 = vmatpush.msra.mxu3 %v1880_v2  ;;  %v4741_v59 = vld [vmem:[%s5038_s2 + $0x5c8] sm:$0xff] }
 0x445   :  { %2080 = vmatpush.msra.mxu1 %v1814_v17  ;;  %v4747_v17 = vld [vmem:[%s5038_s2 + $0x5c0] sm:$0xff] }
 0x446   :  { %2100 = vmatpush.msrb.mxu2 %v1846_v11  ;;  %2120 = vmatpush.msra.mxu3 %v1878_v49 }
 0x447   :  { %2081 = vmatpush.msra.mxu1 %v1812_v0  ;;  %v4753_v0 = vld [vmem:[%s5038_s2 + $0x5b8] sm:$0xff] }
 0x448   :  { %2101 = vmatpush.msrb.mxu2 %v1844_v37  ;;  %2121 = vmatpush.msra.mxu3 %v1876_v4  ;;  %v4761_v4 = vld [vmem:[%s5038_s2 + $0x5b0] sm:$0xff] }
 0x449   :  { %2082 = vmatpush.msra.mxu1 %v1810_v6  ;;  %v4768_v6 = vld [vmem:[%s5038_s2 + $0x5a8] sm:$0xff] }
 0x44a   :  { %2102 = vmatpush.msrb.mxu2 %v1842_v38  ;;  %2122 = vmatpush.msra.mxu3 %v1874_v60  ;;  %v4774_v38 = vld [vmem:[%s5038_s2 + $0x5a0] sm:$0xff]  ;;  %v4781_v60 = vld [vmem:[%s5038_s2 + $0x598] sm:$0xff] }
 0x44b   :  { %2083 = vmatpush.msra.mxu1 %v1808_v35  ;;  %v4786_v35 = vld [vmem:[%s5038_s2 + $0x590] sm:$0xff] }
 0x44c   :  { %2103 = vmatpush.msrb.mxu2 %v1840_v39  ;;  %2123 = vmatpush.msra.mxu3 %v1872_v53  ;;  %v1933_v39 = vperm.slane %v2477_v26, 1  ;;  %v2517_v26 = vld [vmem:[%s5038_s2 + $0x5d8] ss:$0 sm:$0xff] }
 0x44d   :  { %2084 = vmatpush.msra.mxu1 %v1806_v18 }
 0x44e   :  { %2104 = vmatpush.msrb.mxu2 %v1838_v15  ;;  %2124 = vmatpush.msra.mxu3 %v1870_v40 }
 0x44f   :  { %2085 = vmatpush.msra.mxu1 %v1804_v25 }
 0x450   :  { %2105 = vmatpush.msrb.mxu2 %v1836_v23  ;;  %2125 = vmatpush.msra.mxu3 %v1868_v20 }
 0x451   :  { %2086 = vmatpush.msra.mxu1 %v1802_v22 }
 0x452   :  { %2106 = vmatpush.msrb.mxu2 %v1834_v44  ;;  %2126 = vmatpush.msra.mxu3 %v1866_v32 }
 0x453   :  { %2087 = vmatmul.f32.vlgmr.msra.gmra.mxu1 %v4479_v28  ;;  %2107 = vmatmul.f32.vlgmr.msrb.gmra.mxu2 %v4482_v34  ;;  %v1912_v28 = vld [vmem:[%s5039_s3 + $0x478] sm:$0xff]  ;;  %v1910_v34 = vld [vmem:[%s5039_s3 + $0x468] sm:$0xff] }
 0x454   :  { %2127 = vmatmul.f32.vlgmr.msra.gmra.mxu3 %v4517_v50  ;;  %2131 = vmatpush.msrb.mxu1 %v1928_v24  ;;  %v2154_v50 = vld [vmem:[%s5038_s2 + $0x528] sm:$0xff]  ;;  %v4797_v24 = vld [vmem:[%s5039_s3 + $0x600] sm:$0xff] }
 0x455   :  { %2216 = vmatpush.msra.mxu2 %v4637_v41  ;;  %2243 = vmatpush.msrb.mxu3 %v4736_v45 }
 0x456   :  { %2132 = vmatpush.msrb.mxu1 %v1926_v30  ;;  %v2208_v30 = vld [vmem:[%s5039_s3 + $0x608] sm:$0xff] }
 0x457   :  { %2217 = vmatpush.msra.mxu2 %v2165_v31  ;;  %2244 = vmatpush.msrb.mxu3 %v4741_v59 }
 0x458   :  { %2133 = vmatpush.msrb.mxu1 %v1924_v12  ;;  %v4814_v12 = vld [vmem:[%s5039_s3 + $0x5e0] sm:$0xff] }
 0x459   :  { %2218 = vmatpush.msra.mxu2 %v2164_v33  ;;  %2245 = vmatpush.msrb.mxu3 %v4747_v17 }
 0x45a   :  { %2134 = vmatpush.msrb.mxu1 %v1922_v5  ;;  %v4823_v5 = vld [vmem:[%s5039_s3 + $0x5d0] sm:$0xff] }
 0x45b   :  { %2219 = vmatpush.msra.mxu2 %v2163_v27  ;;  %2246 = vmatpush.msrb.mxu3 %v4753_v0 }
 0x45c   :  { %2135 = vmatpush.msrb.mxu1 %v1920_v48  ;;  %v4832_v48 = vld [vmem:[%s5039_s3 + $0x5c0] sm:$0xff] }
 0x45d   :  { %2220 = vmatpush.msra.mxu2 %v2162_v16  ;;  %2247 = vmatpush.msrb.mxu3 %v4761_v4 }
 0x45e   :  { %2136 = vmatpush.msrb.mxu1 %v1918_v14  ;;  %v4841_v14 = vld [vmem:[%s5039_s3 + $0x5b0] sm:$0xff] }
 0x45f   :  { %2221 = vmatpush.msra.mxu2 %v2161_v56  ;;  %2248 = vmatpush.msrb.mxu3 %v4768_v6 }
 0x460   :  { %2137 = vmatpush.msrb.mxu1 %v1916_v13  ;;  %v4850_v13 = vld [vmem:[%s5039_s3 + $0x5a0] sm:$0xff] }
 0x461   :  { %2222 = vmatpush.msra.mxu2 %v2160_v52  ;;  %2249 = vmatpush.msrb.mxu3 %v4774_v38 }
 0x462   :  { %2138 = vmatpush.msrb.mxu1 %v1914_v8  ;;  %v4859_v8 = vld [vmem:[%s5039_s3 + $0x590] sm:$0xff] }
 0x463   :  { %2223 = vmatpush.msra.mxu2 %v2159_v9  ;;  %2250 = vmatpush.msrb.mxu3 %v4781_v60 }
 0x464   :  { %2139 = vmatpush.msrb.mxu1 %v1912_v28  ;;  %v2194_v28 = vld [vmem:[%s5039_s3 + $0x598] sm:$0xff] }
 0x465   :  { %2224 = vmatpush.msra.mxu2 %v2158_v63  ;;  %2251 = vmatpush.msrb.mxu3 %v4786_v35 }
 0x466   :  { %2140 = vmatpush.msrb.mxu1 %v1910_v34  ;;  %v2191_v34 = vld [vmem:[%s5039_s3 + $0x580] sm:$0xff] }
 0x467   :  { %2225 = vmatpush.msra.mxu2 %v2157_v57  ;;  %2262 = vmatpush.msra.mxu3 %v4797_v24 }
 0x468   :  { %2141 = vmatpush.msrb.mxu1 %v1908_v21  ;;  %v2192_v21 = vld [vmem:[%s5039_s3 + $0x588] sm:$0xff] }
 0x469   :  { %2226 = vmatpush.msra.mxu2 %v2156_v19 }
 0x46a   :  { %2142 = vmatpush.msrb.mxu1 %v1906_v7  ;;  %v2189_v7 = vld [vmem:[%s5039_s3 + $0x570] sm:$0xff] }
 0x46c   :  { %2143 = vmatpush.msrb.mxu1 %v1904_v42  ;;  %v2190_v42 = vld [vmem:[%s5039_s3 + $0x578] sm:$0xff] }
 0x46e   :  { %2144 = vmatpush.msrb.mxu1 %v1902_v1  ;;  %v2187_v1 = vld [vmem:[%s5039_s3 + $0x560] sm:$0xff] }
 0x470   :  { %2145 = vmatpush.msrb.mxu1 %v1900_v43  ;;  %v2188_v43 = vld [vmem:[%s5039_s3 + $0x568] sm:$0xff] }
 0x472   :  { %2146 = vmatpush.msrb.mxu1 %v1898_v62  ;;  %v2185_v62 = vld [vmem:[%s5039_s3 + $0x550] sm:$0xff] }
 0x473   :  { %2147 = vmatmul.f32.vlgmr.msrb.gmra.mxu1 %v4512_v29  ;;  %v2155_v29 = vld [vmem:[%s5038_s2 + $0x530] sm:$0xff] }
 0x474   :  { %2227 = vmatpush.msra.mxu2 %v2155_v29  ;;  %2282 = vmatpush.msra.mxu1 %v2208_v30 }
 0x476   :  { %2228 = vmatpush.msra.mxu2 %v2154_v50 }
 0x478   :  { %2229 = vmatpush.msra.mxu2 %v2153_v61 }
 0x47a   :  { %2230 = vmatpush.msra.mxu2 %v2152_v46 }
 0x47c   :  { %2231 = vmatpush.msra.mxu2 %v2151_v58 }
 0x47e   :  { %2307 = vmatpush.msrb.mxu2 %v4637_v41  ;;  %v4805_v41 = vld [vmem:[%s5039_s3 + $0x5f0] sm:$0xff] }
 0x47f   :  { %2263 = vmatpush.msra.mxu3 %v4805_v41 }
 0x480   :  { %2308 = vmatpush.msrb.mxu2 %v2165_v31  ;;  %v2206_v31 = vld [vmem:[%s5039_s3 + $0x5f8] sm:$0xff] }
 0x481   :  { %2283 = vmatpush.msra.mxu1 %v2206_v31  ;;  %2264 = vmatpush.msra.mxu3 %v4814_v12 }
 0x482   :  { %2309 = vmatpush.msrb.mxu2 %v2164_v33  ;;  %v2204_v33 = vld [vmem:[%s5039_s3 + $0x5e8] sm:$0xff] }
 0x483   :  { %2284 = vmatpush.msra.mxu1 %v2204_v33  ;;  %2265 = vmatpush.msra.mxu3 %v4823_v5 }
 0x484   :  { %2310 = vmatpush.msrb.mxu2 %v2163_v27  ;;  %v2202_v27 = vld [vmem:[%s5039_s3 + $0x5d8] sm:$0xff] }
 0x485   :  { %2285 = vmatpush.msra.mxu1 %v2202_v27  ;;  %2266 = vmatpush.msra.mxu3 %v4832_v48 }
 0x486   :  { %2311 = vmatpush.msrb.mxu2 %v2162_v16  ;;  %v2200_v16 = vld [vmem:[%s5039_s3 + $0x5c8] sm:$0xff] }
 0x487   :  { %2286 = vmatpush.msra.mxu1 %v2200_v16  ;;  %2267 = vmatpush.msra.mxu3 %v4841_v14 }
 0x488   :  { %2312 = vmatpush.msrb.mxu2 %v2161_v56  ;;  %v2198_v56 = vld [vmem:[%s5039_s3 + $0x5b8] sm:$0xff] }
 0x489   :  { %2287 = vmatpush.msra.mxu1 %v2198_v56  ;;  %2268 = vmatpush.msra.mxu3 %v4850_v13 }
 0x48a   :  { %2313 = vmatpush.msrb.mxu2 %v2160_v52  ;;  %v2196_v52 = vld [vmem:[%s5039_s3 + $0x5a8] sm:$0xff] }
 0x48b   :  { %2288 = vmatpush.msra.mxu1 %v2196_v52  ;;  %2269 = vmatpush.msra.mxu3 %v4859_v8 }
 0x48c   :  { %2314 = vmatpush.msrb.mxu2 %v2159_v9  ;;  %v2186_v9 = vld [vmem:[%s5039_s3 + $0x558] sm:$0xff] }
 0x48d   :  { %2289 = vmatpush.msra.mxu1 %v2194_v28  ;;  %2270 = vmatpush.msra.mxu3 %v2191_v34 }
 0x48e   :  { %2315 = vmatpush.msrb.mxu2 %v2158_v63  ;;  %v2183_v63 = vld [vmem:[%s5039_s3 + $0x540] sm:$0xff] }
 0x48f   :  { %2290 = vmatpush.msra.mxu1 %v2192_v21  ;;  %2271 = vmatpush.msra.mxu3 %v2189_v7 }
 0x490   :  { %2316 = vmatpush.msrb.mxu2 %v2157_v57  ;;  %v2184_v57 = vld [vmem:[%s5039_s3 + $0x548] sm:$0xff] }
 0x491   :  { %2291 = vmatpush.msra.mxu1 %v2190_v42  ;;  %2272 = vmatpush.msra.mxu3 %v2187_v1 }
 0x492   :  { %2317 = vmatpush.msrb.mxu2 %v2156_v19  ;;  %v2181_v19 = vld [vmem:[%s5039_s3 + $0x530] sm:$0xff] }
 0x493   :  { %2292 = vmatpush.msra.mxu1 %v2188_v43  ;;  %2273 = vmatpush.msra.mxu3 %v2185_v62 }
 0x494   :  { %2318 = vmatpush.msrb.mxu2 %v2155_v29  ;;  %v2182_v29 = vld [vmem:[%s5039_s3 + $0x538] sm:$0xff] }
 0x495   :  { %2293 = vmatpush.msra.mxu1 %v2186_v9  ;;  %2274 = vmatpush.msra.mxu3 %v2183_v63 }
 0x496   :  { %2319 = vmatpush.msrb.mxu2 %v2154_v50  ;;  %v2179_v50 = vld [vmem:[%s5039_s3 + $0x520] sm:$0xff] }
 0x497   :  { %2294 = vmatpush.msra.mxu1 %v2184_v57  ;;  %2275 = vmatpush.msra.mxu3 %v2181_v19 }
 0x498   :  { %2320 = vmatpush.msrb.mxu2 %v2153_v61  ;;  %v2180_v61 = vld [vmem:[%s5039_s3 + $0x528] sm:$0xff] }
 0x499   :  { %2295 = vmatpush.msra.mxu1 %v2182_v29  ;;  %2276 = vmatpush.msra.mxu3 %v2179_v50 }
 0x49a   :  { %2321 = vmatpush.msrb.mxu2 %v2152_v46  ;;  %v2177_v46 = vld [vmem:[%s5039_s3 + $0x510] sm:$0xff] }
 0x49b   :  { %2296 = vmatpush.msra.mxu1 %v2180_v61  ;;  %2277 = vmatpush.msra.mxu3 %v2177_v46 }
 0x49c   :  { %2322 = vmatpush.msrb.mxu2 %v2151_v58  ;;  %v2178_v58 = vld [vmem:[%s5039_s3 + $0x518] sm:$0xff] }
 0x49d   :  { %2297 = vmatpush.msra.mxu1 %v2178_v58 }
 0x49f   :  { %2348 = vmatpush.msrb.mxu1 %v4797_v24  ;;  %v2393_v24 = vld [vmem:[%s5038_s2 + $0x5f8] sm:$0xff] }
 0x4a1   :  { %2349 = vmatpush.msrb.mxu1 %v4805_v41 }
 0x4a3   :  { %2350 = vmatpush.msrb.mxu1 %v4814_v12 }
 0x4a5   :  { %2351 = vmatpush.msrb.mxu1 %v4823_v5  ;;  %v2392_v5 = vld [vmem:[%s5038_s2 + $0x5f0] sm:$0xff] }
 0x4a7   :  { %2352 = vmatpush.msrb.mxu1 %v4832_v48  ;;  %v2391_v48 = vld [vmem:[%s5038_s2 + $0x5e8] sm:$0xff] }
 0x4a9   :  { %2353 = vmatpush.msrb.mxu1 %v4841_v14  ;;  %v2390_v14 = vld [vmem:[%s5038_s2 + $0x5e0] sm:$0xff] }
 0x4ab   :  { %2354 = vmatpush.msrb.mxu1 %v4850_v13  ;;  %v2408_v13 = vld [vmem:[%s5038_s2 + $0x670] sm:$0xff] }
 0x4ad   :  { %2355 = vmatpush.msrb.mxu1 %v4859_v8  ;;  %v2406_v8 = vld [vmem:[%s5038_s2 + $0x660] sm:$0xff] }
 0x4ae   :  { %v1968_v36 = vpop.f32.mrf.mxu1 }
 0x4af   :  { %v1969_v54 = vadd.f32 %v1968_v36, %v1932_v10  ;;  %2356 = vmatpush.msrb.mxu1 %v2191_v34 }
 0x4b1   :  { %2357 = vmatpush.msrb.mxu1 %v2189_v7 }
 0x4b3   :  { %2358 = vmatpush.msrb.mxu1 %v2187_v1 }
 0x4b4   :  { %v1988_v3 = vpop.f32.mrf.mxu2 }
 0x4b5   :  { %v1989_v55 = vadd.f32 %v1988_v3, %v1969_v54  ;;  %v2008_v51 = vpop.f32.mrf.mxu3  ;;  %2359 = vmatpush.msrb.mxu1 %v2185_v62 }
 0x4b7   :  { %v2009_v47 = vadd.f32 %v2008_v51, %v1989_v55  ;;  %v2028_v2 = vpop.f32.mrf.mxu1  ;;  %2360 = vmatpush.msrb.mxu1 %v2183_v63  ;;  %v4937_v51 = vld [vmem:[%s5039_s3 + $0x610] ss:$8 sm:$0x3] }
 0x4b9   :  { %v2029_v11 = vadd.f32 %v2028_v2, %v2009_v47  ;;  %2361 = vmatpush.msrb.mxu1 %v2181_v19  ;;  %v2259_v47 = vperm.slane %v4937_v51, 1 }
 0x4bb   :  { %2362 = vmatpush.msrb.mxu1 %v2179_v50 }
 0x4bd   :  { %v2048_v49 = vpop.f32.mrf.mxu2  ;;  %2363 = vmatpush.msrb.mxu1 %v2177_v46 }
 0x4be   :  { %v4755_v37 = vadd.f32 %v2048_v49, %v2029_v11  ;;  %v2068_v53 = vpop.f32.mrf.mxu3 }
 0x4bf   :  { %v2069_v15 = vadd.f32 %v2068_v53, %v1933_v39  ;;  %v2413_v39 = vld [vmem:[%s5038_s2 + $0x698] sm:$0xff]  ;;  %v2412_v53 = vld [vmem:[%s5038_s2 + $0x690] sm:$0xff] }
 0x4c0   :  { %2232 = vmatmul.f32.vlgmr.msra.gmra.mxu2 %v4755_v37 }
 0x4c1   :  { %2368 = vmatpush.msra.mxu2 %v2208_v30 }
 0x4c3   :  { %2369 = vmatpush.msra.mxu2 %v2206_v31 }
 0x4c5   :  { %2370 = vmatpush.msra.mxu2 %v2204_v33 }
 0x4c7   :  { %2371 = vmatpush.msra.mxu2 %v2202_v27  ;;  %v2411_v27 = vld [vmem:[%s5038_s2 + $0x688] sm:$0xff] }
 0x4c9   :  { %2372 = vmatpush.msra.mxu2 %v2200_v16  ;;  %v2410_v16 = vld [vmem:[%s5038_s2 + $0x680] sm:$0xff] }
 0x4cb   :  { %2373 = vmatpush.msra.mxu2 %v2198_v56  ;;  %v2409_v56 = vld [vmem:[%s5038_s2 + $0x678] sm:$0xff] }
 0x4cd   :  { %2374 = vmatpush.msra.mxu2 %v2196_v52  ;;  %v2407_v52 = vld [vmem:[%s5038_s2 + $0x668] sm:$0xff] }
 0x4cf   :  { %2375 = vmatpush.msra.mxu2 %v2194_v28 }
 0x4d0   :  { %v2088_v18 = vpop.f32.mrf.mxu1 }
 0x4d1   :  { %v2089_v25 = vadd.f32 %v2088_v18, %v2069_v15  ;;  %2376 = vmatpush.msra.mxu2 %v2192_v21  ;;  %v2401_v18 = vld [vmem:[%s5038_s2 + $0x638] sm:$0xff]  ;;  %v2400_v15 = vld [vmem:[%s5038_s2 + $0x630] sm:$0xff] }
 0x4d3   :  { %2377 = vmatpush.msra.mxu2 %v2190_v42 }
 0x4d5   :  { %2378 = vmatpush.msra.mxu2 %v2188_v43  ;;  %v2518_v43 = vld [vmem:[%s5038_s2 + $0x6a8] ss:$0 sm:$0xff] }
 0x4d6   :  { %v2108_v40 = vpop.f32.mrf.mxu2 }
 0x4d7   :  { %v2109_v23 = vadd.f32 %v2108_v40, %v2089_v25  ;;  %v2128_v20 = vpop.f32.mrf.mxu3  ;;  %2379 = vmatpush.msra.mxu2 %v2186_v9  ;;  %v2399_v40 = vld [vmem:[%s5038_s2 + $0x628] sm:$0xff]  ;;  %v2398_v25 = vld [vmem:[%s5038_s2 + $0x620] sm:$0xff] }
 0x4d9   :  { %v2129_v22 = vadd.f32 %v2128_v20, %v2109_v23  ;;  %2380 = vmatpush.msra.mxu2 %v2184_v57  ;;  %v2397_v23 = vld [vmem:[%s5038_s2 + $0x618] sm:$0xff]  ;;  %v2396_v20 = vld [vmem:[%s5038_s2 + $0x610] sm:$0xff] }
 0x4db   :  { %2381 = vmatpush.msra.mxu2 %v2182_v29 }
 0x4dd   :  { %2382 = vmatpush.msra.mxu2 %v2180_v61 }
 0x4df   :  { %2383 = vmatpush.msra.mxu2 %v2178_v58 }
 0x4f0   :  { %v2148_v44 = vpop.f32.mrf.mxu1 }
 0x4f1   :  { %v4790_v32 = vadd.f32 %v2148_v44, %v2129_v22  ;;  %v2395_v22 = vld [vmem:[%s5038_s2 + $0x608] sm:$0xff]  ;;  %v2394_v44 = vld [vmem:[%s5038_s2 + $0x600] sm:$0xff] }
 0x4f3   :  { %2479 = vmatmul.msk.f32.vlgmr.msrb.gmra.mxu3 %vm2212_vm1, %v4790_v32 }
 0x4f4   :  { %2334 = vmatpush.msrb.mxu3 %v4736_v45 }
 0x4f6   :  { %2335 = vmatpush.msrb.mxu3 %v4741_v59 }
 0x4f8   :  { %2336 = vmatpush.msrb.mxu3 %v4747_v17  ;;  %v2258_v17 = vperm.slane %v4937_v51, 0 }
 0x4fa   :  { %2337 = vmatpush.msrb.mxu3 %v4753_v0 }
 0x4fc   :  { %2338 = vmatpush.msrb.mxu3 %v4761_v4  ;;  %v2405_v4 = vld [vmem:[%s5038_s2 + $0x658] sm:$0xff] }
 0x4fe   :  { %2339 = vmatpush.msrb.mxu3 %v4768_v6  ;;  %v2404_v6 = vld [vmem:[%s5038_s2 + $0x650] sm:$0xff] }
 0x500   :  { %2340 = vmatpush.msrb.mxu3 %v4774_v38  ;;  %v2403_v38 = vld [vmem:[%s5038_s2 + $0x648] sm:$0xff] }
 0x502   :  { %2341 = vmatpush.msrb.mxu3 %v4781_v60  ;;  %v2414_v60 = vld [vmem:[%s5038_s2 + $0x6a0] sm:$0xff] }
 0x504   :  { %2342 = vmatpush.msrb.mxu3 %v4786_v35  ;;  %v2402_v35 = vld [vmem:[%s5038_s2 + $0x640] sm:$0xff] }
 0x543   :  { %v2233_v10 = vpop.f32.mrf.mxu2 }
 0x544   :  { %v2234_v36 = vadd.f32 %v2517_v26, %v2233_v10 }
 0x576   :  { %v2253_v54 = vpop.f32.mrf.mxu3 }
 0x577   :  { %v2254_v3 = vadd.f32 %v2253_v54, %v2234_v36 }
 0x579   :  { %v2256_v55 = vmax.f32 %v2254_v3, 0.0 }
 0x57b   :  { %2278 = vmatmul.f32.vlgmr.msra.gmra.mxu3 %v2256_v55  ;;  %2298 = vmatmul.f32.vlgmr.msra.gmra.mxu1 %v2256_v55 }
 0x57c   :  { %2420 = vmatpush.msra.mxu3 %v2405_v4  ;;  %2447 = vmatpush.msra.mxu1 %v2414_v60 }
 0x57e   :  { %2421 = vmatpush.msra.mxu3 %v2404_v6  ;;  %2448 = vmatpush.msra.mxu1 %v2413_v39 }
 0x580   :  { %2422 = vmatpush.msra.mxu3 %v2403_v38  ;;  %2449 = vmatpush.msra.mxu1 %v2412_v53 }
 0x582   :  { %2423 = vmatpush.msra.mxu3 %v2402_v35  ;;  %2450 = vmatpush.msra.mxu1 %v2411_v27 }
 0x584   :  { %2424 = vmatpush.msra.mxu3 %v2401_v18  ;;  %2451 = vmatpush.msra.mxu1 %v2410_v16 }
 0x586   :  { %2425 = vmatpush.msra.mxu3 %v2400_v15  ;;  %2452 = vmatpush.msra.mxu1 %v2409_v56 }
 0x588   :  { %2426 = vmatpush.msra.mxu3 %v2399_v40  ;;  %2453 = vmatpush.msra.mxu1 %v2408_v13 }
 0x58a   :  { %2427 = vmatpush.msra.mxu3 %v2398_v25  ;;  %2454 = vmatpush.msra.mxu1 %v2407_v52 }
 0x58c   :  { %2428 = vmatpush.msra.mxu3 %v2397_v23  ;;  %2455 = vmatpush.msra.mxu1 %v2406_v8 }
 0x58e   :  { %2429 = vmatpush.msra.mxu3 %v2396_v20 }
 0x590   :  { %2430 = vmatpush.msra.mxu3 %v2395_v22 }
 0x592   :  { %2431 = vmatpush.msra.mxu3 %v2394_v44 }
 0x594   :  { %2432 = vmatpush.msra.mxu3 %v2393_v24 }
 0x596   :  { %2433 = vmatpush.msra.mxu3 %v2392_v5 }
 0x598   :  { %2434 = vmatpush.msra.mxu3 %v2391_v48 }
 0x59a   :  { %2435 = vmatpush.msra.mxu3 %v2390_v14 }
 0x5f8   :  { %v2299_v45 = vpop.f32.mrf.mxu1 }
 0x5f9   :  { %v2300_v59 = vadd.f32 %v2299_v45, %v2259_v47 }
 0x5fb   :  { %v2303_v2 = vadd.f32 %v2300_v59, %v4790_v32 }
 0x5fd   :  { %2480 = vmatmul.msk.f32.vlgmr.msrb.gmra.mxu3 %vm2212_vm1, %v2303_v2 }
 0x5fe   :  { %v2279_v11 = vpop.f32.mrf.mxu3 }
 0x5ff   :  { %v2280_v49 = vadd.f32 %v2279_v11, %v2258_v17 }
 0x601   :  { %v2302_v0 = vadd.f32 %v2280_v49, %v4755_v37 }
 0x603   :  { %2323 = vmatmul.f32.vlgmr.msrb.gmra.mxu2 %v2302_v0 }
 0x680   :  { %v2344_v31 = vpop.f32.mrf.mxu3 }
 0x686   :  { %v2324_v30 = vpop.f32.mrf.mxu2 }
 0x687   :  { %v2325_v41 = vadd.f32 %v2517_v26, %v2324_v30 }
 0x689   :  { %v2345_v12 = vadd.f32 %v2344_v31, %v2325_v41 }
 0x68b   :  { %v2347_v33 = vmax.f32 %v2345_v12, 0.0 }
 0x68d   :  { %2364 = vmatmul.f32.vlgmr.msrb.gmra.mxu1 %v2347_v33  ;;  %2384 = vmatmul.f32.vlgmr.msra.gmra.mxu2 %v2347_v33 }
 0x70a   :  { %v2365_v28 = vpop.f32.mrf.mxu1 }
 0x70b   :  { %v2366_v34 = vadd.f32 %v2365_v28, %v2258_v17 }
 0x70d   :  { %v2388_v21 = vadd.f32 %v2366_v34, %v4755_v37 }
 0x70f   :  { %2436 = vmatmul.f32.vlgmr.msra.gmra.mxu3 %v2388_v21 }
 0x710   :  { %v2385_v7 = vpop.f32.mrf.mxu2 }
 0x711   :  { %v2386_v42 = vadd.f32 %v2385_v7, %v2259_v47 }
 0x713   :  { %v2389_v1 = vadd.f32 %v2386_v42, %v4790_v32 }
 0x715   :  { %2481 = vmatmul.msk.f32.vlgmr.msra.gmra.mxu1 %vm2212_vm1, %v2389_v1 }
 0x792   :  { %v2437_v62 = vpop.f32.mrf.mxu3  ;;  %v2457_v9 = vpop.f32.mrf.mxu1 }
 0x793   :  { %v2438_v37 = vadd.f32 %v2518_v43, %v2437_v62 }
 0x795   :  { %v2458_v63 = vadd.f32 %v2457_v9, %v2438_v37 }
 0x797   :  { %2460 = vst [vmem:[#allocation6] sm:$0x3] %v2458_v63 }
 0x798   :  { %2471 = dma.vmem_to_hbm [thread:$0]  %s2467_s26, 32, %s2469_s28, [#allocation7]  }
 0x799   :  { %2546 = dma.done.wait [#allocation7], 32  }
 0x79a   :  { %2547 = vsyncadd [#allocation7], 4294967264 }
 0x79b   :  { %2476 = vsyncpa [#allocation7], 1 }

</bundles_post_ra>
